<compile_context>
chip_gen: v5e
topology: v5e:2x2
jax: 0.10.0
libtpu: 0.0.40
codegen_flags: <defaults>
</compile_context>

<pallas_src>
import functools
import math

import jax
import jax.numpy as jnp
from jax.experimental import pallas as pl
from jax.experimental.pallas import tpu as pltpu


# ----------------------------- Pallas kernel: batched KernelMLP edge message -----------------------------

def _knet_msg_kernel(sph_ref, xj_ref, w0_ref, b0_ref, w1_ref, b1_ref,
                     w2_ref, b2_ref, wl_ref, bl_ref, sred_ref, msg_ref, *, n_out):
    # Transposed, lane-dense layout: every slab is (features, e_tile); omega is
    # pre-folded into the SIREN weight/bias slabs, so no in-kernel omega multiply.
    f32 = jnp.float32
    h = jnp.sin(jnp.dot(w0_ref[...], sph_ref[...], preferred_element_type=f32) + b0_ref[...])
    h = jnp.sin(jnp.dot(w1_ref[...], h, preferred_element_type=f32) + b1_ref[...])
    h = jnp.sin(jnp.dot(w2_ref[...], h, preferred_element_type=f32) + b2_ref[...])
    k = jnp.dot(wl_ref[...], h, preferred_element_type=f32) + bl_ref[...]        # (C*IN, T)
    xt = jnp.tile(xj_ref[...], (n_out, 1))                                       # (C*IN, T) sublane tile (XLU), no MXU waste
    msg_ref[...] = jnp.dot(sred_ref[...], k * xt, preferred_element_type=f32)    # (C, T) lane-dense store


def knet_message_pallas(sph_t, xj_t, slabs, *, e_tile, vmem_limit_bytes):
    """msg[c, e] = sum_i KernelMLP(sph[:, e], c)_i * x_j[i, e], for all edges/channels."""
    in_sz, e_pad = xj_t.shape
    c, ci = slabs['sred'].shape
    ch = slabs['w1'].shape[0]

    const = lambda shape: pl.BlockSpec(shape, lambda i: (0, 0))   # weight slabs resident in VMEM
    grid = (e_pad // e_tile,)

    flops = e_pad * (2 * ch * 3 + 2 * ch * ch * 2 + 2 * ci * ch + ci + 2 * c * ci)
    cost = pl.CostEstimate(flops=int(flops),
                           transcendentals=int(3 * e_pad * ch),
                           bytes_accessed=int(4 * e_pad * (3 + in_sz + c)))

    return pl.pallas_call(
        functools.partial(_knet_msg_kernel, n_out=c),
        out_shape=jax.ShapeDtypeStruct((c, e_pad), jnp.float32),
        grid=grid,
        in_specs=[pl.BlockSpec((3, e_tile), lambda i: (0, i)),      # sph tile, edges on lanes
                  pl.BlockSpec((in_sz, e_tile), lambda i: (0, i)),  # gathered x_j tile
                  const((ch, 3)), const((ch, 1)),
                  const((ch, ch)), const((ch, 1)),
                  const((ch, ch)), const((ch, 1)),
                  const((ci, ch)), const((ci, 1)),
                  const((c, ci))],
        out_specs=pl.BlockSpec((c, e_tile), lambda i: (0, i)),
        compiler_params=pltpu.CompilerParams(
            dimension_semantics=("parallel",),                      # shard edge tiles across TCs (v7x)
            vmem_limit_bytes=int(vmem_limit_bytes)),
        cost_estimate=cost,
    )(sph_t, xj_t, slabs['w0'], slabs['b0'], slabs['w1'], slabs['b1'],
      slabs['w2'], slabs['b2'], slabs['wl'], slabs['bl'], slabs['sred'])


# ----------------------------- once-per-params slab preparation -----------------------------

def prepare_conv_slabs(cp, *, omega):
    """Build transposed, omega-folded, block-diagonal weight slabs once per parameter set
    (hoisted out of the per-forward path; each ERDB forward reuses them 6x)."""
    kp = cp['knet']
    hid = kp['w1'].shape[0]
    in_sz = kp['wl'].shape[1]
    c = cp['bias'].shape[1]
    om = jnp.float32(omega)
    eye_c = jnp.eye(c, dtype=jnp.float32)
    chan = jnp.arange(c, dtype=jnp.float32)[:, None]                       # (C, 1)

    w0_geo = kp['w0'][:3, :]                                               # (3, H)
    w0_ch = kp['w0'][3, :]                                                 # (H,)
    slabs = dict(
        # SIREN layer 0: geometric weights replicated per channel; the channel index
        # (4th SIREN input) and omega are folded into the bias / weights.
        w0=om * jnp.tile(w0_geo.T, (c, 1)),                                # (C*H, 3)
        b0=(om * (kp['b0'][0][None, :] + chan * w0_ch[None, :])).reshape(c * hid, 1),
        # SIREN layers 1/2 + final linear as block-diagonal kron(I_C, W.T): one MXU
        # matmul applies the per-channel MLP to all channels at once.
        w1=om * jnp.kron(eye_c, kp['w1'].T), b1=om * jnp.tile(kp['b1'].T, (c, 1)),
        w2=om * jnp.kron(eye_c, kp['w2'].T), b2=om * jnp.tile(kp['b2'].T, (c, 1)),
        wl=jnp.kron(eye_c, kp['wl'].T),      bl=jnp.tile(kp['bl'].T, (c, 1)),
        # Per-channel reduction sum_i k[c,i]*x_j[i] as one matmul with a 0/1 selector.
        sred=jnp.kron(eye_c, jnp.ones((1, in_sz), jnp.float32)),           # (C, C*IN)
    )
    # TODO(synk): for C*H >= 256 the kron block-diagonal scheme wastes MXU work / VMEM
    # quadratically; switch to per-channel (H,H) matmuls with the channel axis on sublanes.
    return dict(slabs=slabs, bias=cp['bias'])


def prepare_erdb_params(params, *, omega=100.0):
    prep = lambda rp: {name: prepare_conv_slabs(cp, omega=omega) for name, cp in rp.items()}
    return dict(rdb1=prep(params['rdb1']), rdb2=prep(params['rdb2']))


# ----------------------------- JAX glue (graph ops) -----------------------------

def _round_up(a, b):
    return ((a + b - 1) // b) * b


def build_edge_geometry(edge_index, pos, num_nodes, *, max_tile=4096, vmem_limit_mb=48):
    """Add self loops, compute spherical edge features once per forward, pad the edge axis
    to a multiple of a large lane-dense tile.  `max_tile` is the tuning knob: sweep
    2048-8192 on v6e (128 MiB VMEM), cap ~4096 on v7x (64 MiB VMEM), 2048-4096 on v5e
    together with the raised scoped-VMEM limit."""
    assert max_tile % 128 == 0 and max_tile >= 128
    loops = jnp.arange(num_nodes, dtype=edge_index.dtype)
    src = jnp.concatenate([edge_index[0], loops])
    dst = jnp.concatenate([edge_index[1], loops])
    rel = pos[dst] - pos[src]                                  # get_edge_attr
    rho = jnp.sqrt(jnp.sum(rel * rel, axis=1))
    theta = jnp.arctan2(rel[:, 1], rel[:, 0])
    phi = jnp.arcsin(rel[:, 2] / rho)                          # NaN on zero-length edges (self loops)
    nanm = jnp.isnan(phi)
    theta = jnp.where(nanm, 0.0, theta)
    phi = jnp.where(nanm, 0.0, phi)
    sph = jnp.stack([rho, theta / jnp.pi, phi / jnp.pi], axis=1)   # (E, 3)

    e_total = int(src.shape[0])
    e_tile = min(max_tile, _round_up(e_total, 128))            # lane axis: multiple of 128
    e_pad = _round_up(e_total, e_tile)
    pad = e_pad - e_total
    sph_t = jnp.pad(sph, ((0, pad), (0, 0))).T                 # (3, E_pad): edges on lanes
    src = jnp.pad(src, (0, pad))
    dst = jnp.pad(dst, (0, pad))
    mask = jnp.pad(jnp.ones((e_total,), jnp.float32), (0, pad))
    return dict(src=src, dst=dst, sph_t=sph_t, mask=mask, num_nodes=num_nodes,
                e_tile=e_tile, vmem_limit_bytes=vmem_limit_mb * 1024 * 1024)


def graph_kernel_conv(prep, x, geo):
    x_j = x[geo['src']] * geo['mask'][:, None]                 # padded edges contribute exactly 0
    msg_t = knet_message_pallas(geo['sph_t'], x_j.T, prep['slabs'],
                                e_tile=geo['e_tile'],
                                vmem_limit_bytes=geo['vmem_limit_bytes'])
    # TODO(synk): scatter-add aggregation (PyG aggr='add') and the gathers stay in plain JAX;
    # on large graphs profile segment_sum — it can dominate the message kernel.
    agg = jax.ops.segment_sum(msg_t.T, geo['dst'], num_segments=geo['num_nodes'])
    return agg + prep['bias']


def rdb_forward(rp, x, geo, *, beta):
    x1 = jax.nn.selu(graph_kernel_conv(rp['conv1'], x, geo))
    x2 = jax.nn.selu(graph_kernel_conv(rp['conv2'], jnp.concatenate([x, x1], axis=1), geo))
    x3 = jax.nn.selu(graph_kernel_conv(rp['conv3'], jnp.concatenate([x, x1, x2], axis=1), geo))
    return x + beta * x3


def erdb_forward(prepared, x, edge_index, pos, *, beta=0.2, max_tile=4096, vmem_limit_mb=48):
    geo = build_edge_geometry(edge_index, pos, x.shape[0],
                              max_tile=max_tile, vmem_limit_mb=vmem_limit_mb)
    x1 = rdb_forward(prepared['rdb1'], x, geo, beta=beta)
    x2 = rdb_forward(prepared['rdb2'], x + beta * x1, geo, beta=beta)
    return x + beta * x2


# ----------------------------- deterministic parameter init -----------------------------

def _uniform(key, shape, lim):
    return jax.random.uniform(key, shape, dtype=jnp.float32, minval=-lim, maxval=lim)


def _init_sine_layer(key, fan_in, fan_out):
    kw, kb = jax.random.split(key)
    return (_uniform(kw, (fan_in, fan_out), 1.0 / fan_in),
            _uniform(kb, (1, fan_out), 1.0 / math.sqrt(fan_in)))


def _init_linear(key, fan_in, fan_out):
    kw, kb = jax.random.split(key)
    lim = 1.0 / math.sqrt(fan_in)
    return _uniform(kw, (fan_in, fan_out), lim), _uniform(kb, (1, fan_out), lim)


def _init_graph_kernel_conv(key, dim, in_channels, hidden_channels, out_channels):
    k0, k1, k2, kl = jax.random.split(key, 4)
    w0, b0 = _init_sine_layer(k0, dim + 1, hidden_channels)
    w1, b1 = _init_sine_layer(k1, hidden_channels, hidden_channels)
    w2, b2 = _init_sine_layer(k2, hidden_channels, hidden_channels)
    wl, bl = _init_linear(kl, hidden_channels, in_channels)
    return dict(knet=dict(w0=w0, b0=b0, w1=w1, b1=b1, w2=w2, b2=b2, wl=wl, bl=bl),
                bias=jnp.zeros((1, out_channels), jnp.float32))


def _init_rdb(key, dim, in_channels, growth_channels):
    k1, k2, k3 = jax.random.split(key, 3)
    return dict(
        conv1=_init_graph_kernel_conv(k1, dim, in_channels, in_channels, growth_channels),
        conv2=_init_graph_kernel_conv(k2, dim, in_channels + growth_channels,
                                      in_channels, growth_channels),
        conv3=_init_graph_kernel_conv(k3, dim, in_channels + 2 * growth_channels,
                                      in_channels, in_channels),
    )


def init_erdb_params(key, *, dim, in_channels, growth_channels):
    k1, k2 = jax.random.split(key)
    return dict(rdb1=_init_rdb(k1, dim, in_channels, growth_channels),
                rdb2=_init_rdb(k2, dim, in_channels, growth_channels))


# ----------------------------- demo -----------------------------

if __name__ == "__main__":
    DIM = 3            # positions are 3-D (KernelMLP uses spherical coordinates)
    IN_CH = 8          # node feature channels
    GROWTH = 8         # growth channels
    N = 16             # nodes
    BETA = 0.2

    key = jax.random.PRNGKey(0)
    kx, kp, kparam = jax.random.split(key, 3)
    x = jax.random.uniform(kx, (N, IN_CH), dtype=jnp.float32)
    pos = jax.random.uniform(kp, (N, DIM), dtype=jnp.float32)

    idx = jnp.arange(N, dtype=jnp.int32)                       # ring graph, no self loops
    src = jnp.concatenate([idx, (idx + 1) % N])
    dst = jnp.concatenate([(idx + 1) % N, idx])
    edge_index = jnp.stack([src, dst], axis=0)                 # (2, 2N)

    params = init_erdb_params(kparam, dim=DIM, in_channels=IN_CH, growth_channels=GROWTH)
    prepared = prepare_erdb_params(params, omega=100.0)        # slab construction hoisted here

    out = erdb_forward(prepared, x, edge_index, pos, beta=BETA)
    out = jax.block_until_ready(out)

    assert out.shape == (N, IN_CH), out.shape
    assert bool(jnp.all(jnp.isfinite(out)))
    print("KERNEL_OK")
</pallas_src>

<mosaic_0001>
module attributes {stable_mosaic.version = 11 : i64} {
  func.func @_knet_msg_kernel(%arg0: i32, %arg1: memref<3x128xf32, #tpu.memory_space<vmem>>, %arg2: memref<8x128xf32, #tpu.memory_space<vmem>>, %arg3: memref<64x3xf32, #tpu.memory_space<vmem>>, %arg4: memref<64x1xf32, #tpu.memory_space<vmem>>, %arg5: memref<64x64xf32, #tpu.memory_space<vmem>>, %arg6: memref<64x1xf32, #tpu.memory_space<vmem>>, %arg7: memref<64x64xf32, #tpu.memory_space<vmem>>, %arg8: memref<64x1xf32, #tpu.memory_space<vmem>>, %arg9: memref<64x64xf32, #tpu.memory_space<vmem>>, %arg10: memref<64x1xf32, #tpu.memory_space<vmem>>, %arg11: memref<8x64xf32, #tpu.memory_space<vmem>>, %arg12: memref<8x128xf32, #tpu.memory_space<vmem>>) attributes {dimension_semantics = [#tpu.dimension_semantics<parallel>], iteration_bounds = array<i64: 1>, scalar_prefetch = 0 : i64, scratch_operands = 0 : i64, tpu.core_type = #tpu.core_type<tc>, window_params = [{transform_indices = @transform_0, window_bounds = array<i64: 3, 128>}, {transform_indices = @transform_1, window_bounds = array<i64: 8, 128>}, {pipeline_mode = #tpu.pipeline_mode<synchronous>, transform_indices = @transform_2, window_bounds = array<i64: 64, 3>}, {pipeline_mode = #tpu.pipeline_mode<synchronous>, transform_indices = @transform_3, window_bounds = array<i64: 64, 1>}, {pipeline_mode = #tpu.pipeline_mode<synchronous>, transform_indices = @transform_4, window_bounds = array<i64: 64, 64>}, {pipeline_mode = #tpu.pipeline_mode<synchronous>, transform_indices = @transform_5, window_bounds = array<i64: 64, 1>}, {pipeline_mode = #tpu.pipeline_mode<synchronous>, transform_indices = @transform_6, window_bounds = array<i64: 64, 64>}, {pipeline_mode = #tpu.pipeline_mode<synchronous>, transform_indices = @transform_7, window_bounds = array<i64: 64, 1>}, {pipeline_mode = #tpu.pipeline_mode<synchronous>, transform_indices = @transform_8, window_bounds = array<i64: 64, 64>}, {pipeline_mode = #tpu.pipeline_mode<synchronous>, transform_indices = @transform_9, window_bounds = array<i64: 64, 1>}, {pipeline_mode = #tpu.pipeline_mode<synchronous>, transform_indices = @transform_10, window_bounds = array<i64: 8, 64>}, {transform_indices = @transform_11, window_bounds = array<i64: 8, 128>}]} {
    %c0 = arith.constant 0 : index
    %c0_0 = arith.constant 0 : index
    %0 = vector.load %arg3[%c0, %c0_0] : memref<64x3xf32, #tpu.memory_space<vmem>>, vector<64x3xf32>
    %c0_1 = arith.constant 0 : index
    %c0_2 = arith.constant 0 : index
    %1 = vector.load %arg1[%c0_1, %c0_2] : memref<3x128xf32, #tpu.memory_space<vmem>>, vector<3x128xf32>
    %cst = arith.constant dense<0.000000e+00> : vector<64x128xf32>
    %2 = tpu.matmul %0, %1, %cst {dimension_numbers = #tpu.dot_dimension_numbers<[1], [0], [0], [1], [0, 0, 1, 1], [], []>} : vector<64x3xf32>, vector<3x128xf32>, vector<64x128xf32> -> vector<64x128xf32>
    %c0_3 = arith.constant 0 : index
    %c0_4 = arith.constant 0 : index
    %3 = vector.load %arg4[%c0_3, %c0_4] : memref<64x1xf32, #tpu.memory_space<vmem>>, vector<64x1xf32>
    %4 = vector.broadcast %3 : vector<64x1xf32> to vector<64x128xf32>
    %5 = arith.addf %2, %4 : vector<64x128xf32>
    %6 = math.sin %5 : vector<64x128xf32>
    %c0_5 = arith.constant 0 : index
    %c0_6 = arith.constant 0 : index
    %7 = vector.load %arg5[%c0_5, %c0_6] : memref<64x64xf32, #tpu.memory_space<vmem>>, vector<64x64xf32>
    %cst_7 = arith.constant dense<0.000000e+00> : vector<64x128xf32>
    %8 = tpu.matmul %7, %6, %cst_7 {dimension_numbers = #tpu.dot_dimension_numbers<[1], [0], [0], [1], [0, 0, 1, 1], [], []>} : vector<64x64xf32>, vector<64x128xf32>, vector<64x128xf32> -> vector<64x128xf32>
    %c0_8 = arith.constant 0 : index
    %c0_9 = arith.constant 0 : index
    %9 = vector.load %arg6[%c0_8, %c0_9] : memref<64x1xf32, #tpu.memory_space<vmem>>, vector<64x1xf32>
    %10 = vector.broadcast %9 : vector<64x1xf32> to vector<64x128xf32>
    %11 = arith.addf %8, %10 : vector<64x128xf32>
    %12 = math.sin %11 : vector<64x128xf32>
    %c0_10 = arith.constant 0 : index
    %c0_11 = arith.constant 0 : index
    %13 = vector.load %arg7[%c0_10, %c0_11] : memref<64x64xf32, #tpu.memory_space<vmem>>, vector<64x64xf32>
    %cst_12 = arith.constant dense<0.000000e+00> : vector<64x128xf32>
    %14 = tpu.matmul %13, %12, %cst_12 {dimension_numbers = #tpu.dot_dimension_numbers<[1], [0], [0], [1], [0, 0, 1, 1], [], []>} : vector<64x64xf32>, vector<64x128xf32>, vector<64x128xf32> -> vector<64x128xf32>
    %c0_13 = arith.constant 0 : index
    %c0_14 = arith.constant 0 : index
    %15 = vector.load %arg8[%c0_13, %c0_14] : memref<64x1xf32, #tpu.memory_space<vmem>>, vector<64x1xf32>
    %16 = vector.broadcast %15 : vector<64x1xf32> to vector<64x128xf32>
    %17 = arith.addf %14, %16 : vector<64x128xf32>
    %18 = math.sin %17 : vector<64x128xf32>
    %c0_15 = arith.constant 0 : index
    %c0_16 = arith.constant 0 : index
    %19 = vector.load %arg9[%c0_15, %c0_16] : memref<64x64xf32, #tpu.memory_space<vmem>>, vector<64x64xf32>
    %cst_17 = arith.constant dense<0.000000e+00> : vector<64x128xf32>
    %20 = tpu.matmul %19, %18, %cst_17 {dimension_numbers = #tpu.dot_dimension_numbers<[1], [0], [0], [1], [0, 0, 1, 1], [], []>} : vector<64x64xf32>, vector<64x128xf32>, vector<64x128xf32> -> vector<64x128xf32>
    %c0_18 = arith.constant 0 : index
    %c0_19 = arith.constant 0 : index
    %21 = vector.load %arg10[%c0_18, %c0_19] : memref<64x1xf32, #tpu.memory_space<vmem>>, vector<64x1xf32>
    %22 = vector.broadcast %21 : vector<64x1xf32> to vector<64x128xf32>
    %23 = arith.addf %20, %22 : vector<64x128xf32>
    %c0_20 = arith.constant 0 : index
    %c0_21 = arith.constant 0 : index
    %24 = vector.load %arg2[%c0_20, %c0_21] : memref<8x128xf32, #tpu.memory_space<vmem>>, vector<8x128xf32>
    %25 = tpu.concatenate %24, %24, %24, %24, %24, %24, %24, %24 in 0 : vector<8x128xf32>, vector<8x128xf32>, vector<8x128xf32>, vector<8x128xf32>, vector<8x128xf32>, vector<8x128xf32>, vector<8x128xf32>, vector<8x128xf32> -> vector<64x128xf32>
    %c0_22 = arith.constant 0 : index
    %c0_23 = arith.constant 0 : index
    %26 = vector.load %arg11[%c0_22, %c0_23] : memref<8x64xf32, #tpu.memory_space<vmem>>, vector<8x64xf32>
    %27 = arith.mulf %23, %25 : vector<64x128xf32>
    %cst_24 = arith.constant dense<0.000000e+00> : vector<8x128xf32>
    %28 = tpu.matmul %26, %27, %cst_24 {dimension_numbers = #tpu.dot_dimension_numbers<[1], [0], [0], [1], [0, 0, 1, 1], [], []>} : vector<8x64xf32>, vector<64x128xf32>, vector<8x128xf32> -> vector<8x128xf32>
    %c0_25 = arith.constant 0 : index
    %c0_26 = arith.constant 0 : index
    %29 = vector.load %arg12[%c0_25, %c0_26] : memref<8x128xf32, #tpu.memory_space<vmem>>, vector<8x128xf32>
    tpu.vector_store %arg12[%c0_25, %c0_26], %28 {strides = array<i32>} : memref<8x128xf32, #tpu.memory_space<vmem>>, vector<8x128xf32>,
    return
  }
  func.func @transform_0(%arg0: i32) -> (i32, i32) {
    %c0_i32 = arith.constant 0 : i32
    %c0_i32_0 = arith.constant 0 : i32
    return %c0_i32, %arg0 : i32, i32
  }
  func.func @transform_1(%arg0: i32) -> (i32, i32) {
    %c0_i32 = arith.constant 0 : i32
    %c0_i32_0 = arith.constant 0 : i32
    return %c0_i32, %arg0 : i32, i32
  }
  func.func @transform_2(%arg0: i32) -> (i32, i32) {
    %c0_i32 = arith.constant 0 : i32
    %c0_i32_0 = arith.constant 0 : i32
    %c0_i32_1 = arith.constant 0 : i32
    return %c0_i32, %c0_i32_0 : i32, i32
  }
  func.func @transform_3(%arg0: i32) -> (i32, i32) {
    %c0_i32 = arith.constant 0 : i32
    %c0_i32_0 = arith.constant 0 : i32
    %c0_i32_1 = arith.constant 0 : i32
    return %c0_i32, %c0_i32_0 : i32, i32
  }
  func.func @transform_4(%arg0: i32) -> (i32, i32) {
    %c0_i32 = arith.constant 0 : i32
    %c0_i32_0 = arith.constant 0 : i32
    %c0_i32_1 = arith.constant 0 : i32
    return %c0_i32, %c0_i32_0 : i32, i32
  }
  func.func @transform_5(%arg0: i32) -> (i32, i32) {
    %c0_i32 = arith.constant 0 : i32
    %c0_i32_0 = arith.constant 0 : i32
    %c0_i32_1 = arith.constant 0 : i32
    return %c0_i32, %c0_i32_0 : i32, i32
  }
  func.func @transform_6(%arg0: i32) -> (i32, i32) {
    %c0_i32 = arith.constant 0 : i32
    %c0_i32_0 = arith.constant 0 : i32
    %c0_i32_1 = arith.constant 0 : i32
    return %c0_i32, %c0_i32_0 : i32, i32
  }
  func.func @transform_7(%arg0: i32) -> (i32, i32) {
    %c0_i32 = arith.constant 0 : i32
    %c0_i32_0 = arith.constant 0 : i32
    %c0_i32_1 = arith.constant 0 : i32
    return %c0_i32, %c0_i32_0 : i32, i32
  }
  func.func @transform_8(%arg0: i32) -> (i32, i32) {
    %c0_i32 = arith.constant 0 : i32
    %c0_i32_0 = arith.constant 0 : i32
    %c0_i32_1 = arith.constant 0 : i32
    return %c0_i32, %c0_i32_0 : i32, i32
  }
  func.func @transform_9(%arg0: i32) -> (i32, i32) {
    %c0_i32 = arith.constant 0 : i32
    %c0_i32_0 = arith.constant 0 : i32
    %c0_i32_1 = arith.constant 0 : i32
    return %c0_i32, %c0_i32_0 : i32, i32
  }
  func.func @transform_10(%arg0: i32) -> (i32, i32) {
    %c0_i32 = arith.constant 0 : i32
    %c0_i32_0 = arith.constant 0 : i32
    %c0_i32_1 = arith.constant 0 : i32
    return %c0_i32, %c0_i32_0 : i32, i32
  }
  func.func @transform_11(%arg0: i32) -> (i32, i32) {
    %c0_i32 = arith.constant 0 : i32
    %c0_i32_0 = arith.constant 0 : i32
    return %c0_i32, %arg0 : i32, i32
  }
}

</mosaic_0001>

<bundles_post_ra>
// kernel: tpu_custom_call.1
= control target key start
LH: loop header
LB: loop body
LE: loop exit
PB: predicated region body
PF: predicated region fallthrough
CT: control target
= control target key end

     0   :  { %vm121_vm0 = vcmask 1042432   ;;  %v8137_v3 = vmov 0   ;;  %vm96_vm1 = vcmask 23552   ;;  %s8122_s0 = inlined_call_operand.vmem [shape: f32[3,128], index: 0, kind: input, shape index: {}]   ;;  %s8123_s1 = inlined_call_operand.vmem [shape: f32[8,128], index: 1, kind: input, shape index: {}]   ;;  %s8124_s2 = inlined_call_operand.vmem [shape: f32[64,3], index: 2, kind: input, shape index: {}]   ;;  %s8125_s3 = inlined_call_operand.vmem [shape: f32[64,1], index: 3, kind: input, shape index: {}]   ;;  %s8126_s4 = inlined_call_operand.vmem [shape: f32[64,64], index: 4, kind: input, shape index: {}]   ;;  %s8127_s5 = inlined_call_operand.vmem [shape: f32[64,1], index: 5, kind: input, shape index: {}]   ;;  %s8128_s6 = inlined_call_operand.vmem [shape: f32[64,64], index: 6, kind: input, shape index: {}]   ;;  %s8129_s7 = inlined_call_operand.vmem [shape: f32[64,1], index: 7, kind: input, shape index: {}]   ;;  %s8130_s8 = inlined_call_operand.vmem [shape: f32[64,64], index: 8, kind: input, shape index: {}]   ;;  %s8131_s9 = inlined_call_operand.vmem [shape: f32[64,1], index: 9, kind: input, shape index: {}]   ;;  %s8132_s10 = inlined_call_operand.vmem [shape: f32[8,64], index: 10, kind: input, shape index: {}]   ;;  %s8133_s11 = inlined_call_operand.hbm [shape: f32[8,128], index: 11, kind: output, shape index: {}]  }
   0x1   :  { %v47_v0 = vld [vmem:[%s8122_s0] sm:$0x7]  ;;  %v55_v1 = vld [vmem:[%s8125_s3 + $0x38] sm:$0xff]  ;;  %v53_v2 = vld [vmem:[%s8125_s3 + $0x28] sm:$0xff]  ;;  %4415 = vset.pattern.permute.xlu1 %v8137_v3  ;;  %4414 = vset.pattern.permute.xlu0 %v8137_v3 }
   0x2   :  { %v39_v4 = vld [vmem:[%s8124_s2] sm:$0xff]  ;;  %4300 = vmatpush.msk.msra.mxu0 %vm121_vm0, %v47_v0  ;;  %93 = vperm.xlu0 %4414, %v55_v1   ;;  %v51_v5 = vld [vmem:[%s8125_s3 + $0x18] sm:$0xff] }
   0x3   :  { %83 = vperm.xlu1 %4415, %v53_v2   ;;  %4301 = vmatmul.msk.f32.vlgmr.msra.gmra.mxu0 %vm96_vm1, %v39_v4 }
   0x4   :  { %4416 = vset.pattern.permute.xlu2 %v8137_v3 }
   0x5   :  { %73 = vperm.xlu2 %4416, %v51_v5  }
   0x6   :  { %16 = vsyncpa [#allocation3], 0  ;;  %v54_v6 = vld [vmem:[%s8125_s3 + $0x30] sm:$0xff]  ;;  %v52_v7 = vld [vmem:[%s8125_s3 + $0x20] sm:$0xff]  ;;  %s4450_s28 = smov [#allocation2]   ;;  %s4291_s12 = sshll.u32 %s8133_s11, 4  ;;  %s4292_s12 = int_to_ptr.hbm [resolvable:$true] %s4291_s12 }
   0x7   :  { %v40_v8 = vld [vmem:[%s8124_s2 + $0x8] sm:$0xff]  ;;  %v50_v9 = vld [vmem:[%s8125_s3 + $0x10] sm:$0xff]  ;;  %v48_v11 = vld [vmem:[%s8125_s3] sm:$0xff]  ;;  %s4289_s29 = sshll.u32 %s4450_s28, 4  ;;  %s4290_s29 = int_to_ptr.vmem [resolvable:$true] %s4289_s29 }
   0x8   :  { %v49_v10 = vld [vmem:[%s8125_s3 + $0x8] sm:$0xff]  ;;  %v41_v12 = vld [vmem:[%s8124_s2 + $0x10] sm:$0xff]  ;;  %v1421_v13 = vld [vmem:[%s8127_s5 + $0x38] sm:$0xff] }
   0x9   :  { %v1420_v14 = vld [vmem:[%s8127_s5 + $0x30] sm:$0xff]  ;;  %v1419_v15 = vld [vmem:[%s8127_s5 + $0x28] sm:$0xff]  ;;  %v42_v16 = vld [vmem:[%s8124_s2 + $0x18] sm:$0xff] }
   0xa   :  { %88 = vperm.xlu0 %4414, %v54_v6   ;;  %v1418_v17 = vld [vmem:[%s8127_s5 + $0x20] sm:$0xff]  ;;  %v1417_v18 = vld [vmem:[%s8127_s5 + $0x18] sm:$0xff]  ;;  %v1416_v19 = vld [vmem:[%s8127_s5 + $0x10] sm:$0xff] }
   0xb   :  { %78 = vperm.xlu1 %4415, %v52_v7   ;;  %4302 = vmatmul.msk.f32.gmra.mxu0 %vm96_vm1, %v40_v8  ;;  %v43_v20 = vld [vmem:[%s8124_s2 + $0x20] sm:$0xff]  ;;  %v1415_v21 = vld [vmem:[%s8127_s5 + $0x8] sm:$0xff]  ;;  %v2783_v23 = vld [vmem:[%s8129_s7 + $0x38] sm:$0xff] }
   0xc   :  { %v1414_v22 = vld [vmem:[%s8127_s5] sm:$0xff]  ;;  %v44_v24 = vld [vmem:[%s8124_s2 + $0x28] sm:$0xff]  ;;  %v2782_v25 = vld [vmem:[%s8129_s7 + $0x30] sm:$0xff] }
   0xd   :  { %68 = vperm.xlu2 %4416, %v50_v9   ;;  %v2781_v26 = vld [vmem:[%s8129_s7 + $0x28] sm:$0xff]  ;;  %v2780_v27 = vld [vmem:[%s8129_s7 + $0x20] sm:$0xff]  ;;  %v45_v28 = vld [vmem:[%s8124_s2 + $0x30] sm:$0xff] }
   0xe   :  { %v2779_v29 = vld [vmem:[%s8129_s7 + $0x18] sm:$0xff]  ;;  %v2778_v30 = vld [vmem:[%s8129_s7 + $0x10] sm:$0xff]  ;;  %v2777_v31 = vld [vmem:[%s8129_s7 + $0x8] sm:$0xff] }
   0xf   :  { %v46_v32 = vld [vmem:[%s8124_s2 + $0x38] sm:$0xff]  ;;  %v2776_v33 = vld [vmem:[%s8129_s7] sm:$0xff]  ;;  %v4143_v35 = vld [vmem:[%s8131_s9 + $0x30] sm:$0xff] }
  0x10   :  { %v4144_v34 = vld [vmem:[%s8131_s9 + $0x38] sm:$0xff]  ;;  %v4142_v36 = vld [vmem:[%s8131_s9 + $0x28] sm:$0xff]  ;;  %v4141_v37 = vld [vmem:[%s8131_s9 + $0x20] sm:$0xff] }
  0x11   :  { %v4140_v38 = vld [vmem:[%s8131_s9 + $0x18] sm:$0xff]  ;;  %v4139_v39 = vld [vmem:[%s8131_s9 + $0x10] sm:$0xff]  ;;  %v4138_v40 = vld [vmem:[%s8131_s9 + $0x8] sm:$0xff] }
  0x12   :  { %63 = vperm.xlu0 %4414, %v49_v10   ;;  %v4137_v41 = vld [vmem:[%s8131_s9] sm:$0xff] }
  0x13   :  { %58 = vperm.xlu1 %4415, %v48_v11   ;;  %4303 = vmatmul.msk.f32.gmra.mxu0 %vm96_vm1, %v41_v12 }
  0x15   :  { %1459 = vperm.xlu2 %4416, %v1421_v13  }
  0x1a   :  { %1454 = vperm.xlu0 %4414, %v1420_v14  }
  0x1b   :  { %1449 = vperm.xlu1 %4415, %v1419_v15   ;;  %4304 = vmatmul.msk.f32.gmra.mxu0 %vm96_vm1, %v42_v16 }
  0x1d   :  { %1444 = vperm.xlu2 %4416, %v1418_v17  }
  0x22   :  { %1439 = vperm.xlu0 %4414, %v1417_v18  }
  0x23   :  { %1434 = vperm.xlu1 %4415, %v1416_v19   ;;  %4305 = vmatmul.msk.f32.gmra.mxu0 %vm96_vm1, %v43_v20 }
  0x25   :  { %1429 = vperm.xlu2 %4416, %v1415_v21  }
  0x2a   :  { %1424 = vperm.xlu0 %4414, %v1414_v22  }
  0x2b   :  { %2821 = vperm.xlu1 %4415, %v2783_v23   ;;  %4306 = vmatmul.msk.f32.gmra.mxu0 %vm96_vm1, %v44_v24 }
  0x2d   :  { %2816 = vperm.xlu2 %4416, %v2782_v25  }
  0x32   :  { %2811 = vperm.xlu0 %4414, %v2781_v26  }
  0x33   :  { %2806 = vperm.xlu1 %4415, %v2780_v27   ;;  %4307 = vmatmul.msk.f32.gmra.mxu0 %vm96_vm1, %v45_v28 }
  0x35   :  { %2801 = vperm.xlu2 %4416, %v2779_v29  }
  0x3a   :  { %2796 = vperm.xlu0 %4414, %v2778_v30  }
  0x3b   :  { %2791 = vperm.xlu1 %4415, %v2777_v31   ;;  %4308 = vmatmul.msk.f32.gmra.mxu0 %vm96_vm1, %v46_v32 }
  0x3d   :  { %2786 = vperm.xlu2 %4416, %v2776_v33   ;;  %v8144_v33 = vmov 2102212464  }
  0x42   :  { %4182 = vperm.xlu0 %4414, %v4144_v34  }
  0x43   :  { %4177 = vperm.xlu1 %4415, %v4143_v35  }
  0x45   :  { %4172 = vperm.xlu2 %4416, %v4142_v36  }
  0x4a   :  { %4167 = vperm.xlu0 %4414, %v4141_v37  }
  0x4b   :  { %4162 = vperm.xlu1 %4415, %v4140_v38   ;;  %v8148_v38 = vmov 920167782  }
  0x4d   :  { %4157 = vperm.xlu2 %4416, %v4139_v39  }
  0x52   :  { %4152 = vperm.xlu0 %4414, %v4138_v40  }
  0x53   :  { %4147 = vperm.xlu1 %4415, %v4137_v41  }
  0x5f   :  { %v74_v47 = vpop.permute.xlu2 %73 }
  0x67   :  { %v69_v54 = vpop.permute.xlu2 %68 }
  0x74   :  { %v4645_v43 = vpop.permute.xlu0 %93 }
  0x75   :  { %v84_v42 = vpop.permute.xlu1 %83 }
  0x7c   :  { %v4647_v46 = vpop.permute.xlu0 %88 }
  0x7d   :  { %v79_v45 = vpop.permute.xlu1 %78 }
  0x80   :  { %v142_v44 = vpop.f32.mrf.mxu0 }
  0x84   :  { %v64_v50 = vpop.permute.xlu0 %63 }
  0x85   :  { %v59_v49 = vpop.permute.xlu1 %58 }
  0x86   :  { %v4649_v51 = vadd.f32 %v142_v44, %v59_v49 }
  0x88   :  { %v145_v48 = vpop.f32.mrf.mxu0  ;;  %8263 = vst [vmem:[#allocation5_spill] sm:$0xff] %v4649_v51  ;;  %v169_v56 = vand.u32 2139095040, %v4649_v51 }
  0x89   :  { %v4651_v52 = vadd.f32 %v145_v48, %v64_v50 }
  0x8a   :  { %v170_v59 = vshrl.u32 %v169_v56, 23 }
  0x8b   :  { %8264 = vst [vmem:[#allocation6_spill] sm:$0xff] %v4651_v52  ;;  %v324_v57 = vand.u32 2139095040, %v4651_v52 }
  0x8c   :  { %v4309_v0 = vadd.s32 4294967169, %v170_v59 }
  0x8d   :  { %v325_v60 = vshrl.u32 %v324_v57, 23 }
  0x8e   :  { %v176_v6 = vadd.s32 1, %v4309_v0 }
  0x8f   :  { %v4312_v2 = vadd.s32 4294967169, %v325_v60 }
  0x90   :  { %v148_v53 = vpop.f32.mrf.mxu0  ;;  %vm177_vm2 = vcmp.gt.s32.totalorder %v176_v6, 0 }
  0x91   :  { %v4653_v55 = vadd.f32 %v148_v53, %v69_v54  ;;  %v331_v7 = vadd.s32 1, %v4312_v2  ;;  %v178_v14 = vsel %vm177_vm2, %v176_v6, 0 }
  0x92   :  { %v4664_v19 = vand.u32 31, %v178_v14  ;;  %v4684_v32 = vshrl.u32 %v178_v14, 5 }
  0x93   :  { %8265 = vst [vmem:[#allocation7_spill] sm:$0xff] %v4653_v55  ;;  %v479_v58 = vand.u32 2139095040, %v4653_v55  ;;  %vm332_vm3 = vcmp.gt.s32.totalorder %v331_v7, 0 }
  0x94   :  { %v333_v16 = vsel %vm332_vm3, %v331_v7, 0  ;;  %8267 = vst [vmem:[#allocation9_spill] sm:$0xff] %v4664_v19  ;;  %v4676_v27 = vsub.s32 32, %v4664_v19  ;;  %v4688_v34 = vshll.u32 %v8144_v33, %v4664_v19  ;;  %v4699_v40 = vshll.u32 %v8148_v38, %v4664_v19 }
  0x95   :  { %v480_v63 = vshrl.u32 %v479_v58, 23  ;;  %v4668_v22 = vand.u32 31, %v333_v16  ;;  %8274 = vst [vmem:[#allocation16_spill] sm:$0xff] %v4684_v32  ;;  %v4701_v41 = vshrl.u32 %v333_v16, 5 }
  0x96   :  { %8271 = vst [vmem:[#allocation13_spill] sm:$0xff] %v4676_v27  ;;  %v4695_v39 = vshrl.u32 %v8148_v38, %v4676_v27 }
  0x97   :  { %v4315_v5 = vadd.s32 4294967169, %v480_v63  ;;  %8268 = vst [vmem:[#allocation10_spill] sm:$0xff] %v4668_v22  ;;  %v4679_v29 = vsub.s32 32, %v4668_v22  ;;  %v347_v49 = vshll.u32 %v8144_v33, %v4668_v22  ;;  %v4714_v50 = vshll.u32 %v8148_v38, %v4668_v22 }
  0x98   :  { %v151_v61 = vpop.f32.mrf.mxu0  ;;  %8275 = vst [vmem:[#allocation17_spill] sm:$0xff] %v4688_v34 }
  0x99   :  { %v4658_v62 = vadd.f32 %v151_v61, %v74_v47  ;;  %v486_v11 = vadd.s32 1, %v4315_v5  ;;  %8272 = vst [vmem:[#allocation14_spill] sm:$0xff] %v4679_v29  ;;  %v348_v44 = vshrl.u32 %v8148_v38, %v4679_v29 }
  0x9a   :  { %8277 = vst [vmem:[#allocation19_spill] sm:$0xff] %v4695_v39 }
  0x9b   :  { %8266 = vst [vmem:[#allocation8_spill] sm:$0xff] %v4658_v62  ;;  %v634_v1 = vand.u32 2139095040, %v4658_v62  ;;  %vm487_vm5 = vcmp.gt.s32.totalorder %v486_v11, 0  ;;  %v4728_v63 = vor.u32 %v348_v44, %v347_v49 }
  0x9c   :  { %v488_v20 = vsel %vm487_vm5, %v486_v11, 0  ;;  %8278 = vst [vmem:[#allocation20_spill] sm:$0xff] %v4699_v40 }
  0x9d   :  { %v635_v4 = vshrl.u32 %v634_v1, 23  ;;  %v4673_v26 = vand.u32 31, %v488_v20  ;;  %8279 = vst [vmem:[#allocation21_spill] sm:$0xff] %v4701_v41 }
  0x9e   :  { %8280 = vst [vmem:[#allocation22_spill] sm:$0xff] %v4714_v50 }
  0x9f   :  { %v4318_v8 = vadd.s32 4294967169, %v635_v4  ;;  %8270 = vst [vmem:[#allocation12_spill] sm:$0xff] %v4673_v26  ;;  %v4691_v35 = vsub.s32 32, %v4673_v26  ;;  %v502_v0 = vshll.u32 %v8144_v33, %v4673_v26  ;;  %v4733_v4 = vshrl.u32 %v488_v20, 5 }
  0xa0   :  { %v154_v9 = vpop.f32.mrf.mxu0  ;;  %8283 = vst [vmem:[#allocation25_spill] sm:$0xff] %v4728_v63  ;;  %v4737_v5 = vshll.u32 %v8148_v38, %v4673_v26  ;;  %v8293_v63 = vmov 2131351028  }
  0xa1   :  { %v4661_v10 = vadd.f32 %v154_v9, %v79_v45  ;;  %v641_v12 = vadd.s32 1, %v4318_v8  ;;  %8276 = vst [vmem:[#allocation18_spill] sm:$0xff] %v4691_v35  ;;  %v8150_v45 = vmov 1326507024   ;;  %v503_v54 = vshrl.u32 %v8148_v38, %v4691_v35 }
  0xa2   :  { %8284 = vst [vmem:[#allocation26_spill] sm:$0xff] %v4733_v4  ;;  %v4745_v9 = vshrl.u32 %v8150_v45, %v4691_v35 }
  0xa3   :  { %v789_v13 = vand.u32 2139095040, %v4661_v10  ;;  %vm642_vm4 = vcmp.gt.s32.totalorder %v641_v12, 0  ;;  %8285 = vst [vmem:[#allocation27_spill] sm:$0xff] %v4737_v5  ;;  %v4741_v8 = vor.u32 %v503_v54, %v502_v0 }
  0xa4   :  { %v643_v17 = vsel %vm642_vm4, %v641_v12, 0  ;;  %8287 = vst [vmem:[#allocation29_spill] sm:$0xff] %v4745_v9 }
  0xa5   :  { %v790_v15 = vshrl.u32 %v789_v13, 23  ;;  %v4670_v23 = vand.u32 31, %v643_v17  ;;  %v4723_v56 = vshrl.u32 %v643_v17, 5  ;;  %8286 = vst [vmem:[#allocation28_spill] sm:$0xff] %v4741_v8 }
  0xa7   :  { %8269 = vst [vmem:[#allocation11_spill] sm:$0xff] %v4670_v23  ;;  %v4321_v24 = vadd.s32 4294967169, %v790_v15  ;;  %v4682_v30 = vsub.s32 32, %v4670_v23  ;;  %v660_v57 = vshll.u32 %v8148_v38, %v4670_v23  ;;  %v4749_v11 = vshll.u32 %v8144_v33, %v4670_v23 }
  0xa8   :  { %v157_v18 = vpop.f32.mrf.mxu0  ;;  %8282 = vst [vmem:[#allocation24_spill] sm:$0xff] %v4723_v56  ;;  %vm666_vm8 = vcmp.lt.s32.totalorder %v4723_v56, 4 }
  0xa9   :  { %v4666_v21 = vadd.f32 %v157_v18, %v84_v42  ;;  %8273 = vst [vmem:[#allocation15_spill] sm:$0xff] %v4682_v30  ;;  %v796_v31 = vadd.s32 1, %v4321_v24  ;;  %v661_v47 = vshrl.u32 %v8150_v45, %v4682_v30  ;;  %v4763_v17 = vshrl.u32 %v8148_v38, %v4682_v30 }
  0xab   :  { %v944_v25 = vand.u32 2139095040, %v4666_v21  ;;  %vm797_vm6 = vcmp.gt.s32.totalorder %v796_v31, 0  ;;  %v8134_v61 = vand.u32 2147483647, %v4666_v21  ;;  %v662_v1 = vor.u32 %v661_v47, %v660_v57 }
  0xac   :  { %v798_v58 = vsel %vm797_vm6, %v796_v31, 0 }
  0xad   :  { %v945_v28 = vshrl.u32 %v944_v25, 23  ;;  %v4751_v12 = vand.u32 31, %v798_v58  ;;  %v4759_v16 = vand.u32 8388607, %v8134_v61  ;;  %v4767_v18 = vsel %vm666_vm8, %v662_v1, 1326507024 }
  0xae   :  { %8288 = vst [vmem:[#allocation30_spill] sm:$0xff] %v4767_v18  ;;  %v4769_v20 = vshrl.u32 %v798_v58, 5 }
  0xaf   :  { %v4324_v36 = vadd.s32 4294967169, %v945_v28  ;;  %v4781_v31 = vsub.s32 32, %v4751_v12 }
  0xb0   :  { %v160_v37 = vpop.f32.mrf.mxu0 }
  0xb1   :  { %v4704_v42 = vadd.f32 %v160_v37, %v4647_v46  ;;  %v951_v48 = vadd.s32 1, %v4324_v36  ;;  %v4718_v46 = vshrl.u32 %v8150_v45, %v4679_v29  ;;  %v4785_v36 = vshll.u32 %v8144_v33, %v4751_v12 }
  0xb2   :  { %v4789_v37 = vshll.u32 %v8148_v38, %v4751_v12 }
  0xb3   :  { %8281 = vst [vmem:[#allocation23_spill] sm:$0xff] %v4718_v46  ;;  %v1099_v53 = vand.u32 2139095040, %v4704_v42  ;;  %vm952_vm7 = vcmp.gt.s32.totalorder %v951_v48, 0  ;;  %v8135_v2 = vand.u32 2147483647, %v4704_v42 }
  0xb4   :  { %v953_v59 = vsel %vm952_vm7, %v951_v48, 0 }
  0xb5   :  { %v1100_v60 = vshrl.u32 %v1099_v53, 23  ;;  %v4739_v6 = vand.u32 31, %v953_v59  ;;  %v4773_v24 = vand.u32 8388607, %v8135_v2  ;;  %v4791_v47 = vshrl.u32 %v953_v59, 5 }
  0xb6   :  { %v8171_v2 = vmov 2475754826  }
  0xb7   :  { %v4327_v7 = vadd.s32 4294967169, %v1100_v60  ;;  %v967_v54 = vshll.u32 %v8144_v33, %v4739_v6  ;;  %v4798_v57 = vshll.u32 %v8148_v38, %v4739_v6 }
  0xb8   :  { %v163_v13 = vpop.f32.mrf.mxu0 }
  0xb9   :  { %v1106_v14 = vadd.s32 1, %v4327_v7  ;;  %v4755_v15 = vadd.f32 %v163_v13, %v4645_v43  ;;  %v4776_v43 = vsub.s32 32, %v4739_v6  ;;  %v8154_v7 = vmov 683565275  }
  0xba   :  { %v958_v13 = vshll.u32 %v8154_v7, %v4739_v6 }
  0xbb   :  { %vm1107_vm9 = vcmp.gt.s32.totalorder %v1106_v14, 0  ;;  %v1254_v25 = vand.u32 2139095040, %v4755_v15  ;;  %v8136_v28 = vand.u32 2147483647, %v4755_v15  ;;  %v968_v59 = vshrl.u32 %v8148_v38, %v4776_v43 }
  0xbc   :  { %v1108_v44 = vsel %vm1107_vm9, %v1106_v14, 0  ;;  %v4807_v0 = vshrl.u32 %v8150_v45, %v4776_v43  ;;  %vm976_vm9 = vcmp.lt.s32.totalorder %v4791_v47, 4 }
  0xbd   :  { %v1110_v48 = vand.u32 31, %v1108_v44  ;;  %v1255_v49 = vshrl.u32 %v1254_v25, 23  ;;  %v1258_v58 = vand.u32 8388607, %v8136_v28  ;;  %v959_v28 = vshrl.u32 %v8171_v2, %v4776_v43 }
  0xbe   :  { %v4818_v51 = vshrl.u32 %v1108_v44, 5  ;;  %v8289_v44 = vmov 2102212464  }
  0xbf   :  { %v1111_v1 = vsub.s32 32, %v1110_v48  ;;  %v1122_v14 = vshll.u32 %v8144_v33, %v1110_v48  ;;  %v4330_v25 = vadd.s32 4294967169, %v1255_v49  ;;  %v1259_v61 = vor.u32 8388608, %v1258_v58 }
  0xc0   :  { %v1125_v3 = vshll.u32 %v8148_v38, %v1110_v48  ;;  %v1113_v32 = vshll.u32 %v8154_v7, %v1110_v48  ;;  %v8158_v33 = vmov 2131351028   ;;  %v1116_v29 = vshll.u32 %v8171_v2, %v1110_v48 }
  0xc1   :  { %v1123_v53 = vshrl.u32 %v8148_v38, %v1111_v1  ;;  %v1126_v60 = vshrl.u32 %v8150_v45, %v1111_v1  ;;  %v1114_v19 = vshrl.u32 %v8171_v2, %v1111_v1  ;;  %v1261_v40 = vadd.s32 1, %v4330_v25 }
  0xc2   :  { %v1117_v49 = vshrl.u32 %v8158_v33, %v1111_v1  ;;  %v4824_v34 = vshll.u32 %v1259_v61, 8  ;;  %v4827_v38 = vor.u32 %v968_v59, %v967_v54  ;;  %v1120_v25 = vshrl.u32 %v8289_v44, %v1111_v1 }
  0xc3   :  { %v4822_v58 = vor.u32 %v1123_v53, %v1122_v14  ;;  %v1127_v39 = vor.u32 %v1126_v60, %v1125_v3  ;;  %vm1262_vm10 = vcmp.gt.s32.totalorder %v1261_v40, 0  ;;  %v4832_v7 = vor.u32 %v1114_v19, %v1113_v32 }
  0xc4   :  { %v1263_v22 = vsel %vm1262_vm10, %v1261_v40, 0  ;;  %v4834_v52 = vor.u32 %v1117_v49, %v1116_v29  ;;  %v4836_v53 = vor.u32 %v959_v28, %v958_v13  ;;  %vm1131_vm11 = vcmp.lt.s32.totalorder %v4818_v51, 4 }
  0xc5   :  { %v1265_v3 = vand.u32 31, %v1263_v22  ;;  %v8290_v61 = vmov 683565275   ;;  %v1119_v54 = vshll.u32 %v8158_v33, %v1110_v48  ;;  %v1137_v59 = vsel %vm1131_vm11, %v4822_v58, 920167782 }
  0xc6   :  { %v4840_v60 = vshrl.u32 %v8290_v61, %v1111_v1  ;;  %v1141_v19 = vsel %vm1131_vm11, %v1127_v39, 1326507024  ;;  %v1300_v29 = vand.u32 65535, %v4824_v34  ;;  %v1301_v32 = vshrl.u32 %v4824_v34, 16 }
  0xc7   :  { %v1264_v40 = vshrl.u32 %v1263_v22, 5  ;;  %v1266_v28 = vsub.s32 32, %v1265_v3  ;;  %v1121_v13 = vor.u32 %v1120_v25, %v1119_v54  ;;  %vm1128_vm12 = vcmp.lt.s32.totalorder %v4818_v51, 1 }
  0xc8   :  { %v1277_v1 = vshll.u32 %v8289_v44, %v1265_v3  ;;  %v8291_v14 = vmov 920167782   ;;  %vm1130_vm13 = vcmp.lt.s32.totalorder %v4818_v51, 3  ;;  %v1136_v39 = vsel %vm1128_vm12, %v4832_v7, %v4834_v52 }
  0xc9   :  { %v1280_v48 = vshll.u32 %v8291_v14, %v1265_v3  ;;  %v1278_v49 = vshrl.u32 %v8291_v14, %v1266_v28  ;;  %v8292_v45 = vmov 1326507024   ;;  %v1268_v22 = vshll.u32 %v8290_v61, %v1265_v3 }
  0xca   :  { %v1281_v33 = vshrl.u32 %v8292_v45, %v1266_v28  ;;  %v1269_v25 = vshrl.u32 %v8171_v2, %v1266_v28  ;;  %v1271_v54 = vshll.u32 %v8171_v2, %v1265_v3  ;;  %v1272_v41 = vshrl.u32 %v8293_v63, %v1266_v28 }
  0xcb   :  { %v1274_v27 = vshll.u32 %v8293_v63, %v1265_v3  ;;  %v1275_v46 = vshrl.u32 %v8289_v44, %v1266_v28  ;;  %v1279_v50 = vor.u32 %v1278_v49, %v1277_v1  ;;  %vm1286_vm14 = vcmp.lt.s32.totalorder %v1264_v40, 4 }
  0xcc   :  { %v1282_v35 = vor.u32 %v1281_v33, %v1280_v48  ;;  %v1270_v26 = vor.u32 %v1269_v25, %v1268_v22  ;;  %v1267_v55 = vshrl.u32 %v8290_v61, %v1266_v28  ;;  %v1273_v8 = vor.u32 %v1272_v41, %v1271_v54 }
  0xcd   :  { %v1276_v9 = vor.u32 %v1275_v46, %v1274_v27  ;;  %vm1283_vm15 = vcmp.lt.s32.totalorder %v1264_v40, 1  ;;  %v1292_v5 = vsel %vm1286_vm14, %v1279_v50, 920167782  ;;  %vm1284_vm0 = vcmp.lt.s32.totalorder %v1264_v40, 2 }
  0xce   :  { %v1296_v18 = vsel %vm1286_vm14, %v1282_v35, 1326507024  ;;  %vm1285_vm1 = vcmp.lt.s32.totalorder %v1264_v40, 3  ;;  %v1291_v56 = vsel %vm1283_vm15, %v1270_v26, %v1273_v8  ;;  %v1287_v3 = vsel %vm1283_vm15, %v1267_v55, %v1270_v26 }
  0xcf   :  { %v1288_v2 = vsel %vm1286_vm14, %v1276_v9, 2102212464  ;;  %v1293_v23 = vsel %vm1285_vm1, %v1276_v9, %v1292_v5  ;;  %v1295_v30 = vsel %vm1283_vm15, %v1273_v8, %v1276_v9  ;;  %v1297_v1 = vsel %vm1285_vm1, %v1279_v50, %v1296_v18 }
  0xd0   :  { %v1294_v4 = vsel %vm1284_vm0, %v1291_v56, %v1293_v23  ;;  %v1138_v33 = vsel %vm1130_vm13, %v1121_v13, %v1137_v59  ;;  %v1289_v48 = vsel %vm1285_vm1, %v1273_v8, %v1288_v2  ;;  %v1298_v41 = vsel %vm1284_vm0, %v1295_v30, %v1297_v1 }
  0xd1   :  { %v1324_v27 = vand.u32 65535, %v1294_v4  ;;  %v1325_v46 = vshrl.u32 %v1294_v4, 16  ;;  %v1302_v28 = vand.u32 65535, %v1298_v41  ;;  %v1303_v35 = vshrl.u32 %v1298_v41, 16 }
  0xd2   :  { %vm1129_vm2 = vcmp.lt.s32.totalorder %v4818_v51, 2  ;;  %v4874_v5 = vsel %vm1131_vm11, %v1121_v13, 2102212464  ;;  %v1140_v30 = vsel %vm1128_vm12, %v4834_v52, %v1121_v13  ;;  %v4884_v50 = vsel %vm1284_vm0, %v1287_v3, %v1289_v48 }
  0xd3   :  { %v1327_v55 = vmul.u32 %v1325_v46, %v1300_v29  ;;  %v1328_v26 = vmul.u32 %v1324_v27, %v1301_v32  ;;  %v4878_v23 = vsel %vm1129_vm2, %v1136_v39, %v1138_v33  ;;  %v1305_v56 = vmul.u32 %v1303_v35, %v1300_v29 }
  0xd4   :  { %v1306_v2 = vmul.u32 %v1302_v28, %v1301_v32  ;;  %v1142_v4 = vsel %vm1130_vm13, %v4822_v58, %v1141_v19  ;;  %v1304_v8 = vmul.u32 %v1302_v28, %v1300_v29  ;;  %v1326_v9 = vmul.u32 %v1324_v27, %v1300_v29 }
  0xd5   :  { %v1329_v18 = vmul.u32 %v1325_v46, %v1301_v32  ;;  %v1330_v59 = vshll.u32 %v1327_v55, 16  ;;  %v1307_v49 = vmul.u32 %v1303_v35, %v1301_v32  ;;  %v1308_v39 = vshll.u32 %v1305_v56, 16 }
  0xd6   :  { %v1331_v22 = vshrl.u32 %v1327_v55, 16  ;;  %v1332_v25 = vshll.u32 %v1328_v26, 16  ;;  %v1143_v40 = vsel %vm1129_vm2, %v1140_v30, %v1142_v4  ;;  %v8294_v13 = vor.u32 8388608, %v4773_v24 }
  0xd7   :  { %vm1334_vm3 = vc.u32 %v1326_v9, %v1330_v59  ;;  %v1336_v54 = vadd.s32 %v1330_v59, %v1326_v9  ;;  %v1310_v1 = vshll.u32 %v1306_v2, 16  ;;  %vm1312_vm4 = vc.u32 %v1304_v8, %v1308_v39 }
  0xd8   :  { %v4893_v3 = vshll.u32 %v8294_v13, 8  ;;  %v1314_v58 = vadd.s32 %v1308_v39, %v1304_v8  ;;  %v8295_v19 = vmov 0   ;;  %v1147_v48 = vand.u32 65535, %v1143_v40 }
  0xd9   :  { %v1335_v29 = vsel %vm1334_vm3, 1, %v8295_v19  ;;  %v1313_v33 = vsel %vm1312_vm4, 1, %v8295_v19  ;;  %vm1338_vm5 = vc.u32 %v1336_v54, %v1332_v25  ;;  %v1148_v55 = vshrl.u32 %v1143_v40, 16 }
  0xda   :  { %v1337_v32 = vadd.s32 %v1335_v29, %v1329_v18  ;;  %v1315_v41 = vadd.s32 %v1313_v33, %v1307_v49  ;;  %vm1316_vm6 = vc.u32 %v1314_v58, %v1310_v1  ;;  %v1339_v27 = vsel %vm1338_vm5, 1, %v8295_v19 }
  0xdb   :  { %v1145_v46 = vand.u32 65535, %v4893_v3  ;;  %v1317_v24 = vsel %vm1316_vm6, 1, %v8295_v19  ;;  %v1146_v35 = vshrl.u32 %v4893_v3, 16  ;;  %v1309_v30 = vshrl.u32 %v1305_v56, 16 }
  0xdc   :  { %v1341_v28 = vadd.s32 %v1339_v27, %v1337_v32  ;;  %v1319_v4 = vadd.s32 %v1317_v24, %v1315_v41  ;;  %v1169_v8 = vand.u32 65535, %v4878_v23  ;;  %v1170_v9 = vshrl.u32 %v4878_v23, 16 }
  0xdd   :  { %v1333_v18 = vshrl.u32 %v1328_v26, 16  ;;  %v1150_v49 = vmul.u32 %v1148_v55, %v1145_v46  ;;  %v1151_v39 = vmul.u32 %v1147_v48, %v1146_v35  ;;  %v1311_v13 = vshrl.u32 %v1306_v2, 16 }
  0xde   :  { %v1342_v59 = vadd.s32 %v1341_v28, %v1331_v22  ;;  %v1320_v1 = vadd.s32 %v1319_v4, %v1309_v30  ;;  %v1344_v58 = vmul.u32 %v4824_v34, %v4884_v50  ;;  %v1172_v29 = vmul.u32 %v1170_v9, %v1145_v46 }
  0xdf   :  { %v1149_v32 = vmul.u32 %v1147_v48, %v1145_v46  ;;  %v1153_v27 = vshll.u32 %v1150_v49, 16  ;;  %v1173_v40 = vmul.u32 %v1169_v8, %v1146_v35  ;;  %v4907_v41 = vadd.s32 %v1336_v54, %v1332_v25 }
  0xe0   :  { %v1343_v33 = vadd.s32 %v1342_v59, %v1333_v18  ;;  %v4905_v56 = vadd.s32 %v1320_v1, %v1311_v13  ;;  %v1152_v24 = vmul.u32 %v1148_v55, %v1146_v35  ;;  %v1175_v23 = vshll.u32 %v1172_v29, 16 }
  0xe1   :  { %v1155_v22 = vshll.u32 %v1151_v39, 16  ;;  %vm1157_vm7 = vc.u32 %v1149_v32, %v1153_v27  ;;  %v1159_v28 = vadd.s32 %v1153_v27, %v1149_v32  ;;  %v1171_v50 = vmul.u32 %v1169_v8, %v1145_v46 }
  0xe2   :  { %v1347_v26 = vadd.s32 1, %v1343_v33  ;;  %vm1346_vm10 = vc.u32 %v4905_v56, %v4907_v41  ;;  %v1158_v34 = vsel %vm1157_vm7, 1, %v8295_v19  ;;  %v1174_v2 = vmul.u32 %v1170_v9, %v1146_v35 }
  0xe3   :  { %v1160_v30 = vadd.s32 %v1158_v34, %v1152_v24  ;;  %vm1161_vm11 = vc.u32 %v1159_v28, %v1155_v22  ;;  %v1177_v25 = vshll.u32 %v1173_v40, 16  ;;  %vm1179_vm14 = vc.u32 %v1171_v50, %v1175_v23 }
  0xe4   :  { %v1348_v48 = vsel %vm1346_vm10, %v1347_v26, %v1343_v33  ;;  %v1162_v55 = vsel %vm1161_vm11, 1, %v8295_v19  ;;  %v1181_v4 = vadd.s32 %v1175_v23, %v1171_v50  ;;  %v1154_v18 = vshrl.u32 %v1150_v49, 16 }
  0xe5   :  { %v1349_v54 = vadd.s32 %v1348_v48, %v1344_v58  ;;  %v1156_v59 = vshrl.u32 %v1151_v39, 16  ;;  %v1164_v13 = vadd.s32 %v1162_v55, %v1160_v30  ;;  %v1180_v1 = vsel %vm1179_vm14, 1, %v8295_v19 }
  0xe6   :  { %v1176_v27 = vshrl.u32 %v1172_v29, 16  ;;  %v1182_v62 = vadd.s32 %v1180_v1, %v1174_v2  ;;  %vm1183_vm15 = vc.u32 %v1181_v4, %v1177_v25  ;;  %v8296_v8 = vmov 2475754826  }
  0xe7   :  { %v1350_v32 = vadd.s32 536870912, %v1349_v54  ;;  %v1165_v46 = vadd.s32 %v1164_v13, %v1154_v18  ;;  %v1184_v35 = vsel %vm1183_vm15, 1, %v8295_v19  ;;  %v961_v9 = vshll.u32 %v8296_v8, %v4739_v6 }
  0xe8   :  { %v962_v58 = vshrl.u32 %v8293_v63, %v4776_v43  ;;  %v1186_v49 = vadd.s32 %v1184_v35, %v1182_v62  ;;  %v964_v39 = vshll.u32 %v8293_v63, %v4739_v6  ;;  %v965_v29 = vshrl.u32 %v8289_v44, %v4776_v43 }
  0xe9   :  { %v4920_v33 = vshrl.u32 %v1350_v32, 30  ;;  %v1132_v24 = vsel %vm1128_vm12, %v4840_v60, %v4832_v7  ;;  %v1134_v23 = vsel %vm1130_vm13, %v4834_v52, %v4874_v5  ;;  %v1166_v26 = vadd.s32 %v1165_v46, %v1156_v59 }
  0xea   :  { %v4934_v22 = vor.u32 %v962_v58, %v961_v9  ;;  %v1178_v28 = vshrl.u32 %v1173_v40, 16  ;;  %v1187_v6 = vadd.s32 %v1186_v49, %v1176_v27  ;;  %v966_v34 = vor.u32 %v965_v29, %v964_v39 }
  0xeb   :  { %v1352_v62 = vshll.u32 %v4920_v33, 30  ;;  %v813_v50 = vshrl.u32 %v8291_v14, %v4781_v31  ;;  %v982_v7 = vsel %vm976_vm9, %v4827_v38, 920167782  ;;  %v8297_v60 = vor.u32 %v4807_v0, %v4798_v57 }
  0xec   :  { %v1185_v5 = vadd.s32 %v1181_v4, %v1177_v25  ;;  %v1135_v40 = vsel %vm1129_vm2, %v1132_v24, %v1134_v23  ;;  %v1188_v48 = vadd.s32 %v1187_v6, %v1178_v28  ;;  %vm973_vm12 = vcmp.lt.s32.totalorder %v4791_v47, 1 }
  0xed   :  { %v986_v52 = vsel %vm976_vm9, %v8297_v60, 1326507024  ;;  %v1353_v2 = vsub.s32 %v1349_v54, %v1352_v62  ;;  %vm975_vm0 = vcmp.lt.s32.totalorder %v4791_v47, 3  ;;  %v981_v30 = vsel %vm973_vm12, %v4836_v53, %v4934_v22 }
  0xee   :  { %vm1191_vm13 = vc.u32 %v1166_v26, %v1185_v5  ;;  %v985_v57 = vsel %vm973_vm12, %v4934_v22, %v966_v34  ;;  %v1192_v25 = vadd.s32 1, %v1188_v48  ;;  %v983_v51 = vsel %vm975_vm0, %v966_v34, %v982_v7 }
  0xef   :  { %vm1354_vm1 = vcmp.lt.s32.totalorder %v1353_v2, 0  ;;  %v1355_v0 = vsub.s32 0, %v1353_v2  ;;  %v1189_v54 = vmul.u32 %v4893_v3, %v1135_v40  ;;  %vm974_vm2 = vcmp.lt.s32.totalorder %v4791_v47, 2 }
  0xf0   :  { %v987_v55 = vsel %vm975_vm0, %v4827_v38, %v986_v52  ;;  %v8298_v4 = vor.u32 8388608, %v4759_v16  ;;  %v4971_v59 = vshrl.u32 %v8292_v45, %v4781_v31  ;;  %v1193_v1 = vsel %vm1191_vm13, %v1192_v25, %v1188_v48 }
  0xf1   :  { %v1356_v13 = vsel %vm1354_vm1, %v1355_v0, %v1353_v2  ;;  %v988_v32 = vsel %vm974_vm2, %v985_v57, %v987_v55  ;;  %v4976_v3 = vor.u32 %v813_v50, %v4785_v36  ;;  %v1194_v46 = vadd.s32 %v1193_v1, %v1189_v54 }
  0xf2   :  { %v4967_v18 = vshll.u32 %v8298_v4, 8  ;;  %v1357_v27 = vclz %v1356_v13  ;;  %v4980_v38 = vsel %vm974_vm2, %v981_v30, %v983_v51  ;;  %vm1253_vm3 = vcmp.lt.s32.totalorder %v4755_v15, 0 }
  0xf3   :  { %v1375_v16 = vsub.s32 4, %v4920_v33  ;;  %v957_v35 = vshrl.u32 %v8290_v61, %v4776_v43  ;;  %v992_v9 = vand.u32 65535, %v988_v32  ;;  %v1195_v49 = vadd.s32 536870912, %v1194_v46 }
  0xf4   :  { %v4331_v58 = vadd.s32 4294967294, %v1357_v27  ;;  %v990_v39 = vand.u32 65535, %v4967_v18  ;;  %v993_v36 = vshrl.u32 %v988_v32, 16  ;;  %v8299_v29 = vand.u32 2147483647, %v4755_v15 }
  0xf5   :  { %v1345_v23 = vadd.s32 %v4907_v41, %v4905_v56  ;;  %v991_v62 = vshrl.u32 %v4967_v18, 16  ;;  %v1015_v28 = vshrl.u32 %v4980_v38, 16  ;;  %v4997_v43 = vadd.s32 %v1185_v5, %v1166_v26 }
  0xf6   :  { %vm4989_vm4 = vcmp.le.f32.partialorder %v8299_v29, 0.7853982  ;;  %vm4332_vm5 = vcmp.lt.s32.totalorder %v4331_v58, 0  ;;  %v4999_v6 = vshrl.u32 %v1195_v49, 30  ;;  %v995_v50 = vmul.u32 %v993_v36, %v990_v39 }
  0xf7   :  { %v1360_v7 = vsel %vm4332_vm5, 0, %v4331_v58  ;;  %v5004_v60 = vsel %vm973_vm12, %v957_v35, %v4836_v53  ;;  %v5006_v52 = vmul.u32 %v992_v9, %v991_v62  ;;  %v1014_v56 = vand.u32 65535, %v4980_v38 }
  0xf8   :  { %v1361_v41 = vsub.s32 32, %v1360_v7  ;;  %v1365_v40 = vsub.s32 4294967266, %v1360_v7  ;;  %v1376_v26 = vsel %vm1253_vm3, %v1375_v16, %v4920_v33  ;;  %v1197_v5 = vshll.u32 %v4999_v6, 30 }
  0xf9   :  { %v978_v48 = vsel %vm976_vm9, %v966_v34, 2102212464  ;;  %v994_v30 = vmul.u32 %v992_v9, %v990_v39  ;;  %v998_v57 = vshll.u32 %v995_v50, 16  ;;  %v5015_v0 = vmul.u32 %v1015_v28, %v990_v39 }
  0xfa   :  { %v1362_v53 = vshll.u32 %v1353_v2, %v1360_v7  ;;  %v1363_v25 = vshrl.u32 %v1345_v23, %v1361_v41  ;;  %v1366_v51 = vadd.s32 127, %v1365_v40  ;;  %v1198_v54 = vsub.s32 %v1194_v46, %v1197_v5 }
  0xfb   :  { %v1000_v55 = vshll.u32 %v5006_v52, 16  ;;  %vm1002_vm6 = vc.u32 %v994_v30, %v998_v57  ;;  %v1004_v4 = vadd.s32 %v998_v57, %v994_v30  ;;  %v5018_v13 = vmul.u32 %v1014_v56, %v991_v62 }
  0xfc   :  { %v1364_v33 = vor.u32 %v1363_v25, %v1362_v53  ;;  %v1367_v1 = vshll.u32 %v1366_v51, 23  ;;  %vm1098_vm7 = vcmp.lt.s32.totalorder %v4704_v42, 0  ;;  %vm1199_vm10 = vcmp.lt.s32.totalorder %v1198_v54, 0 }
  0xfd   :  { %v1200_v34 = vsub.s32 0, %v1198_v54  ;;  %v997_v32 = vmul.u32 %v993_v36, %v991_v62  ;;  %v1003_v27 = vsel %vm1002_vm6, 1, %v8295_v19  ;;  %vm1006_vm9 = vc.u32 %v1004_v4, %v1000_v55 }
  0xfe   :  { %v1020_v2 = vshll.u32 %v5015_v0, 16  ;;  %v1368_v38 = vor.u32 4788187, %v1367_v1  ;;  %v1378_v46 = vsel %vm4989_vm4, 0, %v1376_v26  ;;  %v1016_v35 = vmul.u32 %v1014_v56, %v990_v39 }
  0xff   :  { %v1201_v16 = vsel %vm1199_vm10, %v1200_v34, %v1198_v54  ;;  %v1220_v58 = vsub.s32 4, %v4999_v6  ;;  %v1005_v49 = vadd.s32 %v1003_v27, %v997_v32  ;;  %v1007_v29 = vsel %vm1006_vm9, 1, %v8295_v19 }
 0x100   :  { %v1202_v9 = vclz %v1201_v16  ;;  %v1369_v23 = vand.u32 2147483647, %v1368_v38  ;;  %v1371_v7 = vcvt.s32.f32 %v1364_v33  ;;  %v999_v36 = vshrl.u32 %v995_v50, 16 }
 0x101   :  { %v1022_v41 = vshll.u32 %v5018_v13, 16  ;;  %v1009_v5 = vadd.s32 %v1007_v29, %v1005_v49  ;;  %vm1024_vm11 = vc.u32 %v1016_v35, %v1020_v2  ;;  %v1026_v30 = vadd.s32 %v1020_v2, %v1016_v35 }
 0x102   :  { %v4328_v40 = vadd.s32 4294967294, %v1202_v9  ;;  %v1372_v57 = vmul.f32 %v1371_v7, %v1369_v23  ;;  %v1395_v53 = vadd.s32 3, %v1378_v46  ;;  %v979_v39 = vsel %vm975_vm0, %v4934_v22, %v978_v48 }
 0x103   :  { %v1019_v56 = vmul.u32 %v1015_v28, %v991_v62  ;;  %v1010_v26 = vadd.s32 %v1009_v5, %v999_v36  ;;  %v1025_v25 = vsel %vm1024_vm11, 1, %v8295_v19  ;;  %vm1028_vm15 = vc.u32 %v1026_v30, %v1022_v41 }
 0x104   :  { %vm4329_vm14 = vcmp.lt.s32.totalorder %v4328_v40, 0  ;;  %v1373_v51 = vxor.u32 2147483648, %v1372_v57  ;;  %v1029_v4 = vsel %vm1028_vm15, 1, %v8295_v19  ;;  %vm821_vm12 = vcmp.lt.s32.totalorder %v4769_v20, 4 }
 0x105   :  { %v1205_v50 = vsel %vm4329_vm14, 0, %v4328_v40  ;;  %v1027_v55 = vadd.s32 %v1025_v25, %v1019_v56  ;;  %v1221_v34 = vsel %vm1098_vm7, %v1220_v58, %v4999_v6  ;;  %v1001_v22 = vshrl.u32 %v5006_v52, 16 }
 0x106   :  { %v1206_v33 = vsub.s32 32, %v1205_v50  ;;  %v1210_v1 = vsub.s32 4294967266, %v1205_v50  ;;  %v1374_v62 = vsel %vm1253_vm3, %v1373_v51, %v1372_v57  ;;  %v1207_v28 = vshll.u32 %v1198_v54, %v1205_v50 }
 0x107   :  { %v1021_v48 = vshrl.u32 %v5015_v0, 16  ;;  %v1031_v32 = vadd.s32 %v1029_v4, %v1027_v55  ;;  %v5044_v27 = vsel %vm4989_vm4, %v4755_v15, %v1374_v62  ;;  %v5047_v46 = vadd.s32 %v1010_v26, %v1001_v22 }
 0x108   :  { %v1208_v2 = vshrl.u32 %v4997_v43, %v1206_v33  ;;  %v1211_v38 = vadd.s32 127, %v1210_v1  ;;  %v1379_v6 = vmul.f32 %v5044_v27, %v5044_v27  ;;  %v8302_v52 = vand.u32 2147483647, %v4704_v42 }
 0x109   :  { %v1023_v0 = vshrl.u32 %v5018_v13, 16  ;;  %v1032_v16 = vadd.s32 %v1031_v32, %v1021_v48  ;;  %v5060_v9 = vadd.s32 %v1026_v30, %v1022_v41  ;;  %v980_v29 = vsel %vm974_vm2, %v5004_v60, %v979_v39 }
 0x10a   :  { %vm5053_vm13 = vcmp.le.f32.partialorder %v8302_v52, 0.7853982  ;;  %v1209_v24 = vor.u32 %v1208_v2, %v1207_v28  ;;  %v1212_v35 = vshll.u32 %v1211_v38, 23  ;;  %v1380_v58 = vmul.f32 -0.001358992, %v1379_v6 }
 0x10b   :  { %v1223_v43 = vsel %vm5053_vm13, 0, %v1221_v34  ;;  %v1387_v49 = vmul.f32 -0.00019511016, %v1379_v6  ;;  %v1033_v23 = vadd.s32 %v1032_v16, %v1023_v0  ;;  %v817_v7 = vor.u32 %v4971_v59, %v4789_v37 }
 0x10c   :  { %v5067_v36 = vand.u32 3, %v1395_v53  ;;  %v1213_v13 = vor.u32 4788187, %v1212_v35  ;;  %vm1036_vm0 = vc.u32 %v5047_v46, %v5060_v9  ;;  %v1381_v40 = vadd.f32 0.041655596, %v1380_v58 }
 0x10d   :  { %v1388_v5 = vadd.f32 0.008332121, %v1387_v49  ;;  %v1240_v41 = vadd.s32 3, %v1223_v43  ;;  %v1037_v30 = vadd.s32 1, %v1033_v23  ;;  %v1216_v56 = vcvt.s32.f32 %v1209_v24 }
 0x10e   :  { %v1214_v57 = vand.u32 2147483647, %v1213_v13  ;;  %v1034_v26 = vmul.u32 %v4967_v18, %v980_v29  ;;  %v786_v47 = vand.u32 2147483647, %v4661_v10  ;;  %v827_v37 = vsel %vm821_vm12, %v4976_v3, 920167782 }
 0x10f   :  { %v1382_v59 = vmul.f32 %v1381_v40, %v1379_v6  ;;  %v1389_v60 = vmul.f32 %v1388_v5, %v1379_v6  ;;  %v1038_v53 = vsel %vm1036_vm0, %v1037_v30, %v1033_v23  ;;  %v831_v39 = vsel %vm821_vm12, %v817_v7, 1326507024 }
 0x110   :  { %v1217_v25 = vmul.f32 %v1216_v56, %v1214_v57  ;;  %v1039_v51 = vadd.s32 %v1038_v53, %v1034_v26  ;;  %v804_v50 = vshrl.u32 %v8296_v8, %v4781_v31  ;;  %v5080_v18 = vand.u32 3, %v1240_v41 }
 0x111   :  { %v1383_v55 = vadd.f32 -0.4999988, %v1382_v59  ;;  %v1390_v4 = vadd.f32 -0.16666654, %v1389_v60  ;;  %v807_v33 = vshrl.u32 %v8293_v63, %v4781_v31  ;;  %vm1398_vm1 = vcmp.eq.s32.totalorder %v5067_v36, 0 }
 0x112   :  { %vm1401_vm2 = vcmp.eq.s32.totalorder %v5067_v36, 2  ;;  %v1218_v1 = vxor.u32 2147483648, %v1217_v25  ;;  %v1040_v34 = vadd.s32 536870912, %v1039_v51  ;;  %v793_v22 = vand.u32 8388607, %v786_v47 }
 0x113   :  { %v803_v62 = vshll.u32 %v8290_v61, %v4751_v12  ;;  %v1384_v28 = vmul.f32 %v1383_v55, %v1379_v6  ;;  %v1391_v48 = vmul.f32 %v1390_v4, %v1379_v6  ;;  %vm1397_vm3 = vcmp.lt.s32.totalorder %v5067_v36, 2 }
 0x114   :  { %v806_v32 = vshll.u32 %v8296_v8, %v4751_v12  ;;  %v810_v2 = vshrl.u32 %v8289_v44, %v4781_v31  ;;  %vm1394_vm4 = vweird.f32 %v4755_v15  ;;  %v1219_v38 = vsel %vm1098_vm7, %v1218_v1, %v1217_v25 }
 0x115   :  { %v5098_v52 = vshrl.u32 %v1040_v34, 30  ;;  %v805_v0 = vor.u32 %v804_v50, %v803_v62  ;;  %v809_v16 = vshll.u32 %v8293_v63, %v4751_v12  ;;  %v1385_v6 = vadd.f32 1.0, %v1384_v28 }
 0x116   :  { %v1392_v24 = vadd.f32 1.0, %v1391_v48  ;;  %v5105_v35 = vsel %vm5053_vm13, %v4704_v42, %v1219_v38  ;;  %v808_v43 = vor.u32 %v807_v33, %v806_v32  ;;  %v794_v29 = vor.u32 8388608, %v793_v22 }
 0x117   :  { %v1224_v58 = vmul.f32 %v5105_v35, %v5105_v35  ;;  %v1042_v49 = vshll.u32 %v5098_v52, 30  ;;  %v802_v23 = vshrl.u32 %v8290_v61, %v4781_v31  ;;  %v1402_v12 = vxor.u32 2147483648, %v1385_v6 }
 0x118   :  { %v1393_v7 = vmul.f32 %v1392_v24, %v5044_v27  ;;  %v811_v13 = vor.u32 %v810_v2, %v809_v16  ;;  %vm818_vm5 = vcmp.lt.s32.totalorder %v4769_v20, 1  ;;  %vm820_vm6 = vcmp.lt.s32.totalorder %v4769_v20, 3 }
 0x119   :  { %v1225_v40 = vmul.f32 -0.001358992, %v1224_v58  ;;  %v1232_v54 = vmul.f32 -0.00019511016, %v1224_v58  ;;  %v5114_v5 = vsub.s32 %v1039_v51, %v1042_v49  ;;  %vm819_vm7 = vcmp.lt.s32.totalorder %v4769_v20, 2  ;;  %v8309_v20 = vld [vmem:[#allocation26_spill] sm:$0xff] }
 0x11a   :  { %v1399_v41 = vxor.u32 2147483648, %v1393_v7  ;;  %v826_v30 = vsel %vm818_vm5, %v805_v0, %v808_v43  ;;  %v832_v31 = vsel %vm820_vm6, %v4976_v3, %v831_v39  ;;  %v1403_v59 = vsel %vm1401_vm2, %v1402_v12, %v1393_v7 }
 0x11b   :  { %v1226_v27 = vadd.f32 0.041655596, %v1225_v40  ;;  %v1233_v57 = vadd.f32 0.008332121, %v1232_v54  ;;  %vm1044_vm10 = vcmp.lt.s32.totalorder %v5114_v5, 0  ;;  %v1045_v56 = vsub.s32 0, %v5114_v5 }
 0x11c   :  { %v1400_v26 = vsel %vm1398_vm1, %v1385_v6, %v1399_v41  ;;  %v828_v60 = vsel %vm820_vm6, %v811_v13, %v827_v37  ;;  %v830_v53 = vsel %vm818_vm5, %v808_v43, %v811_v13  ;;  %vm1246_vm9 = vcmp.eq.s32.totalorder %v5080_v18, 2 }
 0x11d   :  { %v1404_v3 = vsel %vm1397_vm3, %v1400_v26, %v1403_v59  ;;  %v1227_v39 = vmul.f32 %v1226_v27, %v1224_v58  ;;  %v1234_v25 = vmul.f32 %v1233_v57, %v1224_v58  ;;  %v1046_v51 = vsel %vm1044_vm10, %v1045_v56, %v5114_v5 }
 0x11e   :  { %v1405_v50 = vsel %vm1394_vm4, nan, %v1404_v3  ;;  %v1047_v55 = vclz %v1046_v51  ;;  %v833_v4 = vsel %vm819_vm7, %v830_v53, %v832_v31  ;;  %v5141_v37 = vshll.u32 %v794_v29, 8 }
 0x11f   :  { %v5145_v33 = vor.u32 %v4763_v17, %v4749_v11  ;;  %1495 = vmatpush.msra.mxu1 %v1405_v50  ;;  %v1228_v36 = vadd.f32 -0.4999988, %v1227_v39  ;;  %v1235_v1 = vadd.f32 -0.16666654, %v1234_v25  ;;  %v823_v34 = vsel %vm821_vm12, %v811_v13, 2102212464 }
 0x120   :  { %vm1243_vm11 = vcmp.eq.s32.totalorder %v5080_v18, 0  ;;  %v1035_v15 = vadd.s32 %v5060_v9, %v5047_v46  ;;  %v4325_v22 = vadd.s32 4294967294, %v1047_v55  ;;  %v5154_v62 = vsel %vm818_vm5, %v802_v23, %v805_v0 }
 0x121   :  { %v829_v11 = vsel %vm819_vm7, %v826_v30, %v828_v60  ;;  %v1229_v17 = vmul.f32 %v1228_v36, %v1224_v58  ;;  %v1236_v28 = vmul.f32 %v1235_v1, %v1224_v58  ;;  %vm1242_vm14 = vcmp.lt.s32.totalorder %v5080_v18, 2 }
 0x122   :  { %vm943_vm15 = vcmp.lt.s32.totalorder %v4666_v21, 0  ;;  %v837_v48 = vand.u32 65535, %v833_v4  ;;  %v838_v32 = vshrl.u32 %v833_v4, 16  ;;  %vm1239_vm12 = vweird.f32 %v4704_v42 }
 0x123   :  { %vm4326_vm13 = vcmp.lt.s32.totalorder %v4325_v22, 0  ;;  %v1065_v46 = vsub.s32 4, %v5098_v52  ;;  %v824_v9 = vsel %vm820_vm6, %v808_v43, %v823_v34  ;;  %v835_v2 = vand.u32 65535, %v5141_v37 }
 0x124   :  { %v1230_v38 = vadd.f32 1.0, %v1229_v17  ;;  %v1237_v0 = vadd.f32 1.0, %v1236_v28  ;;  %v1050_v16 = vsel %vm4326_vm13, 0, %v4325_v22  ;;  %v836_v6 = vshrl.u32 %v5141_v37, 16 }
 0x125   :  { %v1051_v24 = vsub.s32 32, %v1050_v16  ;;  %v1055_v58 = vsub.s32 4294967266, %v1050_v16  ;;  %v840_v49 = vmul.u32 %v838_v32, %v835_v2  ;;  %v860_v29 = vshrl.u32 %v829_v11, 16 }
 0x126   :  { %v1238_v23 = vmul.f32 %v1237_v0, %v5105_v35  ;;  %v1247_v7 = vxor.u32 2147483648, %v1230_v38  ;;  %v839_v12 = vmul.u32 %v837_v48, %v835_v2  ;;  %v841_v13 = vmul.u32 %v837_v48, %v836_v6 }
 0x127   :  { %v1052_v40 = vshll.u32 %v5114_v5, %v1050_v16  ;;  %v1053_v54 = vshrl.u32 %v1035_v15, %v1051_v24  ;;  %v1056_v43 = vadd.s32 127, %v1055_v58  ;;  %v843_v41 = vshll.u32 %v840_v49, 16 }
 0x128   :  { %v1244_v30 = vxor.u32 2147483648, %v1238_v23  ;;  %v1248_v31 = vsel %vm1246_vm9, %v1247_v7, %v1238_v23  ;;  %v8305_v27 = vand.u32 2147483647, %v4666_v21  ;;  %v842_v56 = vmul.u32 %v838_v32, %v836_v6 }
 0x129   :  { %v859_v35 = vand.u32 65535, %v829_v11  ;;  %v1054_v26 = vor.u32 %v1053_v54, %v1052_v40  ;;  %v1057_v59 = vshll.u32 %v1056_v43, 23  ;;  %vm847_vm1 = vc.u32 %v839_v12, %v843_v41 }
 0x12a   :  { %vm5172_vm0 = vcmp.le.f32.partialorder %v8305_v27, 0.7853982  ;;  %v849_v60 = vadd.s32 %v843_v41, %v839_v12  ;;  %v1245_v5 = vsel %vm1243_vm11, %v1230_v38, %v1244_v30  ;;  %v845_v53 = vshll.u32 %v841_v13, 16  ;;  %v8311_v30 = vld [vmem:[#allocation11_spill] sm:$0xff] }
 0x12b   :  { %v848_v3 = vsel %vm847_vm1, 1, %v8295_v19  ;;  %v862_v39 = vmul.u32 %v860_v29, %v835_v2  ;;  %v1249_v25 = vsel %vm1242_vm14, %v1245_v5, %v1248_v31  ;;  %v1058_v51 = vor.u32 4788187, %v1057_v59 }
 0x12c   :  { %v1066_v50 = vsel %vm943_vm15, %v1065_v46, %v5098_v52  ;;  %v850_v55 = vadd.s32 %v848_v3, %v842_v56  ;;  %v1250_v4 = vsel %vm1239_vm12, nan, %v1249_v25  ;;  %vm851_vm2 = vc.u32 %v849_v60, %v845_v53  ;;  %v8308_v46 = vld [vmem:[#allocation8_spill] sm:$0xff] }
 0x12d   :  { %v861_v36 = vmul.u32 %v859_v35, %v835_v2  ;;  %v863_v1 = vmul.u32 %v859_v35, %v836_v6  ;;  %1496 = vmatpush.msra.mxu1 %v1250_v4  ;;  %v1059_v34 = vand.u32 2147483647, %v1058_v51  ;;  %v1061_v15 = vcvt.s32.f32 %v1054_v26 }
 0x12e   :  { %v852_v22 = vsel %vm851_vm2, 1, %v8295_v19  ;;  %v865_v11 = vshll.u32 %v862_v39, 16  ;;  %v844_v18 = vshrl.u32 %v840_v49, 16  ;;  %v864_v28 = vmul.u32 %v860_v29, %v836_v6 }
 0x12f   :  { %v854_v17 = vadd.s32 %v852_v22, %v850_v55  ;;  %v867_v48 = vshll.u32 %v863_v1, 16  ;;  %v1062_v32 = vmul.f32 %v1061_v15, %v1059_v34  ;;  %v631_v38 = vand.u32 2147483647, %v8308_v46  ;;  %v8314_v15 = vld [vmem:[#allocation27_spill] sm:$0xff]  ;;  %v8315_v22 = vld [vmem:[#allocation29_spill] sm:$0xff] }
 0x130   :  { %vm869_vm3 = vc.u32 %v861_v36, %v865_v11  ;;  %v871_v52 = vadd.s32 %v865_v11, %v861_v36  ;;  %v825_v42 = vsel %vm819_vm7, %v5154_v62, %v824_v9  ;;  %v846_v2 = vshrl.u32 %v841_v13, 16  ;;  %v8310_v13 = vld [vmem:[#allocation15_spill] sm:$0xff] }
 0x131   :  { %v855_v0 = vadd.s32 %v854_v17, %v844_v18  ;;  %v870_v16 = vsel %vm869_vm3, 1, %v8295_v19  ;;  %v1063_v24 = vxor.u32 2147483648, %v1062_v32  ;;  %v1068_v58 = vsel %vm5172_vm0, 0, %v1066_v50  ;;  %v8312_v50 = vld [vmem:[#allocation24_spill] sm:$0xff] }
 0x132   :  { %v872_v49 = vadd.s32 %v870_v16, %v864_v28  ;;  %vm873_vm4 = vc.u32 %v871_v52, %v867_v48  ;;  %v866_v29 = vshrl.u32 %v862_v39, 16  ;;  %v638_v7 = vand.u32 8388607, %v631_v38 }
 0x133   :  { %v5194_v6 = vadd.s32 %v855_v0, %v846_v2  ;;  %v874_v23 = vsel %vm873_vm4, 1, %v8295_v19  ;;  %vm511_vm5 = vcmp.lt.s32.totalorder %v8309_v20, 4  ;;  %v1064_v62 = vsel %vm943_vm15, %v1063_v24, %v1062_v32  ;;  %v8316_v2 = vld [vmem:[#allocation28_spill] sm:$0xff] }
 0x134   :  { %v5202_v9 = vadd.s32 %v871_v52, %v867_v48  ;;  %v876_v12 = vadd.s32 %v874_v23, %v872_v49  ;;  %v649_v40 = vshrl.u32 %v8296_v8, %v8310_v13  ;;  %v1067_v54 = vsel %vm5172_vm0, %v4666_v21, %v1064_v62 }
 0x135   :  { %v1085_v43 = vadd.s32 3, %v1068_v58  ;;  %v868_v41 = vshrl.u32 %v863_v1, 16  ;;  %v648_v31 = vshll.u32 %v8290_v61, %v8311_v30  ;;  %v1069_v27 = vmul.f32 %v1067_v54, %v1067_v54  ;;  %v8313_v1 = vld [vmem:[#allocation30_spill] sm:$0xff] }
 0x136   :  { %v877_v56 = vadd.s32 %v876_v12, %v866_v29  ;;  %vm881_vm6 = vc.u32 %v5194_v6, %v5202_v9  ;;  %v639_v35 = vor.u32 8388608, %v638_v7  ;;  %v651_v26 = vshll.u32 %v8296_v8, %v8311_v30 }
 0x137   :  { %v652_v59 = vshrl.u32 %v8293_v63, %v8310_v13  ;;  %v654_v57 = vshll.u32 %v8293_v63, %v8311_v30  ;;  %v655_v60 = vshrl.u32 %v8289_v44, %v8310_v13  ;;  %v1070_v5 = vmul.f32 -0.001358992, %v1069_v27 }
 0x138   :  { %v1077_v53 = vmul.f32 -0.00019511016, %v1069_v27  ;;  %v878_v3 = vadd.s32 %v877_v56, %v868_v41  ;;  %v5221_v39 = vor.u32 %v649_v40, %v648_v31  ;;  %vm663_vm7 = vcmp.lt.s32.totalorder %v8312_v50, 1 }
 0x139   :  { %v5223_v25 = vor.u32 %v652_v59, %v651_v26  ;;  %v5225_v51 = vor.u32 %v655_v60, %v654_v57  ;;  %vm665_vm10 = vcmp.lt.s32.totalorder %v8312_v50, 3  ;;  %v1071_v55 = vadd.f32 0.041655596, %v1070_v5 }
 0x13a   :  { %v1078_v4 = vadd.f32 0.008332121, %v1077_v53  ;;  %v882_v36 = vadd.s32 1, %v878_v3  ;;  %v677_v34 = vsel %vm665_vm10, %v5145_v33, %v8313_v1  ;;  %v507_v11 = vor.u32 %v8315_v22, %v8314_v15 }
 0x13b   :  { %v672_v18 = vsel %vm666_vm8, %v5145_v33, 920167782  ;;  %v879_v17 = vmul.u32 %v5141_v37, %v825_v42  ;;  %v675_v28 = vsel %vm663_vm7, %v5223_v25, %v5225_v51  ;;  %v1072_v48 = vmul.f32 %v1071_v55, %v1069_v27 }
 0x13c   :  { %v1079_v32 = vmul.f32 %v1078_v4, %v1069_v27  ;;  %v883_v52 = vsel %vm881_vm6, %v882_v36, %v878_v3  ;;  %vm664_vm9 = vcmp.lt.s32.totalorder %v8312_v50, 2  ;;  %v5250_v0 = vsel %vm511_vm5, %v8316_v2, 920167782 }
 0x13d   :  { %v1086_v33 = vand.u32 3, %v1085_v43  ;;  %v884_v37 = vadd.s32 %v883_v52, %v879_v17  ;;  %v678_v42 = vsel %vm664_vm9, %v675_v28, %v677_v34  ;;  %v1073_v16 = vadd.f32 -0.4999988, %v1072_v48 }
 0x13e   :  { %v1080_v24 = vadd.f32 -0.16666654, %v1079_v32  ;;  %v671_v58 = vsel %vm663_vm7, %v5221_v39, %v5223_v25  ;;  %v5258_v49 = vshll.u32 %v639_v35, 8  ;;  %v673_v23 = vsel %vm665_vm10, %v5225_v51, %v672_v18 }
 0x13f   :  { %v885_v29 = vadd.s32 536870912, %v884_v37  ;;  %v682_v7 = vand.u32 65535, %v678_v42  ;;  %v683_v62 = vshrl.u32 %v678_v42, 16  ;;  %v5265_v12 = vsel %vm511_vm5, %v507_v11, 1326507024 }
 0x140   :  { %v1074_v40 = vmul.f32 %v1073_v16, %v1069_v27  ;;  %v1081_v43 = vmul.f32 %v1080_v24, %v1069_v27  ;;  %v680_v41 = vand.u32 65535, %v5258_v49  ;;  %vm1084_vm11 = vweird.f32 %v4666_v21 }
 0x141   :  { %vm1087_vm14 = vcmp.lt.s32.totalorder %v1086_v33, 2  ;;  %v886_v30 = vshrl.u32 %v885_v29, 30  ;;  %v681_v31 = vshrl.u32 %v5258_v49, 16  ;;  %v674_v26 = vsel %vm664_vm9, %v671_v58, %v673_v23  ;;  %v8317_v23 = vld [vmem:[#allocation7_spill] sm:$0xff] }
 0x142   :  { %v1075_v56 = vadd.f32 1.0, %v1074_v40  ;;  %v1082_v35 = vadd.f32 1.0, %v1081_v43  ;;  %v685_v59 = vmul.u32 %v683_v62, %v680_v41  ;;  %vm1088_vm15 = vcmp.eq.s32.totalorder %v1086_v33, 0 }
 0x143   :  { %vm1091_vm12 = vcmp.eq.s32.totalorder %v1086_v33, 2  ;;  %v887_v57 = vshll.u32 %v886_v30, 30  ;;  %v5272_v60 = vmul.u32 %v682_v7, %v681_v31  ;;  %vm788_vm13 = vcmp.lt.s32.totalorder %v4661_v10, 0 }
 0x144   :  { %v1083_v27 = vmul.f32 %v1082_v35, %v1067_v54  ;;  %v1092_v5 = vxor.u32 2147483648, %v1075_v56  ;;  %v684_v53 = vmul.u32 %v682_v7, %v680_v41  ;;  %v688_v3 = vshll.u32 %v685_v59, 16 }
 0x145   :  { %v880_v55 = vadd.s32 %v5202_v9, %v5194_v6  ;;  %v888_v4 = vsub.s32 %v884_v37, %v887_v57  ;;  %v647_v36 = vshrl.u32 %v8290_v61, %v8310_v13  ;;  %v705_v1 = vshrl.u32 %v674_v26, 16 }
 0x146   :  { %v1089_v34 = vxor.u32 2147483648, %v1083_v27  ;;  %v687_v15 = vmul.u32 %v683_v62, %v681_v31  ;;  %vm692_vm0 = vc.u32 %v684_v53, %v688_v3  ;;  %v704_v22 = vand.u32 65535, %v674_v26 }
 0x147   :  { %vm889_vm1 = vcmp.lt.s32.totalorder %v888_v4, 0  ;;  %v890_v11 = vsub.s32 0, %v888_v4  ;;  %v690_v54 = vshll.u32 %v5272_v60, 16  ;;  %v693_v18 = vsel %vm692_vm0, 1, %v8295_v19 }
 0x148   :  { %v1090_v17 = vsel %vm1088_vm15, %v1075_v56, %v1089_v34  ;;  %v1093_v28 = vsel %vm1091_vm12, %v1092_v5, %v1083_v27  ;;  %v694_v6 = vadd.s32 %v688_v3, %v684_v53  ;;  %v695_v9 = vadd.s32 %v693_v18, %v687_v15 }
 0x149   :  { %v1094_v48 = vsel %vm1087_vm14, %v1090_v17, %v1093_v28  ;;  %v891_v13 = vsel %vm889_vm1, %v890_v11, %v888_v4  ;;  %v910_v32 = vsub.s32 4, %v886_v30  ;;  %v707_v52 = vmul.u32 %v705_v1, %v680_v41  ;;  %v8320_v17 = vld [vmem:[#allocation12_spill] sm:$0xff] }
 0x14a   :  { %v1095_v37 = vsel %vm1084_vm11, nan, %v1094_v48  ;;  %v892_v42 = vclz %v891_v13  ;;  %v668_v16 = vsel %vm666_vm8, %v5225_v51, 2102212464  ;;  %vm696_vm2 = vc.u32 %v694_v6, %v690_v54 }
 0x14b   :  { %1497 = vmatpush.msra.mxu1 %v1095_v37  ;;  %v689_v24 = vshrl.u32 %v685_v59, 16  ;;  %v697_v58 = vsel %vm696_vm2, 1, %v8295_v19  ;;  %v708_v29 = vmul.u32 %v704_v22, %v681_v31  ;;  %v476_v33 = vand.u32 2147483647, %v8317_v23 }
 0x14c   :  { %v4322_v7 = vadd.s32 4294967294, %v892_v42  ;;  %v699_v62 = vadd.s32 %v697_v58, %v695_v9  ;;  %v706_v40 = vmul.u32 %v704_v22, %v680_v41  ;;  %v710_v43 = vshll.u32 %v707_v52, 16  ;;  %v8321_v9 = vld [vmem:[#allocation18_spill] sm:$0xff] }
 0x14d   :  { %vm5293_vm3 = vcmp.le.f32.partialorder %v786_v47, 0.7853982  ;;  %v911_v51 = vsel %vm788_vm13, %v910_v32, %v886_v30  ;;  %v667_v56 = vsel %vm663_vm7, %v647_v36, %v5221_v39  ;;  %v669_v35 = vsel %vm665_vm10, %v5223_v25, %v668_v16 }
 0x14e   :  { %v709_v26 = vmul.u32 %v705_v1, %v681_v31  ;;  %vm4323_vm8 = vcmp.lt.s32.totalorder %v4322_v7, 0  ;;  %v700_v41 = vadd.s32 %v699_v62, %v689_v24  ;;  %vm714_vm4 = vc.u32 %v706_v40, %v710_v43 }
 0x14f   :  { %v716_v59 = vadd.s32 %v710_v43, %v706_v40  ;;  %v895_v47 = vsel %vm4323_vm8, 0, %v4322_v7  ;;  %v712_v57 = vshll.u32 %v708_v29, 16  ;;  %v715_v27 = vsel %vm714_vm4, 1, %v8295_v19 }
 0x150   :  { %v483_v30 = vand.u32 8388607, %v476_v33  ;;  %v896_v5 = vsub.s32 32, %v895_v47  ;;  %v900_v53 = vsub.s32 4294967266, %v895_v47  ;;  %v691_v39 = vshrl.u32 %v5272_v60, 16 }
 0x151   :  { %v711_v3 = vshrl.u32 %v707_v52, 16  ;;  %v897_v36 = vshll.u32 %v888_v4, %v895_v47  ;;  %v713_v34 = vshrl.u32 %v708_v29, 16  ;;  %v717_v25 = vadd.s32 %v715_v27, %v709_v26  ;;  %v8323_v26 = vld [vmem:[#allocation23_spill] sm:$0xff] }
 0x152   :  { %vm718_vm6 = vc.u32 %v716_v59, %v712_v57  ;;  %v898_v31 = vshrl.u32 %v880_v55, %v896_v5  ;;  %v901_v1 = vadd.s32 127, %v900_v53  ;;  %v5309_v15 = vadd.s32 %v700_v41, %v691_v39 }
 0x153   :  { %v719_v22 = vsel %vm718_vm6, 1, %v8295_v19  ;;  %v5312_v11 = vadd.s32 %v716_v59, %v712_v57  ;;  %v484_v18 = vor.u32 8388608, %v483_v30  ;;  %v493_v28 = vshll.u32 %v8290_v61, %v8320_v17 }
 0x154   :  { %v721_v54 = vadd.s32 %v719_v22, %v717_v25  ;;  %v899_v6 = vor.u32 %v898_v31, %v897_v36  ;;  %v902_v60 = vshll.u32 %v901_v1, 23  ;;  %v494_v4 = vshrl.u32 %v8296_v8, %v8321_v9  ;;  %v8324_v31 = vld [vmem:[#allocation13_spill] sm:$0xff] }
 0x155   :  { %v496_v55 = vshll.u32 %v8296_v8, %v8320_v17  ;;  %v497_v13 = vshrl.u32 %v8293_v63, %v8321_v9  ;;  %v499_v32 = vshll.u32 %v8293_v63, %v8320_v17  ;;  %v500_v52 = vshrl.u32 %v8289_v44, %v8321_v9 }
 0x156   :  { %v722_v48 = vadd.s32 %v721_v54, %v711_v3  ;;  %v903_v37 = vor.u32 4788187, %v902_v60  ;;  %v913_v42 = vsel %vm5293_vm3, 0, %v911_v51  ;;  %v670_v16 = vsel %vm664_vm9, %v667_v56, %v669_v35  ;;  %v8322_v35 = vld [vmem:[#allocation22_spill] sm:$0xff] }
 0x157   :  { %v495_v24 = vor.u32 %v494_v4, %v493_v28  ;;  %vm726_vm7 = vc.u32 %v5309_v15, %v5312_v11  ;;  %v5332_v29 = vor.u32 %v497_v13, %v496_v55  ;;  %v501_v7 = vor.u32 %v500_v52, %v499_v32 }
 0x158   :  { %v723_v58 = vadd.s32 %v722_v48, %v713_v34  ;;  %v904_v62 = vand.u32 2147483647, %v903_v37  ;;  %v906_v40 = vcvt.s32.f32 %v899_v6  ;;  %vm508_vm10 = vcmp.lt.s32.totalorder %v8309_v20, 1  ;;  %v8326_v6 = vld [vmem:[#allocation25_spill] sm:$0xff] }
 0x159   :  { %vm510_vm11 = vcmp.lt.s32.totalorder %v8309_v20, 3  ;;  %v516_v50 = vsel %vm508_vm10, %v495_v24, %v5332_v29  ;;  %v5342_v56 = vshll.u32 %v484_v18, 8  ;;  %v352_v41 = vor.u32 %v8323_v26, %v8322_v35 }
 0x15a   :  { %v727_v43 = vadd.s32 1, %v723_v58  ;;  %v518_v51 = vsel %vm510_vm11, %v501_v7, %v5250_v0  ;;  %v907_v59 = vmul.f32 %v906_v40, %v904_v62  ;;  %v724_v47 = vmul.u32 %v5258_v49, %v670_v16 }
 0x15b   :  { %v520_v57 = vsel %vm508_vm10, %v5332_v29, %v501_v7  ;;  %v930_v27 = vadd.s32 3, %v913_v42  ;;  %vm509_vm9 = vcmp.lt.s32.totalorder %v8309_v20, 2  ;;  %v522_v0 = vsel %vm510_vm11, %v8316_v2, %v5265_v12  ;;  %v8325_v2 = vld [vmem:[#allocation21_spill] sm:$0xff] }
 0x15c   :  { %v728_v30 = vsel %vm726_vm7, %v727_v43, %v723_v58  ;;  %v908_v5 = vxor.u32 2147483648, %v907_v59  ;;  %v5360_v49 = vsel %vm509_vm9, %v516_v50, %v518_v51  ;;  %v523_v39 = vsel %vm509_vm9, %v520_v57, %v522_v0 }
 0x15d   :  { %v729_v53 = vadd.s32 %v728_v30, %v724_v47  ;;  %v525_v3 = vand.u32 65535, %v5342_v56  ;;  %v5366_v36 = vshrl.u32 %v5342_v56, 16  ;;  %v527_v34 = vand.u32 65535, %v523_v39 }
 0x15e   :  { %v528_v25 = vshrl.u32 %v523_v39, 16  ;;  %v5370_v1 = vshrl.u32 %v8292_v45, %v8324_v31  ;;  %vm356_vm14 = vcmp.lt.s32.totalorder %v8325_v2, 4  ;;  %v909_v12 = vsel %vm788_vm13, %v908_v5, %v907_v59 }
 0x15f   :  { %v730_v22 = vadd.s32 536870912, %v729_v53  ;;  %v5378_v54 = vsel %vm5293_vm3, %v4661_v10, %v909_v12  ;;  %v5381_v17 = vmul.u32 %v527_v34, %v5366_v36  ;;  %v550_v28 = vshrl.u32 %v5360_v49, 16 }
 0x160   :  { %v530_v18 = vmul.u32 %v528_v25, %v525_v3  ;;  %v5387_v60 = vsel %vm356_vm14, %v8326_v6, 920167782  ;;  %v5391_v4 = vsel %vm356_vm14, %v352_v41, 1326507024  ;;  %v914_v21 = vmul.f32 %v5378_v54, %v5378_v54 }
 0x161   :  { %v5395_v55 = vshrl.u32 %v730_v22, 30  ;;  %v5397_v48 = vand.u32 3, %v930_v27  ;;  %v513_v13 = vsel %vm511_vm5, %v501_v7, 2102212464  ;;  %v529_v32 = vmul.u32 %v527_v34, %v525_v3 }
 0x162   :  { %v533_v52 = vshll.u32 %v530_v18, 16  ;;  %v915_v37 = vmul.f32 -0.001358992, %v914_v21  ;;  %v922_v42 = vmul.f32 -0.00019511016, %v914_v21  ;;  %v492_v58 = vshrl.u32 %v8290_v61, %v8321_v9 }
 0x163   :  { %v732_v16 = vshll.u32 %v5395_v55, 30  ;;  %v535_v62 = vshll.u32 %v5381_v17, 16  ;;  %v5405_v43 = vmul.u32 %v550_v28, %v525_v3  ;;  %v549_v7 = vand.u32 65535, %v5360_v49 }
 0x164   :  { %vm537_vm15 = vc.u32 %v529_v32, %v533_v52  ;;  %v539_v40 = vadd.s32 %v533_v52, %v529_v32  ;;  %v916_v50 = vadd.f32 0.041655596, %v915_v37  ;;  %v923_v51 = vadd.f32 0.008332121, %v922_v42 }
 0x165   :  { %v5407_v35 = vsub.s32 %v729_v53, %v732_v16  ;;  %v512_v26 = vsel %vm508_vm10, %v492_v58, %v495_v24  ;;  %v532_v41 = vmul.u32 %v528_v25, %v5366_v36  ;;  %v538_v59 = vsel %vm537_vm15, 1, %v8295_v19 }
 0x166   :  { %vm541_vm5 = vc.u32 %v539_v40, %v535_v62  ;;  %v917_v9 = vmul.f32 %v916_v50, %v914_v21  ;;  %v924_v47 = vmul.f32 %v923_v51, %v914_v21  ;;  %v514_v27 = vsel %vm510_vm11, %v5332_v29, %v513_v13 }
 0x167   :  { %vm734_vm12 = vcmp.lt.s32.totalorder %v5407_v35, 0  ;;  %v735_v57 = vsub.s32 0, %v5407_v35  ;;  %v540_v30 = vadd.s32 %v538_v59, %v532_v41  ;;  %v542_v0 = vsel %vm541_vm5, 1, %v8295_v19  ;;  %v8329_v59 = vld [vmem:[#allocation6_spill] sm:$0xff] }
 0x168   :  { %v555_v24 = vshll.u32 %v5405_v43, 16  ;;  %v918_v5 = vadd.f32 -0.4999988, %v917_v9  ;;  %v925_v53 = vadd.f32 -0.16666654, %v924_v47  ;;  %v551_v39 = vmul.u32 %v549_v7, %v525_v3 }
 0x169   :  { %v736_v49 = vsel %vm734_vm12, %v735_v57, %v5407_v35  ;;  %vm933_vm13 = vcmp.eq.s32.totalorder %v5397_v48, 0  ;;  %vm936_vm0 = vcmp.eq.s32.totalorder %v5397_v48, 2  ;;  %v725_v34 = vadd.s32 %v5312_v11, %v5309_v15 }
 0x16a   :  { %v737_v25 = vclz %v736_v49  ;;  %v544_v12 = vadd.s32 %v542_v0, %v540_v30  ;;  %v553_v29 = vmul.u32 %v549_v7, %v5366_v36  ;;  %v919_v22 = vmul.f32 %v918_v5, %v914_v21 }
 0x16b   :  { %v926_v13 = vmul.f32 %v925_v53, %v914_v21  ;;  %vm932_vm1 = vcmp.lt.s32.totalorder %v5397_v48, 2  ;;  %v534_v32 = vshrl.u32 %v530_v18, 16  ;;  %vm559_vm2 = vc.u32 %v551_v39, %v555_v24 }
 0x16c   :  { %vm929_vm3 = vweird.f32 %v4661_v10  ;;  %vm633_vm8 = vcmp.lt.s32.totalorder %v8308_v46, 0  ;;  %v4319_v3 = vadd.s32 4294967294, %v737_v25  ;;  %v515_v52 = vsel %vm509_vm9, %v512_v26, %v514_v27 }
 0x16d   :  { %v536_v15 = vshrl.u32 %v5381_v17, 16  ;;  %v554_v11 = vmul.u32 %v550_v28, %v5366_v36  ;;  %v920_v37 = vadd.f32 1.0, %v919_v22  ;;  %v927_v42 = vadd.f32 1.0, %v926_v13  ;;  %v8331_v13 = vld [vmem:[#allocation14_spill] sm:$0xff] }
 0x16e   :  { %v545_v16 = vadd.s32 %v544_v12, %v534_v32  ;;  %v560_v21 = vsel %vm559_vm2, 1, %v8295_v19  ;;  %vm4320_vm4 = vcmp.lt.s32.totalorder %v4319_v3, 0  ;;  %v557_v18 = vshll.u32 %v553_v29, 16 }
 0x16f   :  { %v561_v58 = vadd.s32 %v555_v24, %v551_v39  ;;  %v562_v62 = vadd.s32 %v560_v21, %v554_v11  ;;  %v928_v40 = vmul.f32 %v927_v42, %v5378_v54  ;;  %v937_v50 = vxor.u32 2147483648, %v920_v37 }
 0x170   :  { %v740_v51 = vsel %vm4320_vm4, 0, %v4319_v3  ;;  %v755_v20 = vsub.s32 4, %v5395_v55  ;;  %vm5439_vm6 = vcmp.le.f32.partialorder %v631_v38, 0.7853982  ;;  %v556_v7 = vshrl.u32 %v5405_v43, 16 }
 0x171   :  { %v741_v36 = vsub.s32 32, %v740_v51  ;;  %v745_v28 = vsub.s32 4294967266, %v740_v51  ;;  %vm563_vm7 = vc.u32 %v561_v58, %v557_v18  ;;  %v934_v26 = vxor.u32 2147483648, %v928_v40 }
 0x172   :  { %v5444_v41 = vadd.s32 %v545_v16, %v536_v15  ;;  %v564_v54 = vsel %vm563_vm7, 1, %v8295_v19  ;;  %v321_v9 = vand.u32 2147483647, %v8329_v59  ;;  %v742_v47 = vshll.u32 %v5407_v35, %v740_v51 }
 0x173   :  { %v743_v57 = vshrl.u32 %v725_v34, %v741_v36  ;;  %v746_v27 = vadd.s32 127, %v745_v28  ;;  %v566_v38 = vadd.s32 %v564_v54, %v562_v62  ;;  %v935_v30 = vsel %vm933_vm13, %v920_v37, %v934_v26 }
 0x174   :  { %v938_v0 = vsel %vm936_vm0, %v937_v50, %v928_v40  ;;  %v558_v43 = vshrl.u32 %v553_v29, 16  ;;  %v5453_v24 = vadd.s32 %v561_v58, %v557_v18  ;;  %v756_v34 = vsel %vm633_vm8, %v755_v20, %v5395_v55  ;;  %v8330_v29 = vld [vmem:[#allocation10_spill] sm:$0xff] }
 0x175   :  { %v939_v5 = vsel %vm932_vm1, %v935_v30, %v938_v0  ;;  %v744_v53 = vor.u32 %v743_v57, %v742_v47  ;;  %v747_v49 = vshll.u32 %v746_v27, 23  ;;  %v567_v39 = vadd.s32 %v566_v38, %v556_v7  ;;  %v8334_v47 = vld [vmem:[#allocation16_spill] sm:$0xff] }
 0x176   :  { %v940_v35 = vsel %vm929_vm3, nan, %v939_v5  ;;  %vm571_vm10 = vc.u32 %v5444_v41, %v5453_v24  ;;  %v328_v25 = vand.u32 8388607, %v321_v9  ;;  %v338_v22 = vshll.u32 %v8290_v61, %v8330_v29 }
 0x177   :  { %1498 = vmatpush.msra.mxu1 %v940_v35  ;;  %v748_v12 = vor.u32 4788187, %v747_v49  ;;  %v568_v48 = vadd.s32 %v567_v39, %v558_v43  ;;  %v339_v10 = vshrl.u32 %v8296_v8, %v8331_v13  ;;  %v751_v32 = vcvt.s32.f32 %v744_v53  ;;  %v8335_v39 = vld [vmem:[#allocation20_spill] sm:$0xff] }
 0x178   :  { %v329_v3 = vor.u32 8388608, %v328_v25  ;;  %v341_v55 = vshll.u32 %v8296_v8, %v8330_v29  ;;  %v342_v15 = vshrl.u32 %v8293_v63, %v8331_v13  ;;  %v344_v42 = vshll.u32 %v8293_v63, %v8330_v29 }
 0x179   :  { %v749_v11 = vand.u32 2147483647, %v748_v12  ;;  %v572_v37 = vadd.s32 1, %v568_v48  ;;  %v345_v16 = vshrl.u32 %v8289_v44, %v8331_v13  ;;  %v758_v21 = vsel %vm5439_vm6, 0, %v756_v34 }
 0x17a   :  { %v569_v18 = vmul.u32 %v5342_v56, %v515_v52  ;;  %v340_v58 = vor.u32 %v339_v10, %v338_v22  ;;  %v343_v62 = vor.u32 %v342_v15, %v341_v55  ;;  %vm355_vm11 = vcmp.lt.s32.totalorder %v8325_v2, 3  ;;  %v8332_v56 = vld [vmem:[#allocation17_spill] sm:$0xff]  ;;  %v8333_v52 = vld [vmem:[#allocation19_spill] sm:$0xff] }
 0x17b   :  { %v752_v40 = vmul.f32 %v751_v32, %v749_v11  ;;  %v573_v50 = vsel %vm571_vm10, %v572_v37, %v568_v48  ;;  %v346_v51 = vor.u32 %v345_v16, %v344_v42  ;;  %vm353_vm9 = vcmp.lt.s32.totalorder %v8325_v2, 1 }
 0x17c   :  { %v574_v20 = vadd.s32 %v573_v50, %v569_v18  ;;  %v367_v36 = vsel %vm355_vm11, %v8326_v6, %v5391_v4  ;;  %v5490_v28 = vshll.u32 %v329_v3, 8  ;;  %v5494_v7 = vor.u32 %v8333_v52, %v8332_v56 }
 0x17d   :  { %v753_v26 = vxor.u32 2147483648, %v752_v40  ;;  %vm354_vm15 = vcmp.lt.s32.totalorder %v8325_v2, 2  ;;  %v365_v54 = vsel %vm353_vm9, %v343_v62, %v346_v51  ;;  %vm201_vm5 = vcmp.lt.s32.totalorder %v8334_v47, 4 }
 0x17e   :  { %v775_v57 = vadd.s32 3, %v758_v21  ;;  %v575_v27 = vadd.s32 536870912, %v574_v20  ;;  %v368_v38 = vsel %vm354_vm15, %v365_v54, %v367_v36  ;;  %v361_v4 = vsel %vm353_vm9, %v340_v58, %v343_v62 }
 0x17f   :  { %v754_v6 = vsel %vm633_vm8, %v753_v26, %v752_v40  ;;  %v363_v30 = vsel %vm355_vm11, %v346_v51, %v5387_v60  ;;  %v5510_v0 = vand.u32 65535, %v5490_v28  ;;  %v372_v53 = vand.u32 65535, %v368_v38 }
 0x180   :  { %v757_v43 = vsel %vm5439_vm6, %v8308_v46, %v754_v6  ;;  %v5515_v5 = vshrl.u32 %v575_v27, 30  ;;  %v373_v49 = vshrl.u32 %v368_v38, 16  ;;  %v197_v35 = vor.u32 %v5370_v1, %v8335_v39 }
 0x181   :  { %v5522_v34 = vsel %vm201_vm5, %v5494_v7, 920167782  ;;  %v759_v60 = vmul.f32 %v757_v43, %v757_v43  ;;  %v337_v25 = vshrl.u32 %v8290_v61, %v8331_v13  ;;  %v358_v17 = vsel %vm356_vm14, %v346_v51, 2102212464 }
 0x182   :  { %v577_v12 = vshll.u32 %v5515_v5, 30  ;;  %v371_v48 = vshrl.u32 %v5490_v28, 16  ;;  %v375_v29 = vmul.u32 %v373_v49, %v5510_v0  ;;  %v5531_v10 = vand.u32 3, %v775_v57 }
 0x183   :  { %v760_v22 = vmul.f32 -0.001358992, %v759_v60  ;;  %v767_v1 = vmul.f32 -0.00019511016, %v759_v60  ;;  %v364_v32 = vsel %vm354_vm15, %v361_v4, %v363_v30  ;;  %v357_v13 = vsel %vm353_vm9, %v337_v25, %v340_v58 }
 0x184   :  { %v5535_v3 = vsub.s32 %v574_v20, %v577_v12  ;;  %v5539_v55 = vmul.u32 %v372_v53, %v371_v48  ;;  %v378_v15 = vshll.u32 %v375_v29, 16  ;;  %v359_v42 = vsel %vm355_vm11, %v343_v62, %v358_v17 }
 0x185   :  { %v761_v11 = vadd.f32 0.041655596, %v760_v22  ;;  %v768_v37 = vadd.f32 0.008332121, %v767_v1  ;;  %v374_v16 = vmul.u32 %v372_v53, %v5510_v0  ;;  %v377_v18 = vmul.u32 %v373_v49, %v371_v48 }
 0x186   :  { %vm579_vm14 = vcmp.lt.s32.totalorder %v5535_v3, 0  ;;  %v580_v21 = vsub.s32 0, %v5535_v3  ;;  %v394_v40 = vand.u32 65535, %v364_v32  ;;  %v380_v36 = vshll.u32 %v5539_v55, 16 }
 0x187   :  { %v762_v50 = vmul.f32 %v761_v11, %v759_v60  ;;  %v769_v51 = vmul.f32 %v768_v37, %v759_v60  ;;  %vm382_vm12 = vc.u32 %v374_v16, %v378_v15  ;;  %v384_v58 = vadd.s32 %v378_v15, %v374_v16 }
 0x188   :  { %v581_v20 = vsel %vm579_vm14, %v580_v21, %v5535_v3  ;;  %v383_v56 = vsel %vm382_vm12, 1, %v8295_v19  ;;  %v395_v52 = vshrl.u32 %v364_v32, 16  ;;  %v5551_v27 = vsel %vm201_vm5, %v197_v35, 1326507024 }
 0x189   :  { %v763_v62 = vadd.f32 -0.4999988, %v762_v50  ;;  %v770_v26 = vadd.f32 -0.16666654, %v769_v51  ;;  %v582_v54 = vclz %v581_v20  ;;  %v385_v57 = vadd.s32 %v383_v56, %v377_v18  ;;  %v8336_v51 = vld [vmem:[#allocation5_spill] sm:$0xff] }
 0x18a   :  { %vm778_vm13 = vcmp.eq.s32.totalorder %v5531_v10, 0  ;;  %vm781_vm0 = vcmp.eq.s32.totalorder %v5531_v10, 2  ;;  %vm386_vm1 = vc.u32 %v384_v58, %v380_v36  ;;  %vm777_vm2 = vcmp.lt.s32.totalorder %v5531_v10, 2 }
 0x18b   :  { %v764_v38 = vmul.f32 %v763_v62, %v759_v60  ;;  %v771_v6 = vmul.f32 %v770_v26, %v759_v60  ;;  %v4316_v4 = vadd.s32 4294967294, %v582_v54  ;;  %v387_v30 = vsel %vm386_vm1, 1, %v8295_v19 }
 0x18c   :  { %vm774_vm3 = vweird.f32 %v8308_v46  ;;  %v570_v53 = vadd.s32 %v5453_v24, %v5444_v41  ;;  %v5562_v49 = vsel %vm354_vm15, %v357_v13, %v359_v42  ;;  %v389_v39 = vadd.s32 %v387_v30, %v385_v57  ;;  %v8339_v30 = vld [vmem:[#allocation9_spill] sm:$0xff] }
 0x18d   :  { %v397_v35 = vmul.u32 %v395_v52, %v5510_v0  ;;  %v765_v25 = vadd.f32 1.0, %v764_v38  ;;  %v772_v12 = vadd.f32 1.0, %v771_v6  ;;  %vm4317_vm8 = vcmp.lt.s32.totalorder %v4316_v4, 0 }
 0x18e   :  { %v398_v60 = vmul.u32 %v394_v40, %v371_v48  ;;  %v585_v17 = vsel %vm4317_vm8, 0, %v4316_v4  ;;  %v379_v22 = vshrl.u32 %v375_v29, 16  ;;  %v381_v1 = vshrl.u32 %v5539_v55, 16 }
 0x18f   :  { %v400_v32 = vshll.u32 %v397_v35, 16  ;;  %v773_v15 = vmul.f32 %v772_v12, %v757_v43  ;;  %v782_v11 = vxor.u32 2147483648, %v765_v25  ;;  %v586_v37 = vsub.s32 32, %v585_v17 }
 0x190   :  { %v396_v41 = vmul.u32 %v394_v40, %v5510_v0  ;;  %v587_v2 = vshll.u32 %v5535_v3, %v585_v17  ;;  %v590_v24 = vsub.s32 4294967266, %v585_v17  ;;  %v390_v13 = vadd.s32 %v389_v39, %v379_v22 }
 0x191   :  { %v399_v42 = vmul.u32 %v395_v52, %v371_v48  ;;  %v779_v16 = vxor.u32 2147483648, %v773_v15  ;;  %v588_v21 = vshrl.u32 %v570_v53, %v586_v37  ;;  %v402_v18 = vshll.u32 %v398_v60, 16 }
 0x192   :  { %vm404_vm4 = vc.u32 %v396_v41, %v400_v32  ;;  %v783_v29 = vsel %vm781_vm0, %v782_v11, %v773_v15  ;;  %vm478_vm6 = vcmp.lt.s32.totalorder %v8317_v23, 0  ;;  %v591_v55 = vadd.s32 127, %v590_v24 }
 0x193   :  { %v405_v43 = vsel %vm404_vm4, 1, %v8295_v19  ;;  %v406_v50 = vadd.s32 %v400_v32, %v396_v41  ;;  %v780_v0 = vsel %vm778_vm13, %v765_v25, %v779_v16  ;;  %v589_v3 = vor.u32 %v588_v21, %v587_v2 }
 0x194   :  { %v407_v40 = vadd.s32 %v405_v43, %v399_v42  ;;  %v166_v48 = vand.u32 2147483647, %v8336_v51  ;;  %v784_v58 = vsel %vm777_vm2, %v780_v0, %v783_v29  ;;  %v592_v20 = vshll.u32 %v591_v55, 23 }
 0x195   :  { %v600_v36 = vsub.s32 4, %v5515_v5  ;;  %vm408_vm7 = vc.u32 %v406_v50, %v402_v18  ;;  %v785_v56 = vsel %vm774_vm3, nan, %v784_v58  ;;  %vm5582_vm10 = vcmp.le.f32.partialorder %v476_v33, 0.7853982 }
 0x196   :  { %v5586_v62 = vadd.s32 %v390_v13, %v381_v1  ;;  %v401_v26 = vshrl.u32 %v397_v35, 16  ;;  %v409_v54 = vsel %vm408_vm7, 1, %v8295_v19  ;;  %1499 = vmatpush.msra.mxu1 %v785_v56  ;;  %v593_v10 = vor.u32 4788187, %v592_v20 }
 0x197   :  { %v403_v57 = vshrl.u32 %v398_v60, 16  ;;  %v5589_v38 = vadd.s32 %v406_v50, %v402_v18  ;;  %v411_v6 = vadd.s32 %v409_v54, %v407_v40  ;;  %v596_v4 = vcvt.s32.f32 %v589_v3 }
 0x198   :  { %v173_v46 = vand.u32 8388607, %v166_v48  ;;  %v183_v33 = vshll.u32 %v8290_v61, %v8339_v30  ;;  %v184_v53 = vshrl.u32 %v8296_v8, %v8324_v31  ;;  %v594_v39 = vand.u32 2147483647, %v593_v10 }
 0x199   :  { %v412_v35 = vadd.s32 %v411_v6, %v401_v26  ;;  %v186_v25 = vshll.u32 %v8296_v8, %v8339_v30  ;;  %v187_v12 = vshrl.u32 %v8293_v63, %v8324_v31  ;;  %v189_v22 = vshll.u32 %v8293_v63, %v8339_v30 }
 0x19a   :  { %v174_v60 = vor.u32 8388608, %v173_v46  ;;  %v5601_v17 = vor.u32 %v184_v53, %v183_v33  ;;  %v190_v1 = vshrl.u32 %v8289_v44, %v8324_v31  ;;  %v597_v32 = vmul.f32 %v596_v4, %v594_v39 }
 0x19b   :  { %v413_v15 = vadd.s32 %v412_v35, %v403_v57  ;;  %v414_v11 = vmul.u32 %v5490_v28, %v5562_v49  ;;  %v5609_v37 = vor.u32 %v187_v12, %v186_v25  ;;  %v601_v41 = vsel %vm478_vm6, %v600_v36, %v5515_v5 }
 0x19c   :  { %vm416_vm11 = vc.u32 %v5586_v62, %v5589_v38  ;;  %v5616_v2 = vor.u32 %v190_v1, %v189_v22  ;;  %vm200_vm9 = vcmp.lt.s32.totalorder %v8334_v47, 3  ;;  %v598_v24 = vxor.u32 2147483648, %v597_v32 }
 0x19d   :  { %v417_v13 = vadd.s32 1, %v413_v15  ;;  %vm198_vm15 = vcmp.lt.s32.totalorder %v8334_v47, 1  ;;  %v212_v28 = vsel %vm200_vm9, %v5494_v7, %v5551_v27  ;;  %v5636_v16 = vshll.u32 %v174_v60, 8 }
 0x19e   :  { %v206_v5 = vsel %vm198_vm15, %v5601_v17, %v5609_v37  ;;  %v208_v49 = vsel %vm200_vm9, %v5616_v2, %v5522_v34  ;;  %v210_v42 = vsel %vm198_vm15, %v5609_v37, %v5616_v2  ;;  %v599_v7 = vsel %vm478_vm6, %v598_v24, %v597_v32 }
 0x19f   :  { %v603_v27 = vsel %vm5582_vm10, 0, %v601_v41  ;;  %v418_v21 = vsel %vm416_vm11, %v417_v13, %v413_v15  ;;  %vm199_vm14 = vcmp.lt.s32.totalorder %v8334_v47, 2  ;;  %v602_v34 = vsel %vm5582_vm10, %v8317_v23, %v599_v7 }
 0x1a0   :  { %v419_v18 = vadd.s32 %v418_v21, %v414_v11  ;;  %v213_v29 = vsel %vm199_vm14, %v210_v42, %v212_v28  ;;  %v604_v55 = vmul.f32 %v602_v34, %v602_v34  ;;  %v5650_v43 = vsel %vm199_vm14, %v206_v5, %v208_v49 }
 0x1a1   :  { %v217_v50 = vand.u32 65535, %v213_v29  ;;  %v620_v0 = vadd.s32 3, %v603_v27  ;;  %v215_v40 = vand.u32 65535, %v5636_v16  ;;  %v218_v58 = vshrl.u32 %v213_v29, 16 }
 0x1a2   :  { %v420_v3 = vadd.s32 536870912, %v419_v18  ;;  %v605_v20 = vmul.f32 -0.001358992, %v604_v55  ;;  %v612_v36 = vmul.f32 -0.00019511016, %v604_v55  ;;  %v216_v56 = vshrl.u32 %v5636_v16, 16 }
 0x1a3   :  { %v220_v26 = vmul.u32 %v218_v58, %v215_v40  ;;  %v240_v54 = vshrl.u32 %v5650_v43, 16  ;;  %v621_v4 = vand.u32 3, %v620_v0  ;;  %v219_v30 = vmul.u32 %v217_v50, %v215_v40 }
 0x1a4   :  { %v5654_v52 = vshrl.u32 %v420_v3, 30  ;;  %v606_v10 = vadd.f32 0.041655596, %v605_v20  ;;  %v613_v57 = vadd.f32 0.008332121, %v612_v36  ;;  %v5657_v6 = vmul.u32 %v217_v50, %v216_v56 }
 0x1a5   :  { %v223_v33 = vshll.u32 %v220_v26, 16  ;;  %v222_v35 = vmul.u32 %v218_v58, %v216_v56  ;;  %v239_v25 = vand.u32 65535, %v5650_v43  ;;  %v5661_v22 = vmul.u32 %v240_v54, %v215_v40 }
 0x1a6   :  { %v422_v46 = vshll.u32 %v5654_v52, 30  ;;  %v607_v53 = vmul.f32 %v606_v10, %v604_v55  ;;  %v614_v39 = vmul.f32 %v613_v57, %v604_v55  ;;  %v225_v15 = vshll.u32 %v5657_v6, 16 }
 0x1a7   :  { %vm227_vm12 = vc.u32 %v219_v30, %v223_v33  ;;  %v229_v60 = vadd.s32 %v223_v33, %v219_v30  ;;  %vm622_vm0 = vcmp.lt.s32.totalorder %v621_v4, 2  ;;  %vm619_vm2 = vweird.f32 %v8317_v23 }
 0x1a8   :  { %v423_v12 = vsub.s32 %v419_v18, %v422_v46  ;;  %v608_v1 = vadd.f32 -0.4999988, %v607_v53  ;;  %v615_v32 = vadd.f32 -0.16666654, %v614_v39  ;;  %v228_v11 = vsel %vm227_vm12, 1, %v8295_v19 }
 0x1a9   :  { %v230_v24 = vadd.s32 %v228_v11, %v222_v35  ;;  %vm231_vm1 = vc.u32 %v229_v60, %v225_v15  ;;  %v243_v42 = vmul.u32 %v239_v25, %v216_v56  ;;  %v245_v7 = vshll.u32 %v5661_v22, 16 }
 0x1aa   :  { %vm424_vm13 = vcmp.lt.s32.totalorder %v423_v12, 0  ;;  %v425_v41 = vsub.s32 0, %v423_v12  ;;  %v609_v13 = vmul.f32 %v608_v1, %v604_v55  ;;  %v616_v28 = vmul.f32 %v615_v32, %v604_v55 }
 0x1ab   :  { %v232_v49 = vsel %vm231_vm1, 1, %v8295_v19  ;;  %vm623_vm3 = vcmp.eq.s32.totalorder %v621_v4, 0  ;;  %vm626_vm8 = vcmp.eq.s32.totalorder %v621_v4, 2  ;;  %v415_v29 = vadd.s32 %v5589_v38, %v5586_v62 }
 0x1ac   :  { %v426_v5 = vsel %vm424_vm13, %v425_v41, %v423_v12  ;;  %v610_v27 = vadd.f32 1.0, %v609_v13  ;;  %v617_v21 = vadd.f32 1.0, %v616_v28  ;;  %v234_v43 = vadd.s32 %v232_v49, %v230_v24 }
 0x1ad   :  { %v427_v18 = vclz %v426_v5  ;;  %v241_v55 = vmul.u32 %v239_v25, %v215_v40  ;;  %v182_v58 = vshrl.u32 %v8290_v61, %v8324_v31  ;;  %v224_v20 = vshrl.u32 %v220_v26, 16 }
 0x1ae   :  { %v618_v50 = vmul.f32 %v617_v21, %v602_v34  ;;  %v627_v0 = vxor.u32 2147483648, %v610_v27  ;;  %v247_v36 = vshll.u32 %v243_v42, 16  ;;  %v203_v46 = vsel %vm201_vm5, %v5616_v2, 2102212464 }
 0x1af   :  { %v4313_v3 = vadd.s32 4294967294, %v427_v18  ;;  %vm249_vm4 = vc.u32 %v241_v55, %v245_v7  ;;  %v251_v10 = vadd.s32 %v245_v7, %v241_v55  ;;  %v244_v30 = vmul.u32 %v240_v54, %v216_v56 }
 0x1b0   :  { %v624_v57 = vxor.u32 2147483648, %v618_v50  ;;  %v235_v38 = vadd.s32 %v234_v43, %v224_v20  ;;  %v250_v34 = vsel %vm249_vm4, 1, %v8295_v19  ;;  %v628_v31 = vsel %vm626_vm8, %v627_v0, %v618_v50 }
 0x1b1   :  { %vm4314_vm6 = vcmp.lt.s32.totalorder %v4313_v3, 0  ;;  %vm253_vm7 = vc.u32 %v251_v10, %v247_v36  ;;  %v226_v39 = vshrl.u32 %v5657_v6, 16  ;;  %v252_v35 = vadd.s32 %v250_v34, %v244_v30 }
 0x1b2   :  { %v430_v62 = vsel %vm4314_vm6, 0, %v4313_v3  ;;  %v625_v40 = vsel %vm623_vm3, %v610_v27, %v624_v57  ;;  %v254_v25 = vsel %vm253_vm7, 1, %v8295_v19  ;;  %v202_v1 = vsel %vm198_vm15, %v182_v58, %v5601_v17 }
 0x1b3   :  { %v431_v26 = vsub.s32 32, %v430_v62  ;;  %v435_v33 = vsub.s32 4294967266, %v430_v62  ;;  %v629_v53 = vsel %vm622_vm0, %v625_v40, %v628_v31  ;;  %v432_v56 = vshll.u32 %v423_v12, %v430_v62 }
 0x1b4   :  { %v630_v2 = vsel %vm619_vm2, nan, %v629_v53  ;;  %v246_v32 = vshrl.u32 %v5661_v22, 16  ;;  %v256_v4 = vadd.s32 %v254_v25, %v252_v35  ;;  %v204_v6 = vsel %vm200_vm9, %v5609_v37, %v203_v46 }
 0x1b5   :  { %v433_v54 = vshrl.u32 %v415_v29, %v431_v26  ;;  %v436_v60 = vadd.s32 127, %v435_v33  ;;  %1500 = vmatpush.msra.mxu1 %v630_v2  ;;  %v236_v41 = vadd.s32 %v235_v38, %v226_v39  ;;  %v248_v23 = vshrl.u32 %v243_v42, 16 }
 0x1b6   :  { %v257_v24 = vadd.s32 %v256_v4, %v246_v32  ;;  %v255_v13 = vadd.s32 %v251_v10, %v247_v36  ;;  %v205_v28 = vsel %vm199_vm14, %v202_v1, %v204_v6  ;;  %vm323_vm10 = vcmp.lt.s32.totalorder %v8329_v59, 0 }
 0x1b7   :  { %v434_v15 = vor.u32 %v433_v54, %v432_v56  ;;  %v437_v11 = vshll.u32 %v436_v60, 23  ;;  %v259_v27 = vmul.u32 %v5636_v16, %v205_v28  ;;  %vm5696_vm11 = vcmp.le.f32.partialorder %v321_v9, 0.7853982 }
 0x1b8   :  { %v258_v5 = vadd.s32 %v257_v24, %v248_v23  ;;  %vm261_vm5 = vc.u32 %v236_v41, %v255_v13  ;;  %v445_v42 = vsub.s32 4, %v5654_v52  ;;  %v260_v60 = vadd.s32 %v255_v13, %v236_v41 }
 0x1b9   :  { %v438_v12 = vor.u32 4788187, %v437_v11  ;;  %v441_v17 = vcvt.s32.f32 %v434_v15  ;;  %vm464_vm0 = vweird.f32 %v8329_v59  ;;  %vm168_vm1 = vcmp.lt.s32.totalorder %v8336_v51, 0 }
 0x1ba   :  { %v262_v22 = vadd.s32 1, %v258_v5  ;;  %v446_v0 = vsel %vm323_vm10, %v445_v42, %v5654_v52  ;;  %vm167_vm2 = vcmp.le.f32.partialorder %v166_v48, 0.7853982  ;;  %vm309_vm6 = vweird.f32 %v8336_v51 }
 0x1bb   :  { %v439_v49 = vand.u32 2147483647, %v438_v12  ;;  %v448_v57 = vsel %vm5696_vm11, 0, %v446_v0  ;;  %vm1462_vm7 = vcmask 523264  }
 0x1bc   :  { %v263_v21 = vsel %vm261_vm5, %v262_v22, %v258_v5  ;;  %v465_v40 = vadd.s32 3, %v448_v57 }
 0x1bd   :  { %v442_v7 = vmul.f32 %v441_v17, %v439_v49  ;;  %v264_v29 = vadd.s32 %v263_v21, %v259_v27 }
 0x1be   :  { %v466_v25 = vand.u32 3, %v465_v40  ;;  %v1406_v40 = vld [vmem:[%s8126_s4] sm:$0xff] }
 0x1bf   :  { %v443_v18 = vxor.u32 2147483648, %v442_v7  ;;  %v265_v43 = vadd.s32 536870912, %v264_v29 }
 0x1c0   :  { %vm468_vm14 = vcmp.eq.s32.totalorder %v466_v25, 0  ;;  %vm471_vm12 = vcmp.eq.s32.totalorder %v466_v25, 2  ;;  %vm467_vm13 = vcmp.lt.s32.totalorder %v466_v25, 2 }
 0x1c1   :  { %v444_v47 = vsel %vm323_vm10, %v443_v18, %v442_v7  ;;  %v266_v50 = vshrl.u32 %v265_v43, 30 }
 0x1c2   :  { %v447_v55 = vsel %vm5696_vm11, %v8329_v59, %v444_v47 }
 0x1c3   :  { %v449_v16 = vmul.f32 %v447_v55, %v447_v55  ;;  %v267_v20 = vshll.u32 %v266_v50, 30  ;;  %v290_v21 = vsub.s32 4, %v266_v50 }
 0x1c5   :  { %v450_v3 = vmul.f32 -0.001358992, %v449_v16  ;;  %v457_v58 = vmul.f32 -0.00019511016, %v449_v16  ;;  %v268_v10 = vsub.s32 %v264_v29, %v267_v20  ;;  %v291_v47 = vsel %vm168_vm1, %v290_v21, %v266_v50 }
 0x1c7   :  { %v451_v36 = vadd.f32 0.041655596, %v450_v3  ;;  %v458_v9 = vadd.f32 0.008332121, %v457_v58  ;;  %vm269_vm9 = vcmp.lt.s32.totalorder %v268_v10, 0  ;;  %v270_v62 = vsub.s32 0, %v268_v10 }
 0x1c9   :  { %v452_v46 = vmul.f32 %v451_v36, %v449_v16  ;;  %v459_v30 = vmul.f32 %v458_v9, %v449_v16  ;;  %v271_v31 = vsel %vm269_vm9, %v270_v62, %v268_v10 }
 0x1ca   :  { %v272_v26 = vclz %v271_v31 }
 0x1cb   :  { %v453_v38 = vadd.f32 -0.4999988, %v452_v46  ;;  %v460_v34 = vadd.f32 -0.16666654, %v459_v30 }
 0x1cc   :  { %v4310_v53 = vadd.s32 4294967294, %v272_v26  ;;  %v1407_v26 = vld [vmem:[%s8126_s4 + $0x8] sm:$0xff] }
 0x1cd   :  { %v454_v33 = vmul.f32 %v453_v38, %v449_v16  ;;  %v461_v52 = vmul.f32 %v460_v34, %v449_v16 }
 0x1ce   :  { %vm4311_vm15 = vcmp.lt.s32.totalorder %v4310_v53, 0 }
 0x1cf   :  { %v455_v39 = vadd.f32 1.0, %v454_v33  ;;  %v462_v35 = vadd.f32 1.0, %v461_v52  ;;  %v275_v54 = vsel %vm4311_vm15, 0, %v4310_v53  ;;  %v1409_v33 = vld [vmem:[%s8126_s4 + $0x18] sm:$0xff]  ;;  %v1410_v52 = vld [vmem:[%s8126_s4 + $0x20] sm:$0xff]  ;;  %v1411_v53 = vld [vmem:[%s8126_s4 + $0x28] sm:$0xff] }
 0x1d0   :  { %v276_v1 = vsub.s32 32, %v275_v54  ;;  %v280_v32 = vsub.s32 4294967266, %v275_v54  ;;  %v277_v15 = vshll.u32 %v268_v10, %v275_v54  ;;  %v1455_v54 = vpop.permute.xlu0 %1454 }
 0x1d1   :  { %v463_v2 = vmul.f32 %v462_v35, %v447_v55  ;;  %v472_v56 = vxor.u32 2147483648, %v455_v39  ;;  %v293_v55 = vsel %vm167_vm2, 0, %v291_v47  ;;  %v1413_v35 = vld [vmem:[%s8126_s4 + $0x38] sm:$0xff] }
 0x1d2   :  { %v278_v11 = vshrl.u32 %v260_v60, %v276_v1  ;;  %v281_v6 = vadd.s32 127, %v280_v32  ;;  %v310_v20 = vadd.s32 3, %v293_v55  ;;  %v1460_v32 = vpop.permute.xlu2 %1459 }
 0x1d3   :  { %v469_v4 = vxor.u32 2147483648, %v463_v2  ;;  %v473_v24 = vsel %vm471_vm12, %v472_v56, %v463_v2 }
 0x1d4   :  { %v279_v28 = vor.u32 %v278_v11, %v277_v15  ;;  %v282_v5 = vshll.u32 %v281_v6, 23  ;;  %v311_v57 = vand.u32 3, %v310_v20 }
 0x1d5   :  { %v470_v23 = vsel %vm468_vm14, %v455_v39, %v469_v4  ;;  %v1412_v39 = vld [vmem:[%s8126_s4 + $0x30] sm:$0xff]  ;;  %v1450_v4 = vpop.permute.xlu1 %1449 }
 0x1d6   :  { %v474_v12 = vsel %vm467_vm13, %v470_v23, %v473_v24  ;;  %v283_v17 = vor.u32 4788187, %v282_v5  ;;  %v286_v13 = vcvt.s32.f32 %v279_v28  ;;  %vm313_vm3 = vcmp.eq.s32.totalorder %v311_v57, 0 }
 0x1d7   :  { %v475_v49 = vsel %vm464_vm0, nan, %v474_v12  ;;  %vm316_vm8 = vcmp.eq.s32.totalorder %v311_v57, 2  ;;  %vm312_vm4 = vcmp.lt.s32.totalorder %v311_v57, 2 }
 0x1d8   :  { %1501 = vmatpush.msra.mxu1 %v475_v49  ;;  %v284_v41 = vand.u32 2147483647, %v283_v17  ;;  %v1440_v1 = vpop.permute.xlu0 %1439 }
 0x1da   :  { %v287_v22 = vmul.f32 %v286_v13, %v284_v41  ;;  %v1445_v6 = vpop.permute.xlu2 %1444 }
 0x1dc   :  { %v288_v7 = vxor.u32 2147483648, %v287_v22 }
 0x1dd   :  { %v1435_v12 = vpop.permute.xlu1 %1434 }
 0x1de   :  { %v289_v27 = vsel %vm168_vm1, %v288_v7, %v287_v22 }
 0x1df   :  { %v292_v18 = vsel %vm167_vm2, %v8336_v51, %v289_v27  ;;  %v1408_v51 = vld [vmem:[%s8126_s4 + $0x10] sm:$0xff] }
 0x1e0   :  { %v294_v59 = vmul.f32 %v292_v18, %v292_v18  ;;  %v1425_v11 = vpop.permute.xlu0 %1424 }
 0x1e2   :  { %v295_v29 = vmul.f32 -0.001358992, %v294_v59  ;;  %v302_v37 = vmul.f32 -0.00019511016, %v294_v59  ;;  %v1430_v13 = vpop.permute.xlu2 %1429 }
 0x1e4   :  { %v296_v42 = vadd.f32 0.041655596, %v295_v29  ;;  %v303_v43 = vadd.f32 0.008332121, %v302_v37 }
 0x1e6   :  { %v297_v16 = vmul.f32 %v296_v42, %v294_v59  ;;  %v304_v0 = vmul.f32 %v303_v43, %v294_v59 }
 0x1e8   :  { %v298_v3 = vadd.f32 -0.4999988, %v297_v16  ;;  %v305_v58 = vadd.f32 -0.16666654, %v304_v0 }
 0x1ea   :  { %v299_v36 = vmul.f32 %v298_v3, %v294_v59  ;;  %v306_v9 = vmul.f32 %v305_v58, %v294_v59 }
 0x1ec   :  { %v300_v10 = vadd.f32 1.0, %v299_v36  ;;  %v307_v48 = vadd.f32 1.0, %v306_v9 }
 0x1ee   :  { %v308_v46 = vmul.f32 %v307_v48, %v292_v18  ;;  %v317_v30 = vxor.u32 2147483648, %v300_v10 }
 0x1f0   :  { %v314_v62 = vxor.u32 2147483648, %v308_v46  ;;  %v318_v38 = vsel %vm316_vm8, %v317_v30, %v308_v46 }
 0x1f2   :  { %v315_v50 = vsel %vm313_vm3, %v300_v10, %v314_v62 }
 0x1f3   :  { %v319_v34 = vsel %vm312_vm4, %v315_v50, %v318_v38 }
 0x1f4   :  { %v320_v31 = vsel %vm309_vm6, nan, %v319_v34 }
 0x1f5   :  { %1502 = vmatpush.msra.mxu1 %v320_v31 }
 0x1f6   :  { %4333 = vmatmul.msk.f32.vlgmr.msra.gmra.mxu1 %vm1462_vm7, %v1406_v40 }
 0x1fe   :  { %4334 = vmatmul.msk.f32.gmra.mxu1 %vm1462_vm7, %v1407_v26 }
 0x206   :  { %4335 = vmatmul.msk.f32.gmra.mxu1 %vm1462_vm7, %v1408_v51 }
 0x20e   :  { %4336 = vmatmul.msk.f32.gmra.mxu1 %vm1462_vm7, %v1409_v33 }
 0x216   :  { %4337 = vmatmul.msk.f32.gmra.mxu1 %vm1462_vm7, %v1410_v52 }
 0x21e   :  { %4338 = vmatmul.msk.f32.gmra.mxu1 %vm1462_vm7, %v1411_v53 }
 0x226   :  { %4339 = vmatmul.msk.f32.gmra.mxu1 %vm1462_vm7, %v1412_v39 }
 0x22e   :  { %4340 = vmatmul.msk.f32.gmra.mxu1 %vm1462_vm7, %v1413_v35 }
 0x273   :  { %v1504_v25 = vpop.f32.mrf.mxu1 }
 0x274   :  { %v5745_v23 = vadd.f32 %v1504_v25, %v1425_v11 }
 0x276   :  { %8342 = vst [vmem:[#allocation8_spill] sm:$0xff] %v5745_v23  ;;  %v1531_v5 = vand.u32 2139095040, %v5745_v23 }
 0x278   :  { %v1532_v17 = vshrl.u32 %v1531_v5, 23 }
 0x27a   :  { %v4341_v27 = vadd.s32 4294967169, %v1532_v17 }
 0x27b   :  { %v1507_v2 = vpop.f32.mrf.mxu1 }
 0x27c   :  { %v5751_v22 = vadd.f32 %v1507_v2, %v1430_v13  ;;  %v1538_v29 = vadd.s32 1, %v4341_v27 }
 0x27e   :  { %8344 = vst [vmem:[#allocation15_spill] sm:$0xff] %v5751_v22  ;;  %v1686_v18 = vand.u32 2139095040, %v5751_v22  ;;  %vm1539_vm5 = vcmp.gt.s32.totalorder %v1538_v29, 0 }
 0x27f   :  { %v5762_v20 = vsel %vm1539_vm5, %v1538_v29, 0 }
 0x280   :  { %v1687_v43 = vshrl.u32 %v1686_v18, 23  ;;  %8347 = vst [vmem:[#allocation30_spill] sm:$0xff] %v5762_v20  ;;  %v5769_v62 = vand.u32 31, %v5762_v20 }
 0x282   :  { %v4344_v36 = vadd.s32 4294967169, %v1687_v43  ;;  %8349 = vst [vmem:[#allocation29_spill] sm:$0xff] %v5769_v62  ;;  %v5779_v53 = vsub.s32 32, %v5769_v62  ;;  %v5783_v39 = vshll.u32 %v8289_v44, %v5769_v62 }
 0x283   :  { %v1510_v56 = vpop.f32.mrf.mxu1 }
 0x284   :  { %v5747_v28 = vadd.f32 %v1510_v56, %v1435_v12  ;;  %v1693_v50 = vadd.s32 1, %v4344_v36  ;;  %8350 = vst [vmem:[#allocation28_spill] sm:$0xff] %v5779_v53 }
 0x285   :  { %8351 = vst [vmem:[#allocation7_spill] sm:$0xff] %v5783_v39 }
 0x286   :  { %8343 = vst [vmem:[#allocation26_spill] sm:$0xff] %v5747_v28  ;;  %v1841_v49 = vand.u32 2139095040, %v5747_v28  ;;  %vm1694_vm9 = vcmp.gt.s32.totalorder %v1693_v50, 0 }
 0x288   :  { %v1842_v7 = vshrl.u32 %v1841_v49, 23 }
 0x28a   :  { %v4347_v59 = vadd.s32 4294967169, %v1842_v7 }
 0x28b   :  { %v1513_v60 = vpop.f32.mrf.mxu1 }
 0x28c   :  { %v1848_v55 = vadd.s32 1, %v4347_v59  ;;  %v5759_v16 = vadd.f32 %v1513_v60, %v1440_v1 }
 0x28e   :  { %8346 = vst [vmem:[#allocation24_spill] sm:$0xff] %v5759_v16  ;;  %vm1849_vm10 = vcmp.gt.s32.totalorder %v1848_v55, 0  ;;  %v1996_v9 = vand.u32 2139095040, %v5759_v16 }
 0x28f   :  { %v5771_v38 = vsel %vm1849_vm10, %v1848_v55, 0 }
 0x290   :  { %v1997_v34 = vshrl.u32 %v1996_v9, 23  ;;  %v5786_v35 = vand.u32 31, %v5771_v38 }
 0x292   :  { %8352 = vst [vmem:[#allocation12_spill] sm:$0xff] %v5786_v35  ;;  %v4350_v25 = vadd.s32 4294967169, %v1997_v34 }
 0x293   :  { %v1516_v15 = vpop.f32.mrf.mxu1 }
 0x294   :  { %v5753_v21 = vadd.f32 %v1516_v15, %v1445_v6 }
 0x296   :  { %8345 = vst [vmem:[#allocation11_spill] sm:$0xff] %v5753_v21  ;;  %v2151_v37 = vand.u32 2139095040, %v5753_v21 }
 0x298   :  { %v2152_v3 = vshrl.u32 %v2151_v37, 23 }
 0x29a   :  { %v4353_v10 = vadd.s32 4294967169, %v2152_v3 }
 0x29b   :  { %v1519_v24 = vpop.f32.mrf.mxu1 }
 0x29c   :  { %v5765_v48 = vadd.f32 %v1519_v24, %v1450_v4  ;;  %v2158_v40 = vadd.s32 1, %v4353_v10 }
 0x29e   :  { %8348 = vst [vmem:[#allocation27_spill] sm:$0xff] %v5765_v48  ;;  %v2306_v31 = vand.u32 2139095040, %v5765_v48  ;;  %vm2159_vm15 = vcmp.gt.s32.totalorder %v2158_v40, 0 }
 0x2a0   :  { %v2307_v2 = vshrl.u32 %v2306_v31, 23  ;;  %v5836_v31 = vsel %vm2159_vm15, %v2158_v40, 0 }
 0x2a1   :  { %v5849_v40 = vand.u32 31, %v5836_v31 }
 0x2a2   :  { %v4356_v3 = vadd.s32 4294967169, %v2307_v2  ;;  %v5840_v2 = vshll.u32 %v8291_v14, %v5769_v62 }
 0x2a3   :  { %v1522_v41 = vpop.f32.mrf.mxu1 }
 0x2a4   :  { %v5776_v51 = vadd.f32 %v1522_v41, %v1455_v54  ;;  %8353 = vst [vmem:[#allocation18_spill] sm:$0xff] %v5840_v2 }
 0x2a6   :  { %v2461_v60 = vand.u32 2139095040, %v5776_v51 }
 0x2a8   :  { %v2462_v18 = vshrl.u32 %v2461_v60, 23 }
 0x2ab   :  { %v1525_v47 = vpop.f32.mrf.mxu1 }
 0x2ac   :  { %v5757_v42 = vadd.f32 %v1525_v47, %v1460_v32 }
 0x2ae   :  { %v2616_v0 = vand.u32 2139095040, %v5757_v42  ;;  %v8182_v46 = vand.u32 2147483647, %v5757_v42 }
 0x2b0   :  { %v2617_v58 = vshrl.u32 %v2616_v0, 23  ;;  %v2620_v26 = vand.u32 8388607, %v8182_v46 }
 0x2b2   :  { %v4362_v57 = vadd.s32 4294967169, %v2617_v58  ;;  %v2621_v54 = vor.u32 8388608, %v2620_v26  ;;  %v4359_v26 = vadd.s32 4294967169, %v2462_v18 }
 0x2b4   :  { %v2623_v30 = vadd.s32 1, %v4362_v57  ;;  %v5810_v27 = vshll.u32 %v2621_v54, 8  ;;  %v5843_v54 = vsel %vm1694_vm9, %v1693_v50, 0 }
 0x2b6   :  { %vm2624_vm11 = vcmp.gt.s32.totalorder %v2623_v30, 0  ;;  %v2662_v9 = vand.u32 65535, %v5810_v27  ;;  %v2663_v57 = vshrl.u32 %v5810_v27, 16 }
 0x2b7   :  { %v2625_v33 = vsel %vm2624_vm11, %v2623_v30, 0 }
 0x2b8   :  { %v2627_v52 = vand.u32 31, %v2625_v33  ;;  %v5791_v1 = vshrl.u32 %v2625_v33, 5 }
 0x2ba   :  { %v5788_v56 = vsub.s32 32, %v2627_v52  ;;  %v2639_v32 = vshll.u32 %v8289_v44, %v2627_v52  ;;  %v2642_v4 = vshll.u32 %v8291_v14, %v2627_v52  ;;  %v2630_v6 = vshll.u32 %v8290_v61, %v2627_v52 }
 0x2bb   :  { %v2633_v12 = vshll.u32 %v8296_v8, %v2627_v52  ;;  %v2636_v49 = vshll.u32 %v8293_v63, %v2627_v52  ;;  %vm2648_vm14 = vcmp.lt.s32.totalorder %v5791_v1, 4  ;;  %vm2645_vm12 = vcmp.lt.s32.totalorder %v5791_v1, 1 }
 0x2bc   :  { %v2640_v15 = vshrl.u32 %v8291_v14, %v5788_v56  ;;  %v2643_v11 = vshrl.u32 %v8292_v45, %v5788_v56  ;;  %v2631_v24 = vshrl.u32 %v8296_v8, %v5788_v56  ;;  %v2634_v5 = vshrl.u32 %v8293_v63, %v5788_v56 }
 0x2bd   :  { %v2637_v17 = vshrl.u32 %v8289_v44, %v5788_v56  ;;  %vm2647_vm13 = vcmp.lt.s32.totalorder %v5791_v1, 3  ;;  %vm2646_vm0 = vcmp.lt.s32.totalorder %v5791_v1, 2 }
 0x2be   :  { %v2641_v41 = vor.u32 %v2640_v15, %v2639_v32  ;;  %v2644_v13 = vor.u32 %v2643_v11, %v2642_v4  ;;  %v5808_v7 = vor.u32 %v2631_v24, %v2630_v6  ;;  %v2635_v59 = vor.u32 %v2634_v5, %v2633_v12 }
 0x2bf   :  { %v2638_v29 = vor.u32 %v2637_v17, %v2636_v49  ;;  %v5846_v4 = vsub.s32 32, %v5786_v35  ;;  %v2003_v15 = vadd.s32 1, %v4350_v25  ;;  %v2313_v24 = vadd.s32 1, %v4356_v3 }
 0x2c0   :  { %v2654_v37 = vsel %vm2648_vm14, %v2641_v41, 920167782  ;;  %v2658_v47 = vsel %vm2648_vm14, %v2644_v13, 1326507024  ;;  %v2653_v43 = vsel %vm2645_vm12, %v5808_v7, %v2635_v59  ;;  %v2468_v49 = vadd.s32 1, %v4359_v26 }
 0x2c1   :  { %v2655_v55 = vsel %vm2647_vm13, %v2638_v29, %v2654_v37  ;;  %v2657_v0 = vsel %vm2645_vm12, %v2635_v59, %v2638_v29  ;;  %v2659_v36 = vsel %vm2647_vm13, %v2641_v41, %v2658_v47  ;;  %8354 = vst [vmem:[#allocation22_spill] sm:$0xff] %v5846_v4  ;;  %vm2314_vm4 = vcmp.gt.s32.totalorder %v2313_v24, 0 }
 0x2c2   :  { %v2656_v58 = vsel %vm2646_vm0, %v2653_v43, %v2655_v55  ;;  %v2660_v10 = vsel %vm2646_vm0, %v2657_v0, %v2659_v36  ;;  %v2650_v55 = vsel %vm2648_vm14, %v2638_v29, 2102212464  ;;  %vm2469_vm6 = vcmp.gt.s32.totalorder %v2468_v49, 0 }
 0x2c3   :  { %v2686_v30 = vand.u32 65535, %v2656_v58  ;;  %v2687_v34 = vshrl.u32 %v2656_v58, 16  ;;  %v2664_v33 = vand.u32 65535, %v2660_v10  ;;  %v2665_v52 = vshrl.u32 %v2660_v10, 16 }
 0x2c4   :  { %v2629_v58 = vshrl.u32 %v8290_v61, %v5788_v56  ;;  %v5866_v56 = vshrl.u32 %v8291_v14, %v5779_v53  ;;  %vm2004_vm5 = vcmp.gt.s32.totalorder %v2003_v15, 0 }
 0x2c5   :  { %v2689_v60 = vmul.u32 %v2687_v34, %v2662_v9  ;;  %v2690_v32 = vmul.u32 %v2686_v30, %v2663_v57  ;;  %v2667_v11 = vmul.u32 %v2665_v52, %v2662_v9  ;;  %v2668_v6 = vmul.u32 %v2664_v33, %v2663_v57 }
 0x2c6   :  { %v2688_v12 = vmul.u32 %v2686_v30, %v2662_v9  ;;  %v2666_v17 = vmul.u32 %v2664_v33, %v2662_v9  ;;  %v2691_v13 = vmul.u32 %v2687_v34, %v2663_v57  ;;  %v2669_v50 = vmul.u32 %v2665_v52, %v2663_v57  ;;  %8355 = vst [vmem:[#allocation23_spill] sm:$0xff] %v5866_v56 }
 0x2c7   :  { %v2692_v5 = vshll.u32 %v2689_v60, 16  ;;  %v2670_v41 = vshll.u32 %v2667_v11, 16  ;;  %v2694_v18 = vshll.u32 %v2690_v32, 16  ;;  %v2672_v47 = vshll.u32 %v2668_v6, 16 }
 0x2c8   :  { %v2693_v57 = vshrl.u32 %v2689_v60, 16  ;;  %v2649_v29 = vsel %vm2645_vm12, %v2629_v58, %v5808_v7  ;;  %v2651_v34 = vsel %vm2647_vm13, %v2635_v59, %v2650_v55  ;;  %v2671_v26 = vshrl.u32 %v2667_v11, 16 }
 0x2c9   :  { %vm2696_vm1 = vc.u32 %v2688_v12, %v2692_v5  ;;  %v2698_v37 = vadd.s32 %v2692_v5, %v2688_v12  ;;  %vm2674_vm2 = vc.u32 %v2666_v17, %v2670_v41  ;;  %v2676_v43 = vadd.s32 %v2670_v41, %v2666_v17 }
 0x2ca   :  { %v2697_v25 = vsel %vm2696_vm1, 1, %v8295_v19  ;;  %v2675_v0 = vsel %vm2674_vm2, 1, %v8295_v19  ;;  %v5870_v52 = vshrl.u32 %v8292_v45, %v5779_v53  ;;  %v2695_v12 = vshrl.u32 %v2690_v32, 16 }
 0x2cb   :  { %v2699_v3 = vadd.s32 %v2697_v25, %v2691_v13  ;;  %vm2700_vm3 = vc.u32 %v2698_v37, %v2694_v18  ;;  %v2677_v36 = vadd.s32 %v2675_v0, %v2669_v50  ;;  %vm2678_vm8 = vc.u32 %v2676_v43, %v2672_v47 }
 0x2cc   :  { %v2701_v9 = vsel %vm2700_vm3, 1, %v8295_v19  ;;  %v2679_v10 = vsel %vm2678_vm8, 1, %v8295_v19  ;;  %8356 = vst [vmem:[#allocation13_spill] sm:$0xff] %v5870_v52  ;;  %v5873_v5 = vand.u32 31, %v5843_v54  ;;  %v2673_v7 = vshrl.u32 %v2668_v6, 16 }
 0x2cd   :  { %v2703_v30 = vadd.s32 %v2701_v9, %v2699_v3  ;;  %v2681_v33 = vadd.s32 %v2679_v10, %v2677_v36  ;;  %v2315_v59 = vsel %vm2314_vm4, %v2313_v24, 0  ;;  %v2652_v11 = vsel %vm2646_vm0, %v2649_v29, %v2651_v34 }
 0x2ce   :  { %8357 = vst [vmem:[#allocation21_spill] sm:$0xff] %v5873_v5  ;;  %v1865_v13 = vshrl.u32 %v8291_v14, %v5846_v4  ;;  %v5881_v50 = vsub.s32 32, %v5849_v40  ;;  %v5885_v47 = vadd.s32 %v2698_v37, %v2694_v18  ;;  %v1864_v6 = vshll.u32 %v8289_v44, %v5786_v35 }
 0x2cf   :  { %v2704_v60 = vadd.s32 %v2703_v30, %v2693_v57  ;;  %v2682_v17 = vadd.s32 %v2681_v33, %v2671_v26  ;;  %v1868_v24 = vshrl.u32 %v8292_v45, %v5846_v4  ;;  %v2470_v43 = vsel %vm2469_vm6, %v2468_v49, 0 }
 0x2d0   :  { %v2005_v25 = vsel %vm2004_vm5, %v2003_v15, 0  ;;  %v5891_v55 = vand.u32 31, %v2315_v59  ;;  %v2706_v0 = vmul.u32 %v5810_v27, %v2652_v11  ;;  %v5897_v3 = vsub.s32 32, %v5873_v5 }
 0x2d1   :  { %v2705_v41 = vadd.s32 %v2704_v60, %v2695_v12  ;;  %v5883_v32 = vadd.s32 %v2682_v17, %v2673_v7  ;;  %v5900_v18 = vshrl.u32 %v5771_v38, 5  ;;  %v1867_v37 = vshll.u32 %v8291_v14, %v5786_v35 }
 0x2d2   :  { %8358 = vst [vmem:[#allocation25_spill] sm:$0xff] %v5897_v3  ;;  %v5904_v49 = vor.u32 %v1865_v13, %v1864_v6  ;;  %v2175_v15 = vshrl.u32 %v8291_v14, %v5881_v50  ;;  %v5908_v36 = vand.u32 31, %v2470_v43  ;;  %v5911_v9 = vshrl.u32 %v5843_v54, 5 }
 0x2d3   :  { %v2709_v1 = vadd.s32 1, %v2705_v41  ;;  %vm2708_vm10 = vc.u32 %v5883_v32, %v5885_v47  ;;  %8359 = vst [vmem:[#allocation6_spill] sm:$0xff] %v5900_v18  ;;  %v5915_v10 = vshll.u32 %v8289_v44, %v5873_v5  ;;  %v1869_v38 = vor.u32 %v1868_v24, %v1867_v37 }
 0x2d4   :  { %8360 = vst [vmem:[#allocation10_spill] sm:$0xff] %v5904_v49  ;;  %v5917_v57 = vand.u32 31, %v2005_v25  ;;  %v5920_v30 = vshrl.u32 %v5836_v31, 5  ;;  %v2174_v29 = vshll.u32 %v8289_v44, %v5849_v40  ;;  %v5925_v34 = vsub.s32 32, %v5891_v55 }
 0x2d5   :  { %v2710_v58 = vsel %vm2708_vm10, %v2709_v1, %v2705_v41  ;;  %8361 = vst [vmem:[#allocation14_spill] sm:$0xff] %v5911_v9  ;;  %v5929_v54 = vshrl.u32 %v8291_v14, %v5897_v3  ;;  %v5933_v33 = vshrl.u32 %v8292_v45, %v5897_v3  ;;  %vm1873_vm11 = vcmp.lt.s32.totalorder %v5900_v18, 4 }
 0x2d6   :  { %v2711_v27 = vadd.s32 %v2710_v58, %v2706_v0  ;;  %8362 = vst [vmem:[#allocation17_spill] sm:$0xff] %v5915_v10  ;;  %v2178_v31 = vshrl.u32 %v8292_v45, %v5881_v50  ;;  %v5941_v12 = vsel %vm1873_vm11, %v5904_v49, 920167782  ;;  %v5943_v60 = vor.u32 %v2175_v15, %v2174_v29 }
 0x2d7   :  { %8363 = vst [vmem:[#allocation19_spill] sm:$0xff] %v5917_v57  ;;  %v5946_v7 = vsub.s32 32, %v5908_v36  ;;  %v5950_v11 = vsel %vm1873_vm11, %v1869_v38, 1326507024  ;;  %v5952_v41 = vshrl.u32 %v2005_v25, 5  ;;  %v5955_v13 = vsub.s32 32, %v5917_v57 }
 0x2d8   :  { %v2712_v26 = vadd.s32 536870912, %v2711_v27  ;;  %8364 = vst [vmem:[#allocation16_spill] sm:$0xff] %v5929_v54  ;;  %v2177_v6 = vshll.u32 %v8291_v14, %v5849_v40  ;;  %v5961_v24 = vshll.u32 %v8289_v44, %v5917_v57  ;;  %vm2183_vm9 = vcmp.lt.s32.totalorder %v5920_v30, 4 }
 0x2d9   :  { %8365 = vst [vmem:[#allocation20_spill] sm:$0xff] %v5933_v33  ;;  %v2330_v1 = vshrl.u32 %v8291_v14, %v5925_v34  ;;  %v5966_v58 = vshrl.u32 %v2315_v59, 5  ;;  %v2333_v25 = vshrl.u32 %v8292_v45, %v5925_v34  ;;  %v8189_v15 = vand.u32 2147483647, %v5765_v48 }
 0x2da   :  { %8366 = vst [vmem:[#allocation5_spill] sm:$0xff] %v5941_v12  ;;  %v2713_v17 = vshrl.u32 %v2712_v26, 30  ;;  %v2179_v37 = vor.u32 %v2178_v31, %v2177_v6  ;;  %v5974_v38 = vsel %vm2183_vm9, %v5943_v60, 920167782  ;;  %v2329_v29 = vshll.u32 %v8289_v44, %v5891_v55 }
 0x2db   :  { %8367 = vst [vmem:[#allocation9_spill] sm:$0xff] %v5950_v11  ;;  %v2485_v26 = vshrl.u32 %v8291_v14, %v5946_v7  ;;  %v2332_v59 = vshll.u32 %v8291_v14, %v5891_v55  ;;  %v2488_v31 = vshrl.u32 %v8292_v45, %v5946_v7  ;;  %v2310_v62 = vand.u32 8388607, %v8189_v15 }
 0x2dc   :  { %8368 = vst [vmem:[#allocation31_spill] sm:$0xff] %v5952_v41  ;;  %v2714_v0 = vshll.u32 %v2713_v17, 30  ;;  %v2737_v6 = vsub.s32 4, %v2713_v17  ;;  %v5986_v53 = vor.u32 %v2330_v1, %v2329_v29  ;;  %v2484_v23 = vshll.u32 %v8289_v44, %v5908_v36 }
 0x2dd   :  { %v2334_v2 = vor.u32 %v2333_v25, %v2332_v59  ;;  %vm2338_vm14 = vcmp.lt.s32.totalorder %v5966_v58, 4  ;;  %vm2615_vm12 = vcmp.lt.s32.totalorder %v5757_v42, 0  ;;  %v8195_v1 = vand.u32 2147483647, %v5753_v21 }
 0x2de   :  { %v2715_v46 = vsub.s32 %v2711_v27, %v2714_v0  ;;  %v5991_v27 = vshrl.u32 %v2470_v43, 5  ;;  %v2487_v0 = vshll.u32 %v8291_v14, %v5908_v36  ;;  %v5995_v56 = vor.u32 %v2485_v26, %v2484_v23 }
 0x2df   :  { %v2738_v20 = vsel %vm2615_vm12, %v2737_v6, %v2713_v17  ;;  %v2311_v25 = vor.u32 8388608, %v2310_v62  ;;  %v6003_v43 = vshll.u32 %v8291_v14, %v5917_v57  ;;  %v6007_v59 = vsel %vm2183_vm9, %v2179_v37, 1326507024 }
 0x2e0   :  { %vm2716_vm15 = vcmp.lt.s32.totalorder %v2715_v46, 0  ;;  %v2717_v52 = vsub.s32 0, %v2715_v46  ;;  %v2489_v29 = vor.u32 %v2488_v31, %v2487_v0  ;;  %v6012_v23 = vsel %vm2338_vm14, %v5986_v53, 920167782 }
 0x2e1   :  { %8369 = vst [vmem:[#allocation32_spill] sm:$0xff] %v6003_v43  ;;  %v6022_v62 = vsel %vm2338_vm14, %v2334_v2, 1326507024  ;;  %vm2493_vm0 = vcmp.lt.s32.totalorder %v5991_v27, 4  ;;  %v6028_v26 = vshrl.u32 %v8291_v14, %v5955_v13  ;;  %v6037_v2 = vand.u32 8388607, %v8195_v1 }
 0x2e2   :  { %v2718_v15 = vsel %vm2716_vm15, %v2717_v52, %v2715_v46  ;;  %v8370_v52 = vand.u32 2147483647, %v5757_v42  ;;  %v2499_v31 = vsel %vm2493_vm0, %v5995_v56, 920167782  ;;  %v2707_v0 = vadd.s32 %v5885_v47, %v5883_v32 }
 0x2e3   :  { %v2719_v39 = vclz %v2718_v15  ;;  %v8373_v3 = vand.u32 2147483647, %v5776_v51  ;;  %v2169_v1 = vshrl.u32 %v8293_v63, %v5881_v50  ;;  %v2165_v47 = vshll.u32 %v8290_v61, %v5849_v40 }
 0x2e4   :  { %vm6016_vm13 = vcmp.le.f32.partialorder %v8370_v52, 0.7853982  ;;  %v6043_v52 = vshll.u32 %v2311_v25, 8  ;;  %v2171_v25 = vshll.u32 %v8293_v63, %v5849_v40  ;;  %vm2492_vm2 = vcmp.lt.s32.totalorder %v5991_v27, 3 }
 0x2e5   :  { %v4363_v17 = vadd.s32 4294967294, %v2719_v39  ;;  %v2740_v6 = vsel %vm6016_vm13, 0, %v2738_v20  ;;  %v2503_v39 = vsel %vm2493_vm0, %v2489_v29, 1326507024  ;;  %v2465_v22 = vand.u32 8388607, %v8373_v3 }
 0x2e6   :  { %v2166_v20 = vshrl.u32 %v8296_v8, %v5881_v50  ;;  %v2757_v14 = vadd.s32 3, %v2740_v6  ;;  %v2172_v29 = vshrl.u32 %v8289_v44, %v5881_v50  ;;  %v2168_v3 = vshll.u32 %v8296_v8, %v5849_v40 }
 0x2e7   :  { %vm4364_vm1 = vcmp.lt.s32.totalorder %v4363_v17, 0  ;;  %v6061_v10 = vand.u32 65535, %v6043_v52  ;;  %v2466_v6 = vor.u32 8388608, %v2465_v22  ;;  %v6064_v12 = vshrl.u32 %v6043_v52, 16 }
 0x2e8   :  { %v2722_v37 = vsel %vm4364_vm1, 0, %v4363_v17  ;;  %v6066_v32 = vor.u32 %v2166_v20, %v2165_v47  ;;  %v6068_v49 = vor.u32 %v2169_v1, %v2168_v3  ;;  %v6070_v4 = vand.u32 3, %v2757_v14 }
 0x2e9   :  { %v2723_v33 = vsub.s32 32, %v2722_v37  ;;  %v2727_v9 = vsub.s32 4294967266, %v2722_v37  ;;  %v2724_v17 = vshll.u32 %v2715_v46, %v2722_v37  ;;  %v6072_v35 = vor.u32 %v2172_v29, %v2171_v25 }
 0x2ea   :  { %v2475_v46 = vshll.u32 %v8290_v61, %v5908_v36  ;;  %v2476_v40 = vshrl.u32 %v8296_v8, %v5946_v7  ;;  %v2320_v22 = vshll.u32 %v8290_v61, %v5891_v55  ;;  %v2479_v14 = vshrl.u32 %v8293_v63, %v5946_v7 }
 0x2eb   :  { %v2725_v5 = vshrl.u32 %v2707_v0, %v2723_v33  ;;  %v2728_v54 = vadd.s32 127, %v2727_v9  ;;  %v2323_v9 = vshll.u32 %v8296_v8, %v5891_v55  ;;  %v2481_v37 = vshll.u32 %v8293_v63, %v5908_v36 }
 0x2ec   :  { %v2477_v1 = vor.u32 %v2476_v40, %v2475_v46  ;;  %v2482_v0 = vshrl.u32 %v8289_v44, %v5946_v7  ;;  %v6092_v20 = vshll.u32 %v2466_v6, 8  ;;  %vm2490_vm3 = vcmp.lt.s32.totalorder %v5991_v27, 1 }
 0x2ed   :  { %v2726_v11 = vor.u32 %v2725_v5, %v2724_v17  ;;  %v2729_v18 = vshll.u32 %v2728_v54, 23  ;;  %v2478_v5 = vshll.u32 %v8296_v8, %v5908_v36  ;;  %v2326_v54 = vshll.u32 %v8293_v63, %v5891_v55 }
 0x2ee   :  { %v2483_v3 = vor.u32 %v2482_v0, %v2481_v37  ;;  %v2504_v55 = vsel %vm2492_vm2, %v5995_v56, %v2503_v39  ;;  %v6103_v36 = vshrl.u32 %v8290_v61, %v5925_v34  ;;  %v2321_v17 = vshrl.u32 %v8296_v8, %v5925_v34 }
 0x2ef   :  { %v2730_v33 = vor.u32 4788187, %v2729_v18  ;;  %v2733_v18 = vcvt.s32.f32 %v2726_v11  ;;  %v6094_v47 = vor.u32 %v2479_v14, %v2478_v5  ;;  %v2324_v6 = vshrl.u32 %v8293_v63, %v5925_v34 }
 0x2f0   :  { %vm2491_vm8 = vcmp.lt.s32.totalorder %v5991_v27, 2  ;;  %v2500_v56 = vsel %vm2492_vm2, %v2483_v3, %v2499_v31  ;;  %v2327_v46 = vshrl.u32 %v8289_v44, %v5925_v34  ;;  %v2507_v37 = vand.u32 65535, %v6092_v20 }
 0x2f1   :  { %v2731_v29 = vand.u32 2147483647, %v2730_v33  ;;  %v2498_v11 = vsel %vm2490_vm3, %v2477_v1, %v6094_v47  ;;  %v2502_v39 = vsel %vm2490_vm3, %v6094_v47, %v2483_v3  ;;  %v2474_v33 = vshrl.u32 %v8290_v61, %v5946_v7 }
 0x2f2   :  { %v2501_v5 = vsel %vm2491_vm8, %v2498_v11, %v2500_v56  ;;  %v2505_v14 = vsel %vm2491_vm8, %v2502_v39, %v2504_v55  ;;  %v2508_v31 = vshrl.u32 %v6092_v20, 16  ;;  %v6139_v39 = vor.u32 %v2321_v17, %v2320_v22 }
 0x2f3   :  { %v2734_v25 = vmul.f32 %v2733_v18, %v2731_v29  ;;  %v2509_v0 = vand.u32 65535, %v2505_v14  ;;  %v2510_v29 = vshrl.u32 %v2505_v14, 16  ;;  %v6132_v34 = vsel %vm2490_vm3, %v2474_v33, %v2477_v1 }
 0x2f4   :  { %v2531_v7 = vand.u32 65535, %v2501_v5  ;;  %v2532_v28 = vshrl.u32 %v2501_v5, 16  ;;  %v6145_v1 = vor.u32 %v2324_v6, %v2323_v9  ;;  %v6147_v44 = vor.u32 %v2327_v46, %v2326_v54 }
 0x2f5   :  { %v2735_v40 = vxor.u32 2147483648, %v2734_v25  ;;  %v2512_v55 = vmul.u32 %v2510_v29, %v2507_v37  ;;  %v2513_v56 = vmul.u32 %v2509_v0, %v2508_v31  ;;  %v2511_v33 = vmul.u32 %v2509_v0, %v2507_v37 }
 0x2f6   :  { %v2514_v5 = vmul.u32 %v2510_v29, %v2508_v31  ;;  %v2533_v57 = vmul.u32 %v2531_v7, %v2507_v37  ;;  %v2535_v17 = vmul.u32 %v2531_v7, %v2508_v31  ;;  %v2536_v6 = vmul.u32 %v2532_v28, %v2508_v31 }
 0x2f7   :  { %v2736_v18 = vsel %vm2615_vm12, %v2735_v40, %v2734_v25  ;;  %v2495_v25 = vsel %vm2493_vm0, %v2483_v3, 2102212464  ;;  %v2534_v40 = vmul.u32 %v2532_v28, %v2507_v37  ;;  %v2515_v21 = vshll.u32 %v2512_v55, 16 }
 0x2f8   :  { %v6137_v11 = vsel %vm6016_vm13, %v5757_v42, %v2736_v18  ;;  %v2517_v8 = vshll.u32 %v2513_v56, 16  ;;  %v2516_v43 = vshrl.u32 %v2512_v55, 16  ;;  %v2539_v41 = vshll.u32 %v2535_v17, 16 }
 0x2f9   :  { %v2741_v14 = vmul.f32 %v6137_v11, %v6137_v11  ;;  %vm2519_vm4 = vc.u32 %v2511_v33, %v2515_v21  ;;  %v2521_v22 = vadd.s32 %v2515_v21, %v2511_v33  ;;  %v2537_v63 = vshll.u32 %v2534_v40, 16 }
 0x2fa   :  { %v2520_v3 = vsel %vm2519_vm4, 1, %v8295_v19  ;;  %v2496_v55 = vsel %vm2492_vm2, %v6094_v47, %v2495_v25  ;;  %vm2335_vm10 = vcmp.lt.s32.totalorder %v5966_v58, 1  ;;  %vm2760_vm15 = vcmp.eq.s32.totalorder %v6070_v4, 0 }
 0x2fb   :  { %v2742_v15 = vmul.f32 -0.001358992, %v2741_v14  ;;  %v2749_v18 = vmul.f32 -0.00019511016, %v2741_v14  ;;  %v2522_v9 = vadd.s32 %v2520_v3, %v2514_v5  ;;  %vm2523_vm6 = vc.u32 %v2521_v22, %v2517_v8 }
 0x2fc   :  { %vm2541_vm5 = vc.u32 %v2533_v57, %v2537_v63  ;;  %v2524_v46 = vsel %vm2523_vm6, 1, %v8295_v19  ;;  %v2543_v21 = vadd.s32 %v2537_v63, %v2533_v57  ;;  %vm2763_vm12 = vcmp.eq.s32.totalorder %v6070_v4, 2 }
 0x2fd   :  { %v2743_v16 = vadd.f32 0.041655596, %v2742_v15  ;;  %v2750_v48 = vadd.f32 0.008332121, %v2749_v18  ;;  %v2542_v29 = vsel %vm2541_vm5, 1, %v8295_v19  ;;  %v2526_v37 = vadd.s32 %v2524_v46, %v2522_v9 }
 0x2fe   :  { %v2544_v7 = vadd.s32 %v2542_v29, %v2536_v6  ;;  %v2518_v8 = vshrl.u32 %v2513_v56, 16  ;;  %vm2545_vm13 = vc.u32 %v2543_v21, %v2539_v41  ;;  %vm2759_vm0 = vcmp.lt.s32.totalorder %v6070_v4, 2 }
 0x2ff   :  { %v2744_v0 = vmul.f32 %v2743_v16, %v2741_v14  ;;  %v2751_v54 = vmul.f32 %v2750_v48, %v2741_v14  ;;  %v2527_v28 = vadd.s32 %v2526_v37, %v2516_v43  ;;  %v2538_v16 = vshrl.u32 %v2534_v40, 16 }
 0x300   :  { %v2546_v63 = vsel %vm2545_vm13, 1, %v8295_v19  ;;  %vm2336_vm1 = vcmp.lt.s32.totalorder %v5966_v58, 2  ;;  %vm2756_vm2 = vweird.f32 %v5757_v42  ;;  %vm2337_vm3 = vcmp.lt.s32.totalorder %v5966_v58, 3 }
 0x301   :  { %v2745_v33 = vadd.f32 -0.4999988, %v2744_v0  ;;  %v2752_v15 = vadd.f32 -0.16666654, %v2751_v54  ;;  %v6162_v57 = vadd.s32 %v2527_v28, %v2518_v8  ;;  %v2548_v47 = vadd.s32 %v2546_v63, %v2544_v7 }
 0x302   :  { %v2343_v43 = vsel %vm2335_vm10, %v6139_v39, %v6145_v1  ;;  %v2345_v25 = vsel %vm2337_vm3, %v6147_v44, %v6012_v23  ;;  %v2347_v40 = vsel %vm2335_vm10, %v6145_v1, %v6147_v44  ;;  %v2497_v5 = vsel %vm2491_vm8, %v6132_v34, %v2496_v55 }
 0x303   :  { %v2746_v48 = vmul.f32 %v2745_v33, %v2741_v14  ;;  %v2753_v31 = vmul.f32 %v2752_v15, %v2741_v14  ;;  %v2540_v18 = vshrl.u32 %v2535_v17, 16  ;;  %v2549_v22 = vadd.s32 %v2548_v47, %v2538_v16 }
 0x304   :  { %v2346_v3 = vsel %vm2336_vm1, %v2343_v43, %v2345_v25  ;;  %v6183_v0 = vadd.s32 %v2543_v21, %v2539_v41  ;;  %v2349_v23 = vsel %vm2337_vm3, %v5986_v53, %v6022_v62  ;;  %v2551_v41 = vmul.u32 %v6092_v20, %v2497_v5 }
 0x305   :  { %v2747_v56 = vadd.f32 1.0, %v2746_v48  ;;  %v2754_v14 = vadd.f32 1.0, %v2753_v31  ;;  %v2550_v54 = vadd.s32 %v2549_v22, %v2540_v18  ;;  %v2350_v27 = vsel %vm2336_vm1, %v2347_v40, %v2349_v23 }
 0x306   :  { %v2376_v34 = vand.u32 65535, %v2346_v3  ;;  %v2377_v17 = vshrl.u32 %v2346_v3, 16  ;;  %vm2553_vm8 = vc.u32 %v6162_v57, %v6183_v0  ;;  %v2354_v29 = vand.u32 65535, %v2350_v27 }
 0x307   :  { %v2755_v9 = vmul.f32 %v2754_v14, %v6137_v11  ;;  %v2764_v6 = vxor.u32 2147483648, %v2747_v56  ;;  %v2355_v11 = vshrl.u32 %v2350_v27, 16  ;;  %v2554_v37 = vadd.s32 1, %v2550_v54 }
 0x308   :  { %v2339_v53 = vsel %vm2335_vm10, %v6103_v36, %v6139_v39  ;;  %v2379_v62 = vmul.u32 %v2377_v17, %v6061_v10  ;;  %v2358_v15 = vmul.u32 %v2354_v29, %v6064_v12  ;;  %v2340_v36 = vsel %vm2338_vm14, %v6147_v44, 2102212464 }
 0x309   :  { %v2761_v46 = vxor.u32 2147483648, %v2755_v9  ;;  %v2765_v7 = vsel %vm2763_vm12, %v2764_v6, %v2755_v9  ;;  %v2357_v33 = vmul.u32 %v2355_v11, %v6061_v10  ;;  %v2555_v55 = vsel %vm2553_vm8, %v2554_v37, %v2550_v54 }
 0x30a   :  { %v2380_v39 = vmul.u32 %v2376_v34, %v6064_v12  ;;  %v2556_v28 = vadd.s32 %v2555_v55, %v2551_v41  ;;  %v2356_v16 = vmul.u32 %v2354_v29, %v6061_v10  ;;  %v2359_v31 = vmul.u32 %v2355_v11, %v6064_v12 }
 0x30b   :  { %v2762_v21 = vsel %vm2760_vm15, %v2747_v56, %v2761_v46  ;;  %v2360_v48 = vshll.u32 %v2357_v33, 16  ;;  %v2378_v4 = vmul.u32 %v2376_v34, %v6061_v10  ;;  %v2381_v63 = vmul.u32 %v2377_v17, %v6064_v12 }
 0x30c   :  { %v2766_v20 = vsel %vm2759_vm0, %v2762_v21, %v2765_v7  ;;  %v2382_v47 = vshll.u32 %v2379_v62, 16  ;;  %v2557_v43 = vadd.s32 536870912, %v2556_v28  ;;  %v2362_v56 = vshll.u32 %v2358_v15, 16 }
 0x30d   :  { %v2767_v8 = vsel %vm2756_vm2, nan, %v2766_v20  ;;  %vm2364_vm14 = vc.u32 %v2356_v16, %v2360_v48  ;;  %v2366_v44 = vadd.s32 %v2360_v48, %v2356_v16  ;;  %v2384_v42 = vshll.u32 %v2380_v39, 16 }
 0x30e   :  { %2856 = vmatpush.msra.mxu2 %v2767_v8  ;;  %v2365_v14 = vsel %vm2364_vm14, 1, %v8295_v19  ;;  %vm2386_vm4 = vc.u32 %v2378_v4, %v2382_v47  ;;  %v2388_v25 = vadd.s32 %v2382_v47, %v2378_v4  ;;  %v6218_v40 = vshrl.u32 %v2557_v43, 30 }
 0x30f   :  { %v2367_v5 = vadd.s32 %v2365_v14, %v2359_v31  ;;  %vm2368_vm6 = vc.u32 %v2366_v44, %v2362_v56  ;;  %v2387_v18 = vsel %vm2386_vm4, 1, %v8295_v19  ;;  %v2341_v10 = vsel %vm2337_vm3, %v6145_v1, %v2340_v36 }
 0x310   :  { %v2369_v12 = vsel %vm2368_vm6, 1, %v8295_v19  ;;  %v2389_v22 = vadd.s32 %v2387_v18, %v2381_v63  ;;  %vm2390_vm5 = vc.u32 %v2388_v25, %v2384_v42  ;;  %v2559_v3 = vshll.u32 %v6218_v40, 30 }
 0x311   :  { %v2361_v9 = vshrl.u32 %v2357_v33, 16  ;;  %v2371_v6 = vadd.s32 %v2369_v12, %v2367_v5  ;;  %v2391_v23 = vsel %vm2390_vm5, 1, %v8295_v19  ;;  %v2383_v54 = vshrl.u32 %v2379_v62, 16  ;;  %v8375_v5 = vld [vmem:[#allocation31_spill] sm:$0xff] }
 0x312   :  { %v2393_v27 = vadd.s32 %v2391_v23, %v2389_v22  ;;  %vm2180_vm10 = vcmp.lt.s32.totalorder %v5920_v30, 1  ;;  %vm2182_vm15 = vcmp.lt.s32.totalorder %v5920_v30, 3  ;;  %v2560_v34 = vsub.s32 %v2556_v28, %v2559_v3 }
 0x313   :  { %v2342_v1 = vsel %vm2336_vm1, %v2339_v53, %v2341_v10  ;;  %v2363_v17 = vshrl.u32 %v2358_v15, 16  ;;  %v2372_v46 = vadd.s32 %v2371_v6, %v2361_v9  ;;  %v2385_v29 = vshrl.u32 %v2380_v39, 16 }
 0x314   :  { %v6231_v11 = vadd.s32 %v2388_v25, %v2384_v42  ;;  %v2394_v41 = vadd.s32 %v2393_v27, %v2383_v54  ;;  %v2188_v37 = vsel %vm2180_vm10, %v6066_v32, %v6068_v49  ;;  %vm2561_vm12 = vcmp.lt.s32.totalorder %v2560_v34, 0 }
 0x315   :  { %v2562_v62 = vsub.s32 0, %v2560_v34  ;;  %v6237_v21 = vadd.s32 %v2372_v46, %v2363_v17  ;;  %v2190_v58 = vsel %vm2182_vm15, %v6072_v35, %v5974_v38  ;;  %v2192_v7 = vsel %vm2180_vm10, %v6068_v49, %v6072_v35  ;;  %v8376_v46 = vld [vmem:[#allocation32_spill] sm:$0xff] }
 0x316   :  { %v2395_v53 = vadd.s32 %v2394_v41, %v2385_v29  ;;  %v2194_v33 = vsel %vm2182_vm15, %v5943_v60, %v6007_v59  ;;  %v8374_v15 = vor.u32 8388608, %v6037_v2  ;;  %v6257_v55 = vshrl.u32 %v8292_v45, %v5955_v13 }
 0x317   :  { %v2563_v38 = vsel %vm2561_vm12, %v2562_v62, %v2560_v34  ;;  %vm2398_vm13 = vc.u32 %v6237_v21, %v6231_v11  ;;  %vm2181_vm0 = vcmp.lt.s32.totalorder %v5920_v30, 2  ;;  %v6264_v36 = vor.u32 %v6028_v26, %v5961_v24 }
 0x318   :  { %v6253_v20 = vshll.u32 %v8374_v15, 8  ;;  %v2564_v39 = vclz %v2563_v38  ;;  %v2399_v60 = vadd.s32 1, %v2395_v53  ;;  %v2195_v59 = vsel %vm2181_vm0, %v2192_v7, %v2194_v33 }
 0x319   :  { %v2396_v2 = vmul.u32 %v6043_v52, %v2342_v1  ;;  %v6271_v8 = vsel %vm2181_vm0, %v2188_v37, %v2190_v58  ;;  %v2199_v24 = vand.u32 65535, %v2195_v59  ;;  %v2200_v26 = vshrl.u32 %v2195_v59, 16 }
 0x31a   :  { %v2197_v28 = vand.u32 65535, %v6253_v20  ;;  %v6275_v16 = vshrl.u32 %v6253_v20, 16  ;;  %v4360_v48 = vadd.s32 4294967294, %v2564_v39  ;;  %v2400_v31 = vsel %vm2398_vm13, %v2399_v60, %v2395_v53 }
 0x31b   :  { %vm2460_vm1 = vcmp.lt.s32.totalorder %v5776_v51, 0  ;;  %v2582_v4 = vsub.s32 4, %v6218_v40  ;;  %v2401_v63 = vadd.s32 %v2400_v31, %v2396_v2  ;;  %v2164_v52 = vshrl.u32 %v8290_v61, %v5881_v50 }
 0x31c   :  { %v2552_v47 = vadd.s32 %v6183_v0, %v6162_v57  ;;  %vm4361_vm2 = vcmp.lt.s32.totalorder %v4360_v48, 0  ;;  %v6283_v43 = vmul.u32 %v2200_v26, %v2197_v28  ;;  %v6286_v56 = vmul.u32 %v2199_v24, %v6275_v16 }
 0x31d   :  { %v2567_v44 = vsel %vm4361_vm2, 0, %v4360_v48  ;;  %v2402_v14 = vadd.s32 536870912, %v2401_v63  ;;  %v2185_v42 = vsel %vm2183_vm9, %v6072_v35, 2102212464  ;;  %v2222_v25 = vshrl.u32 %v6271_v8, 16 }
 0x31e   :  { %vm2028_vm3 = vcmp.lt.s32.totalorder %v8375_v5, 4  ;;  %v2568_v50 = vsub.s32 32, %v2567_v44  ;;  %v2572_v18 = vsub.s32 4294967266, %v2567_v44  ;;  %v2201_v10 = vmul.u32 %v2199_v24, %v2197_v28 }
 0x31f   :  { %v2205_v57 = vshll.u32 %v6283_v43, 16  ;;  %v2569_v0 = vshll.u32 %v2560_v34, %v2567_v44  ;;  %v2583_v12 = vsel %vm2460_vm1, %v2582_v4, %v6218_v40  ;;  %v6297_v22 = vshrl.u32 %v2402_v14, 30  ;;  %v8380_v14 = vld [vmem:[#allocation27_spill] sm:$0xff] }
 0x320   :  { %v2207_v3 = vshll.u32 %v6286_v56, 16  ;;  %v2570_v9 = vshrl.u32 %v2552_v47, %v2568_v50  ;;  %v2573_v35 = vadd.s32 127, %v2572_v18  ;;  %v2204_v54 = vmul.u32 %v2200_v26, %v6275_v16 }
 0x321   :  { %vm2209_vm9 = vc.u32 %v2201_v10, %v2205_v57  ;;  %v2211_v6 = vadd.s32 %v2205_v57, %v2201_v10  ;;  %v2404_v23 = vshll.u32 %v6297_v22, 30  ;;  %v2221_v34 = vand.u32 65535, %v6271_v8 }
 0x322   :  { %v2210_v27 = vsel %vm2209_vm9, 1, %v8295_v19  ;;  %v2571_v1 = vor.u32 %v2570_v9, %v2569_v0  ;;  %v2574_v17 = vshll.u32 %v2573_v35, 23  ;;  %v2224_v40 = vmul.u32 %v2222_v25, %v2197_v28 }
 0x323   :  { %vm2213_vm8 = vc.u32 %v2211_v6, %v2207_v3  ;;  %v2024_v29 = vor.u32 %v6257_v55, %v8376_v46  ;;  %v8377_v41 = vand.u32 2147483647, %v5776_v51  ;;  %v6312_v62 = vsub.s32 %v2401_v63, %v2404_v23 }
 0x324   :  { %v2212_v58 = vadd.s32 %v2210_v27, %v2204_v54  ;;  %v2575_v53 = vor.u32 4788187, %v2574_v17  ;;  %v2184_v33 = vsel %vm2180_vm10, %v2164_v52, %v6066_v32  ;;  %v2214_v15 = vsel %vm2213_vm8, 1, %v8295_v19 }
 0x325   :  { %vm6308_vm14 = vcmp.le.f32.partialorder %v8377_v41, 0.7853982  ;;  %vm2406_vm4 = vcmp.lt.s32.totalorder %v6312_v62, 0  ;;  %v2407_v55 = vsub.s32 0, %v6312_v62  ;;  %v2186_v38 = vsel %vm2182_vm15, %v6068_v49, %v2185_v42 }
 0x326   :  { %v2585_v7 = vsel %vm6308_vm14, 0, %v2583_v12  ;;  %v2223_v39 = vmul.u32 %v2221_v34, %v2197_v28  ;;  %v2576_v60 = vand.u32 2147483647, %v2575_v53  ;;  %v2578_v59 = vcvt.s32.f32 %v2571_v1  ;;  %v8384_v1 = vld [vmem:[#allocation24_spill] sm:$0xff] }
 0x327   :  { %v2225_v2 = vmul.u32 %v2221_v34, %v6275_v16  ;;  %v2227_v8 = vshll.u32 %v2224_v40, 16  ;;  %v6329_v32 = vsel %vm2028_vm3, %v6264_v36, 920167782  ;;  %v2602_v48 = vadd.s32 3, %v2585_v7 }
 0x328   :  { %v2408_v31 = vsel %vm2406_vm4, %v2407_v55, %v6312_v62  ;;  %v2216_v24 = vadd.s32 %v2214_v15, %v2212_v58  ;;  %v6334_v26 = vsel %vm2028_vm3, %v2024_v29, 1326507024  ;;  %v2579_v49 = vmul.f32 %v2578_v59, %v2576_v60 }
 0x329   :  { %v2409_v28 = vclz %v2408_v31  ;;  %vm2231_vm6 = vc.u32 %v2223_v39, %v2227_v8  ;;  %v6338_v4 = vsel %vm2181_vm0, %v2184_v33, %v2186_v38  ;;  %v2206_v63 = vshrl.u32 %v6283_v43, 16 }
 0x32a   :  { %v2226_v52 = vmul.u32 %v2222_v25, %v6275_v16  ;;  %v2232_v47 = vsel %vm2231_vm6, 1, %v8295_v19  ;;  %v2580_v44 = vxor.u32 2147483648, %v2579_v49  ;;  %vm2305_vm5 = vcmp.lt.s32.totalorder %v8380_v14, 0 }
 0x32b   :  { %v4357_v42 = vadd.s32 4294967294, %v2409_v28  ;;  %v2229_v50 = vshll.u32 %v2225_v2, 16  ;;  %v2233_v18 = vadd.s32 %v2227_v8, %v2223_v39  ;;  %v6344_v10 = vand.u32 3, %v2602_v48 }
 0x32c   :  { %v2397_v57 = vadd.s32 %v6231_v11, %v6237_v21  ;;  %v2217_v30 = vadd.s32 %v2216_v24, %v2206_v63  ;;  %v2234_v0 = vadd.s32 %v2232_v47, %v2226_v52  ;;  %v2581_v43 = vsel %vm2460_vm1, %v2580_v44, %v2579_v49  ;;  %v8386_v24 = vld [vmem:[#allocation19_spill] sm:$0xff] }
 0x32d   :  { %vm4358_vm10 = vcmp.lt.s32.totalorder %v4357_v42, 0  ;;  %v2208_v16 = vshrl.u32 %v6286_v56, 16  ;;  %vm2235_vm15 = vc.u32 %v2233_v18, %v2229_v50  ;;  %v6354_v25 = vsel %vm6308_vm14, %v5776_v51, %v2581_v43 }
 0x32e   :  { %v2412_v12 = vsel %vm4358_vm10, 0, %v4357_v42  ;;  %v2427_v3 = vsub.s32 4, %v6297_v22  ;;  %v2236_v9 = vsel %vm2235_vm15, 1, %v8295_v19  ;;  %v2586_v11 = vmul.f32 %v6354_v25, %v6354_v25 }
 0x32f   :  { %v8381_v21 = vand.u32 2147483647, %v8380_v14  ;;  %v2413_v56 = vsub.s32 32, %v2412_v12  ;;  %v2417_v6 = vsub.s32 4294967266, %v2412_v12  ;;  %v2228_v23 = vshrl.u32 %v2224_v40, 16 }
 0x330   :  { %v2414_v54 = vshll.u32 %v6312_v62, %v2412_v12  ;;  %v6367_v27 = vadd.s32 %v2217_v30, %v2208_v16  ;;  %v2238_v34 = vadd.s32 %v2236_v9, %v2234_v0  ;;  %v1993_v17 = vand.u32 2147483647, %v8384_v1 }
 0x331   :  { %vm6362_vm12 = vcmp.le.f32.partialorder %v8381_v21, 0.7853982  ;;  %v2587_v46 = vmul.f32 -0.001358992, %v2586_v11  ;;  %v2594_v29 = vmul.f32 -0.00019511016, %v2586_v11  ;;  %v2415_v41 = vshrl.u32 %v2397_v57, %v2413_v56 }
 0x332   :  { %v2418_v37 = vadd.s32 127, %v2417_v6  ;;  %v2230_v58 = vshrl.u32 %v2225_v2, 16  ;;  %v6370_v53 = vadd.s32 %v2233_v18, %v2229_v50  ;;  %v2239_v7 = vadd.s32 %v2238_v34, %v2228_v23 }
 0x333   :  { %v2241_v33 = vmul.u32 %v6253_v20, %v6338_v4  ;;  %v2588_v15 = vadd.f32 0.041655596, %v2587_v46  ;;  %v2595_v40 = vadd.f32 0.008332121, %v2594_v29  ;;  %v2416_v55 = vor.u32 %v2415_v41, %v2414_v54 }
 0x334   :  { %v2419_v62 = vshll.u32 %v2418_v37, 23  ;;  %v2428_v38 = vsel %vm2305_vm5, %v2427_v3, %v6297_v22  ;;  %v2240_v39 = vadd.s32 %v2239_v7, %v2230_v58  ;;  %vm2243_vm13 = vc.u32 %v6367_v27, %v6370_v53 }
 0x335   :  { %v8385_v60 = vmov 2131351028   ;;  %v2589_v2 = vmul.f32 %v2588_v15, %v2586_v11  ;;  %v2596_v8 = vmul.f32 %v2595_v40, %v2586_v11  ;;  %v2000_v20 = vand.u32 8388607, %v1993_v17 }
 0x336   :  { %v2014_v59 = vshrl.u32 %v8385_v60, %v5955_v13  ;;  %v2420_v48 = vor.u32 4788187, %v2419_v62  ;;  %v2244_v31 = vadd.s32 1, %v2240_v39  ;;  %v8387_v49 = vmov 2475754826  }
 0x337   :  { %v2013_v28 = vshll.u32 %v8387_v49, %v8386_v24  ;;  %v2016_v22 = vshll.u32 %v8385_v60, %v8386_v24  ;;  %v8388_v4 = vmov 2102212464   ;;  %v2590_v52 = vadd.f32 -0.4999988, %v2589_v2 }
 0x338   :  { %v2017_v63 = vshrl.u32 %v8388_v4, %v5955_v13  ;;  %v2597_v47 = vadd.f32 -0.16666654, %v2596_v8  ;;  %v2421_v44 = vand.u32 2147483647, %v2420_v48  ;;  %v2423_v42 = vcvt.s32.f32 %v2416_v55 }
 0x339   :  { %vm2605_vm0 = vcmp.eq.s32.totalorder %v6344_v10, 0  ;;  %v2430_v50 = vsel %vm6362_vm12, 0, %v2428_v38  ;;  %v2245_v18 = vsel %vm2243_vm13, %v2244_v31, %v2240_v39  ;;  %v6395_v57 = vor.u32 %v2014_v59, %v2013_v28 }
 0x33a   :  { %v6397_v30 = vor.u32 %v2017_v63, %v2016_v22  ;;  %v2591_v0 = vmul.f32 %v2590_v52, %v2586_v11  ;;  %v2598_v43 = vmul.f32 %v2597_v47, %v2586_v11  ;;  %vm2604_vm1 = vcmp.lt.s32.totalorder %v6344_v10, 2 }
 0x33b   :  { %v2424_v16 = vmul.f32 %v2423_v42, %v2421_v44  ;;  %v2246_v12 = vadd.s32 %v2245_v18, %v2241_v33  ;;  %vm2601_vm2 = vweird.f32 %v5776_v51  ;;  %v2001_v3 = vor.u32 8388608, %v2000_v20 }
 0x33c   :  { %v2011_v9 = vshrl.u32 %v8387_v49, %v5955_v13  ;;  %vm2025_vm9 = vcmp.lt.s32.totalorder %v8375_v5, 1  ;;  %vm2027_vm8 = vcmp.lt.s32.totalorder %v8375_v5, 3  ;;  %v2592_v21 = vadd.f32 1.0, %v2591_v0 }
 0x33d   :  { %v2599_v56 = vadd.f32 1.0, %v2598_v43  ;;  %v2425_v6 = vxor.u32 2147483648, %v2424_v16  ;;  %v2247_v23 = vadd.s32 536870912, %v2246_v12  ;;  %v2010_v11 = vshll.u32 %v8290_v61, %v8386_v24 }
 0x33e   :  { %vm2026_vm14 = vcmp.lt.s32.totalorder %v8375_v5, 2  ;;  %v2037_v54 = vsel %vm2025_vm9, %v6395_v57, %v6397_v30  ;;  %v2039_v34 = vsel %vm2027_vm8, %v6264_v36, %v6334_v26  ;;  %v2609_v29 = vxor.u32 2147483648, %v2592_v21 }
 0x33f   :  { %v2600_v46 = vmul.f32 %v2599_v56, %v6354_v25  ;;  %v2426_v41 = vsel %vm2305_vm5, %v2425_v6, %v2424_v16  ;;  %v6419_v37 = vshrl.u32 %v2247_v23, 30  ;;  %vm2608_vm4 = vcmp.eq.s32.totalorder %v6344_v10, 2 }
 0x340   :  { %v6425_v58 = vsel %vm6362_vm12, %v8380_v14, %v2426_v41  ;;  %v2447_v7 = vadd.s32 3, %v2430_v50  ;;  %v2040_v33 = vsel %vm2026_vm14, %v2037_v54, %v2039_v34  ;;  %v2012_v15 = vor.u32 %v2011_v9, %v2010_v11 }
 0x341   :  { %v2606_v36 = vxor.u32 2147483648, %v2600_v46  ;;  %v2431_v26 = vmul.f32 %v6425_v58, %v6425_v58  ;;  %v2249_v25 = vshll.u32 %v6419_v37, 30  ;;  %v2610_v40 = vsel %vm2608_vm4, %v2609_v29, %v2600_v46 }
 0x342   :  { %v6432_v55 = vshll.u32 %v2001_v3, 8  ;;  %v2044_v62 = vand.u32 65535, %v2040_v33  ;;  %v2045_v38 = vshrl.u32 %v2040_v33, 16  ;;  %v6440_v48 = vand.u32 3, %v2447_v7  ;;  %v8389_v3 = vld [vmem:[#allocation11_spill] sm:$0xff] }
 0x343   :  { %v2607_v35 = vsel %vm2605_vm0, %v2592_v21, %v2606_v36  ;;  %v2432_v39 = vmul.f32 -0.001358992, %v2431_v26  ;;  %v2439_v59 = vmul.f32 -0.00019511016, %v2431_v26  ;;  %v6436_v2 = vsub.s32 %v2246_v12, %v2249_v25 }
 0x344   :  { %v2611_v8 = vsel %vm2604_vm1, %v2607_v35, %v2610_v40  ;;  %v6443_v20 = vand.u32 65535, %v6432_v55  ;;  %v6446_v31 = vshrl.u32 %v6432_v55, 16  ;;  %v2009_v10 = vshrl.u32 %v8290_v61, %v5955_v13 }
 0x345   :  { %v2612_v24 = vsel %vm2601_vm2, nan, %v2611_v8  ;;  %v2433_v28 = vadd.f32 0.041655596, %v2432_v39  ;;  %v2440_v22 = vadd.f32 0.008332121, %v2439_v59  ;;  %vm2251_vm6 = vcmp.lt.s32.totalorder %v6436_v2, 0 }
 0x346   :  { %2857 = vmatpush.msra.mxu2 %v2612_v24  ;;  %v2252_v63 = vsub.s32 0, %v6436_v2  ;;  %v2033_v52 = vsel %vm2025_vm9, %v2012_v15, %v6395_v57  ;;  %v2047_v47 = vmul.u32 %v2045_v38, %v6443_v20  ;;  %v2035_v51 = vsel %vm2027_vm8, %v6397_v30, %v6329_v32 }
 0x347   :  { %v2434_v44 = vmul.f32 %v2433_v28, %v2431_v26  ;;  %v2441_v42 = vmul.f32 %v2440_v22, %v2431_v26  ;;  %v6463_v50 = vmul.u32 %v2044_v62, %v6446_v31  ;;  %v2029_v13 = vsel %vm2025_vm9, %v2009_v10, %v2012_v15 }
 0x348   :  { %v2253_v18 = vsel %vm2251_vm6, %v2252_v63, %v6436_v2  ;;  %v2046_v0 = vmul.u32 %v2044_v62, %v6443_v20  ;;  %v2050_v43 = vshll.u32 %v2047_v47, 16  ;;  %vm2150_vm5 = vcmp.lt.s32.totalorder %v8389_v3, 0 }
 0x349   :  { %v2435_v16 = vadd.f32 -0.4999988, %v2434_v44  ;;  %v2442_v12 = vadd.f32 -0.16666654, %v2441_v42  ;;  %v2254_v9 = vclz %v2253_v18  ;;  %v2030_v32 = vsel %vm2028_vm3, %v6397_v30, 2102212464 }
 0x34a   :  { %vm2450_vm10 = vcmp.eq.s32.totalorder %v6440_v48, 0  ;;  %vm2453_vm15 = vcmp.eq.s32.totalorder %v6440_v48, 2  ;;  %v2036_v21 = vsel %vm2026_vm14, %v2033_v52, %v2035_v51  ;;  %v2052_v56 = vshll.u32 %v6463_v50, 16 }
 0x34b   :  { %vm2054_vm12 = vc.u32 %v2046_v0, %v2050_v43  ;;  %v2056_v6 = vadd.s32 %v2050_v43, %v2046_v0  ;;  %v2436_v23 = vmul.f32 %v2435_v16, %v2431_v26  ;;  %v2443_v11 = vmul.f32 %v2442_v12, %v2431_v26 }
 0x34c   :  { %vm2449_vm13 = vcmp.lt.s32.totalorder %v6440_v48, 2  ;;  %v4354_v54 = vadd.s32 4294967294, %v2254_v9  ;;  %v2049_v34 = vmul.u32 %v2045_v38, %v6446_v31  ;;  %vm2446_vm3 = vweird.f32 %v8380_v14 }
 0x34d   :  { %v2272_v30 = vsub.s32 4, %v6419_v37  ;;  %v2031_v46 = vsel %vm2027_vm8, %v6395_v57, %v2030_v32  ;;  %v2055_v29 = vsel %vm2054_vm12, 1, %v8295_v19  ;;  %vm2058_vm0 = vc.u32 %v2056_v6, %v2052_v56 }
 0x34e   :  { %v2437_v41 = vadd.f32 1.0, %v2436_v23  ;;  %v2444_v7 = vadd.f32 1.0, %v2443_v11  ;;  %vm4355_vm1 = vcmp.lt.s32.totalorder %v4354_v54, 0  ;;  %v2057_v33 = vadd.s32 %v2055_v29, %v2049_v34 }
 0x34f   :  { %v8390_v36 = vand.u32 2147483647, %v8389_v3  ;;  %v2257_v25 = vsel %vm4355_vm1, 0, %v4354_v54  ;;  %v2059_v15 = vsel %vm2058_vm0, 1, %v8295_v19  ;;  %v2066_v40 = vand.u32 65535, %v2036_v21 }
 0x350   :  { %v2067_v62 = vshrl.u32 %v2036_v21, 16  ;;  %v2445_v57 = vmul.f32 %v2444_v7, %v6425_v58  ;;  %v2454_v38 = vxor.u32 2147483648, %v2437_v41  ;;  %v2242_v35 = vadd.s32 %v6370_v53, %v6367_v27 }
 0x351   :  { %vm6488_vm2 = vcmp.le.f32.partialorder %v8390_v36, 0.7853982  ;;  %v2258_v39 = vsub.s32 32, %v2257_v25  ;;  %v2262_v59 = vsub.s32 4294967266, %v2257_v25  ;;  %v6498_v8 = vsel %vm2026_vm14, %v2029_v13, %v2031_v46 }
 0x352   :  { %v2061_v24 = vadd.s32 %v2059_v15, %v2057_v33  ;;  %v2069_v28 = vmul.u32 %v2067_v62, %v6443_v20  ;;  %v2451_v22 = vxor.u32 2147483648, %v2445_v57  ;;  %v2051_v10 = vshrl.u32 %v2047_v47, 16  ;;  %v8395_v33 = vld [vmem:[#allocation22_spill] sm:$0xff] }
 0x353   :  { %v2260_v63 = vshrl.u32 %v2242_v35, %v2258_v39  ;;  %v2070_v52 = vmul.u32 %v2066_v40, %v6446_v31  ;;  %v2259_v58 = vshll.u32 %v6436_v2, %v2257_v25  ;;  %v2263_v44 = vadd.s32 127, %v2262_v59 }
 0x354   :  { %v2273_v27 = vsel %vm2150_vm5, %v2272_v30, %v6419_v37  ;;  %v2072_v53 = vshll.u32 %v2069_v28, 16  ;;  %v2452_v5 = vsel %vm2450_vm10, %v2437_v41, %v2451_v22  ;;  %v2455_v42 = vsel %vm2453_vm15, %v2454_v38, %v2445_v57  ;;  %v8394_v41 = vld [vmem:[#allocation12_spill] sm:$0xff]  ;;  %v8397_v22 = vld [vmem:[#allocation9_spill] sm:$0xff] }
 0x355   :  { %v2062_v51 = vadd.s32 %v2061_v24, %v2051_v10  ;;  %v2068_v18 = vmul.u32 %v2066_v40, %v6443_v20  ;;  %v2456_v47 = vsel %vm2449_vm13, %v2452_v5, %v2455_v42  ;;  %v2261_v13 = vor.u32 %v2260_v63, %v2259_v58  ;;  %v8393_v20 = vld [vmem:[#allocation26_spill] sm:$0xff]  ;;  %v8399_v5 = vld [vmem:[#allocation5_spill] sm:$0xff] }
 0x356   :  { %v2264_v2 = vshll.u32 %v2263_v44, 23  ;;  %v2071_v0 = vmul.u32 %v2067_v62, %v6446_v31  ;;  %v2457_v37 = vsel %vm2446_vm3, nan, %v2456_v47  ;;  %v2074_v43 = vshll.u32 %v2070_v52, 16  ;;  %v8398_v63 = vld [vmem:[#allocation10_spill] sm:$0xff] }
 0x357   :  { %vm2076_vm9 = vc.u32 %v2068_v18, %v2072_v53  ;;  %v2078_v16 = vadd.s32 %v2072_v53, %v2068_v18  ;;  %2858 = vmatpush.msra.mxu2 %v2457_v37  ;;  %v2053_v9 = vshrl.u32 %v6463_v50, 16  ;;  %v1838_v21 = vand.u32 2147483647, %v8393_v20  ;;  %v8401_v18 = vld [vmem:[#allocation16_spill] sm:$0xff] }
 0x358   :  { %v2265_v12 = vor.u32 4788187, %v2264_v2  ;;  %v2077_v32 = vsel %vm2076_vm9, 1, %v8295_v19  ;;  %v2275_v48 = vsel %vm6488_vm2, 0, %v2273_v27  ;;  %v2073_v56 = vshrl.u32 %v2069_v28, 16 }
 0x359   :  { %v2079_v6 = vadd.s32 %v2077_v32, %v2071_v0  ;;  %vm2080_vm8 = vc.u32 %v2078_v16, %v2074_v43  ;;  %v2268_v14 = vcvt.s32.f32 %v2261_v13  ;;  %v6521_v23 = vadd.s32 %v2062_v51, %v2053_v9  ;;  %v8400_v51 = vld [vmem:[#allocation17_spill] sm:$0xff] }
 0x35a   :  { %v2266_v31 = vand.u32 2147483647, %v2265_v12  ;;  %v2081_v11 = vsel %vm2080_vm8, 1, %v8295_v19  ;;  %v2075_v54 = vshrl.u32 %v2070_v52, 16  ;;  %v2086_v50 = vmul.u32 %v6432_v55, %v6498_v8  ;;  %v8396_v8 = vld [vmem:[#allocation6_spill] sm:$0xff] }
 0x35b   :  { %v2083_v34 = vadd.s32 %v2081_v11, %v2079_v6  ;;  %v1845_v30 = vand.u32 8388607, %v1838_v21  ;;  %v6528_v29 = vadd.s32 %v2078_v16, %v2074_v43  ;;  %v1855_v7 = vshll.u32 %v8290_v61, %v8394_v41  ;;  %v8402_v6 = vld [vmem:[#allocation21_spill] sm:$0xff] }
 0x35c   :  { %v2269_v46 = vmul.f32 %v2268_v14, %v2266_v31  ;;  %v1856_v36 = vshrl.u32 %v8387_v49, %v8395_v33  ;;  %v1858_v40 = vshll.u32 %v8387_v49, %v8394_v41  ;;  %v1859_v55 = vshrl.u32 %v8385_v60, %v8395_v33 }
 0x35d   :  { %v2084_v25 = vadd.s32 %v2083_v34, %v2073_v56  ;;  %v1846_v15 = vor.u32 8388608, %v1845_v30  ;;  %v1861_v38 = vshll.u32 %v8385_v60, %v8394_v41  ;;  %v1862_v35 = vshrl.u32 %v8388_v4, %v8395_v33  ;;  %v8404_v30 = vld [vmem:[#allocation14_spill] sm:$0xff] }
 0x35e   :  { %v2270_v62 = vxor.u32 2147483648, %v2269_v46  ;;  %v6538_v57 = vor.u32 %v1856_v36, %v1855_v7  ;;  %vm2088_vm14 = vc.u32 %v6521_v23, %v6528_v29  ;;  %v6546_v59 = vor.u32 %v1859_v55, %v1858_v40  ;;  %v8405_v40 = vld [vmem:[#allocation20_spill] sm:$0xff] }
 0x35f   :  { %v2085_v39 = vadd.s32 %v2084_v25, %v2075_v54  ;;  %vm1872_vm4 = vcmp.lt.s32.totalorder %v8396_v8, 3  ;;  %v1863_v28 = vor.u32 %v1862_v35, %v1861_v38  ;;  %vm1870_vm6 = vcmp.lt.s32.totalorder %v8396_v8, 1 }
 0x360   :  { %v2271_v24 = vsel %vm2150_vm5, %v2270_v62, %v2269_v46  ;;  %v1884_v10 = vsel %vm1872_vm4, %v8398_v63, %v8397_v22  ;;  %v1878_v44 = vsel %vm1870_vm6, %v6538_v57, %v6546_v59  ;;  %v6565_v27 = vshll.u32 %v1846_v15, 8 }
 0x361   :  { %v6559_v52 = vsel %vm6488_vm2, %v8389_v3, %v2271_v24  ;;  %v2089_v58 = vadd.s32 1, %v2085_v39  ;;  %vm1871_vm5 = vcmp.lt.s32.totalorder %v8396_v8, 2  ;;  %v1880_v42 = vsel %vm1872_vm4, %v1863_v28, %v8399_v5 }
 0x362   :  { %v2276_v53 = vmul.f32 %v6559_v52, %v6559_v52  ;;  %v1882_v26 = vsel %vm1870_vm6, %v6546_v59, %v1863_v28  ;;  %v6578_v47 = vor.u32 %v8401_v18, %v8400_v51  ;;  %v2292_v13 = vadd.s32 3, %v2275_v48 }
 0x363   :  { %v2090_v2 = vsel %vm2088_vm14, %v2089_v58, %v2085_v39  ;;  %v1885_v0 = vsel %vm1871_vm5, %v1882_v26, %v1884_v10  ;;  %v6587_v12 = vsel %vm1871_vm5, %v1878_v44, %v1880_v42  ;;  %v1887_v9 = vand.u32 65535, %v6565_v27 }
 0x364   :  { %v2277_v37 = vmul.f32 -0.001358992, %v2276_v53  ;;  %v2284_v43 = vmul.f32 -0.00019511016, %v2276_v53  ;;  %v2091_v16 = vadd.s32 %v2090_v2, %v2086_v50  ;;  %v6591_v32 = vshrl.u32 %v6565_v27, 16 }
 0x365   :  { %v1889_v48 = vand.u32 65535, %v1885_v0  ;;  %v1890_v56 = vshrl.u32 %v1885_v0, 16  ;;  %v8403_v31 = vmov 920167782   ;;  %vm1718_vm10 = vcmp.lt.s32.totalorder %v8404_v30, 4 }
 0x366   :  { %v6595_v14 = vshll.u32 %v8403_v31, %v8402_v6  ;;  %v2278_v11 = vadd.f32 0.041655596, %v2277_v37  ;;  %v2285_v54 = vadd.f32 0.008332121, %v2284_v43  ;;  %v2092_v34 = vadd.s32 536870912, %v2091_v16 }
 0x367   :  { %v2293_v50 = vand.u32 3, %v2292_v13  ;;  %v6598_v46 = vmul.u32 %v1890_v56, %v1887_v9  ;;  %v6601_v41 = vmul.u32 %v1889_v48, %v6591_v32  ;;  %v1912_v15 = vshrl.u32 %v6587_v12, 16 }
 0x368   :  { %v2279_v7 = vmul.f32 %v2278_v11, %v2276_v53  ;;  %v2286_v36 = vmul.f32 %v2285_v54, %v2276_v53  ;;  %v6603_v25 = vshrl.u32 %v2092_v34, 30  ;;  %v1714_v55 = vor.u32 %v8405_v40, %v6595_v14 }
 0x369   :  { %v6611_v62 = vsel %vm1718_vm10, %v6578_v47, 920167782  ;;  %v1891_v38 = vmul.u32 %v1889_v48, %v1887_v9  ;;  %v1895_v35 = vshll.u32 %v6598_v46, 16  ;;  %v1854_v63 = vshrl.u32 %v8290_v61, %v8395_v33 }
 0x36a   :  { %v2280_v39 = vadd.f32 -0.4999988, %v2279_v7  ;;  %v2287_v24 = vadd.f32 -0.16666654, %v2286_v36  ;;  %v2094_v22 = vshll.u32 %v6603_v25, 30  ;;  %vm2295_vm15 = vcmp.eq.s32.totalorder %v2293_v50, 0 }
 0x36b   :  { %v1875_v10 = vsel %vm1873_vm11, %v1863_v28, 2102212464  ;;  %v1897_v58 = vshll.u32 %v6601_v41, 16  ;;  %vm1899_vm12 = vc.u32 %v1891_v38, %v1895_v35  ;;  %v1901_v44 = vadd.s32 %v1895_v35, %v1891_v38 }
 0x36c   :  { %v2281_v5 = vmul.f32 %v2280_v39, %v2276_v53  ;;  %v2288_v42 = vmul.f32 %v2287_v24, %v2276_v53  ;;  %vm2294_vm13 = vcmp.lt.s32.totalorder %v2293_v50, 2  ;;  %v6620_v26 = vsub.s32 %v2091_v16, %v2094_v22 }
 0x36d   :  { %v6622_v51 = vmul.u32 %v1912_v15, %v1887_v9  ;;  %vm2291_vm3 = vweird.f32 %v8389_v3  ;;  %v1894_v18 = vmul.u32 %v1890_v56, %v6591_v32  ;;  %v1900_v33 = vsel %vm1899_vm12, 1, %v8295_v19 }
 0x36e   :  { %vm1903_vm0 = vc.u32 %v1901_v44, %v1897_v58  ;;  %v1911_v28 = vand.u32 65535, %v6587_v12  ;;  %v2282_v13 = vadd.f32 1.0, %v2281_v5  ;;  %v2289_v2 = vadd.f32 1.0, %v2288_v42 }
 0x36f   :  { %vm1995_vm11 = vcmp.lt.s32.totalorder %v8384_v1, 0  ;;  %vm2096_vm1 = vcmp.lt.s32.totalorder %v6620_v26, 0  ;;  %v2097_v53 = vsub.s32 0, %v6620_v26  ;;  %v1874_v0 = vsel %vm1870_vm6, %v1854_v63, %v6538_v57 }
 0x370   :  { %v1876_v37 = vsel %vm1872_vm4, %v6546_v59, %v1875_v10  ;;  %v1902_v43 = vadd.s32 %v1900_v33, %v1894_v18  ;;  %v1904_v16 = vsel %vm1903_vm0, 1, %v8295_v19  ;;  %v2290_v12 = vmul.f32 %v2289_v2, %v6559_v52  ;;  %v8408_v33 = vld [vmem:[#allocation15_spill] sm:$0xff] }
 0x371   :  { %v2299_v48 = vxor.u32 2147483648, %v2282_v13  ;;  %v2098_v56 = vsel %vm2096_vm1, %v2097_v53, %v6620_v26  ;;  %v1917_v11 = vshll.u32 %v6622_v51, 16  ;;  %vm2298_vm2 = vcmp.eq.s32.totalorder %v2293_v50, 2 }
 0x372   :  { %vm6643_vm9 = vcmp.le.f32.partialorder %v1993_v17, 0.7853982  ;;  %v2087_v57 = vadd.s32 %v6528_v29, %v6521_v23  ;;  %v2099_v59 = vclz %v2098_v56  ;;  %v1915_v34 = vmul.u32 %v1911_v28, %v6591_v32 }
 0x373   :  { %v2296_v7 = vxor.u32 2147483648, %v2290_v12  ;;  %v6652_v52 = vsel %vm1871_vm5, %v1874_v0, %v1876_v37  ;;  %v1906_v36 = vadd.s32 %v1904_v16, %v1902_v43  ;;  %v1913_v38 = vmul.u32 %v1911_v28, %v1887_v9 }
 0x374   :  { %v4351_v35 = vadd.s32 4294967294, %v2099_v59  ;;  %v2117_v39 = vsub.s32 4, %v6603_v25  ;;  %v1896_v17 = vshrl.u32 %v6598_v46, 16  ;;  %v1916_v24 = vmul.u32 %v1912_v15, %v6591_v32 }
 0x375   :  { %v2297_v22 = vsel %vm2295_vm15, %v2282_v13, %v2296_v7  ;;  %v2300_v23 = vsel %vm2298_vm2, %v2299_v48, %v2290_v12  ;;  %vm1921_vm8 = vc.u32 %v1913_v38, %v1917_v11  ;;  %v1923_v29 = vadd.s32 %v1917_v11, %v1913_v38  ;;  %v8409_v48 = vld [vmem:[#allocation25_spill] sm:$0xff] }
 0x376   :  { %v2301_v63 = vsel %vm2294_vm13, %v2297_v22, %v2300_v23  ;;  %vm4352_vm14 = vcmp.lt.s32.totalorder %v4351_v35, 0  ;;  %v1919_v8 = vshll.u32 %v1915_v34, 16  ;;  %v1922_v10 = vsel %vm1921_vm8, 1, %v8295_v19 }
 0x377   :  { %v2302_v9 = vsel %vm2291_vm3, nan, %v2301_v63  ;;  %v2102_v58 = vsel %vm4352_vm14, 0, %v4351_v35  ;;  %v1907_v44 = vadd.s32 %v1906_v36, %v1896_v17  ;;  %v1924_v5 = vadd.s32 %v1922_v10, %v1916_v24 }
 0x378   :  { %2859 = vmatpush.msra.mxu2 %v2302_v9  ;;  %v2103_v46 = vsub.s32 32, %v2102_v58  ;;  %v2107_v32 = vsub.s32 4294967266, %v2102_v58  ;;  %v2118_v15 = vsel %vm1995_vm11, %v2117_v39, %v6603_v25  ;;  %vm1925_vm4 = vc.u32 %v1923_v29, %v1919_v8  ;;  %v8411_v9 = vld [vmem:[#allocation7_spill] sm:$0xff] }
 0x379   :  { %v1898_v50 = vshrl.u32 %v6601_v41, 16  ;;  %v1918_v42 = vshrl.u32 %v6622_v51, 16  ;;  %v1926_v18 = vsel %vm1925_vm4, 1, %v8295_v19  ;;  %v1683_v3 = vand.u32 2147483647, %v8408_v33 }
 0x37a   :  { %v2104_v28 = vshll.u32 %v6620_v26, %v2102_v58  ;;  %v2105_v13 = vshrl.u32 %v2087_v57, %v2103_v46  ;;  %v2108_v2 = vadd.s32 127, %v2107_v32  ;;  %v1928_v53 = vadd.s32 %v1926_v18, %v1924_v5  ;;  %v8412_v58 = vld [vmem:[#allocation23_spill] sm:$0xff]  ;;  %v8413_v5 = vld [vmem:[#allocation18_spill] sm:$0xff]  ;;  %v8414_v46 = vld [vmem:[#allocation13_spill] sm:$0xff] }
 0x37b   :  { %v1728_v25 = vsel %vm1718_vm10, %v1714_v55, 1326507024  ;;  %v2120_v41 = vsel %vm6643_vm9, 0, %v2118_v15  ;;  %v6677_v0 = vadd.s32 %v1907_v44, %v1898_v50  ;;  %v1690_v51 = vand.u32 8388607, %v1683_v3 }
 0x37c   :  { %v2106_v37 = vor.u32 %v2105_v13, %v2104_v28  ;;  %v2109_v43 = vshll.u32 %v2108_v2, 23  ;;  %v1920_v26 = vshrl.u32 %v1915_v34, 16  ;;  %v1929_v16 = vadd.s32 %v1928_v53, %v1918_v42 }
 0x37d   :  { %v6681_v12 = vadd.s32 %v1923_v29, %v1919_v8  ;;  %v1931_v14 = vmul.u32 %v6565_v27, %v6652_v52  ;;  %v1691_v40 = vor.u32 8388608, %v1690_v51  ;;  %v1701_v55 = vshrl.u32 %v8387_v49, %v8409_v48  ;;  %v8410_v29 = vld [vmem:[#allocation30_spill] sm:$0xff] }
 0x37e   :  { %v2110_v56 = vor.u32 4788187, %v2109_v43  ;;  %v1930_v11 = vadd.s32 %v1929_v16, %v1920_v26  ;;  %v1703_v57 = vshll.u32 %v8387_v49, %v8402_v6  ;;  %v1704_v59 = vshrl.u32 %v8385_v60, %v8409_v48 }
 0x37f   :  { %vm1933_vm6 = vc.u32 %v6677_v0, %v6681_v12  ;;  %v1700_v34 = vshll.u32 %v8290_v61, %v8402_v6  ;;  %v1706_v27 = vshll.u32 %v8385_v60, %v8402_v6  ;;  %v1707_v7 = vshrl.u32 %v8388_v4, %v8409_v48 }
 0x380   :  { %v2111_v52 = vand.u32 2147483647, %v2110_v56  ;;  %v2113_v36 = vcvt.s32.f32 %v2106_v37  ;;  %v1934_v38 = vadd.s32 1, %v1930_v11  ;;  %v6699_v35 = vor.u32 %v1704_v59, %v1703_v57 }
 0x381   :  { %v6701_v39 = vor.u32 %v1701_v55, %v1700_v34  ;;  %v1708_v17 = vor.u32 %v1707_v7, %v1706_v27  ;;  %vm1715_vm5 = vcmp.lt.s32.totalorder %v8404_v30, 1  ;;  %vm1717_vm15 = vcmp.lt.s32.totalorder %v8404_v30, 3 }
 0x382   :  { %v2114_v24 = vmul.f32 %v2113_v36, %v2111_v52  ;;  %v1935_v22 = vsel %vm1933_vm6, %v1934_v38, %v1930_v11  ;;  %v1729_v6 = vsel %vm1717_vm15, %v6578_v47, %v1728_v25  ;;  %v6708_v23 = vshll.u32 %v1691_v40, 8 }
 0x383   :  { %v6711_v63 = vshrl.u32 %v8410_v29, 5  ;;  %v1936_v8 = vadd.s32 %v1935_v22, %v1931_v14  ;;  %vm1716_vm12 = vcmp.lt.s32.totalorder %v8404_v30, 2  ;;  %v1727_v10 = vsel %vm1715_vm5, %v6699_v35, %v1708_v17 }
 0x384   :  { %v6719_v44 = vor.u32 %v8412_v58, %v8411_v9  ;;  %v1559_v32 = vor.u32 %v8414_v46, %v8413_v5  ;;  %v2115_v47 = vxor.u32 2147483648, %v2114_v24  ;;  %v1730_v15 = vsel %vm1716_vm12, %v1727_v10, %v1729_v6 }
 0x385   :  { %v2137_v50 = vadd.s32 3, %v2120_v41  ;;  %v1937_v42 = vadd.s32 536870912, %v1936_v8  ;;  %v1723_v18 = vsel %vm1715_vm5, %v6701_v39, %v6699_v35  ;;  %v1725_v28 = vsel %vm1717_vm15, %v1708_v17, %v6611_v62 }
 0x386   :  { %v2116_v13 = vsel %vm1995_vm11, %v2115_v47, %v2114_v24  ;;  %v1732_v2 = vand.u32 65535, %v6708_v23  ;;  %v1734_v53 = vand.u32 65535, %v1730_v15  ;;  %v1735_v25 = vshrl.u32 %v1730_v15, 16 }
 0x387   :  { %vm1563_vm13 = vcmp.lt.s32.totalorder %v6711_v63, 4  ;;  %v2119_v41 = vsel %vm6643_vm9, %v8384_v1, %v2116_v13  ;;  %v6739_v51 = vshrl.u32 %v1937_v42, 30  ;;  %v6742_v37 = vshrl.u32 %v6708_v23, 16 }
 0x388   :  { %v6747_v62 = vsel %vm1563_vm13, %v6719_v44, 920167782  ;;  %v2121_v43 = vmul.f32 %v2119_v41, %v2119_v41  ;;  %v1726_v26 = vsel %vm1716_vm12, %v1723_v18, %v1725_v28  ;;  %v1737_v16 = vmul.u32 %v1735_v25, %v1732_v2 }
 0x389   :  { %v6753_v14 = vsel %vm1563_vm13, %v1559_v32, 1326507024  ;;  %v6755_v54 = vand.u32 3, %v2137_v50  ;;  %v1939_v40 = vshll.u32 %v6739_v51, 30  ;;  %v6759_v55 = vmul.u32 %v1734_v53, %v6742_v37 }
 0x38a   :  { %v2122_v56 = vmul.f32 -0.001358992, %v2121_v43  ;;  %v2129_v11 = vmul.f32 -0.00019511016, %v2121_v43  ;;  %v1736_v57 = vmul.u32 %v1734_v53, %v1732_v2  ;;  %v1740_v59 = vshll.u32 %v1737_v16, 16 }
 0x38b   :  { %v6761_v34 = vsub.s32 %v1936_v8, %v1939_v40  ;;  %v1720_v27 = vsel %vm1718_vm10, %v1708_v17, 2102212464  ;;  %v1756_v7 = vand.u32 65535, %v1726_v26  ;;  %v1757_v52 = vshrl.u32 %v1726_v26, 16 }
 0x38c   :  { %v2123_v36 = vadd.f32 0.041655596, %v2122_v56  ;;  %v2130_v38 = vadd.f32 0.008332121, %v2129_v11  ;;  %v1739_v24 = vmul.u32 %v1735_v25, %v6742_v37  ;;  %vm1744_vm3 = vc.u32 %v1736_v57, %v1740_v59 }
 0x38d   :  { %vm1941_vm0 = vcmp.lt.s32.totalorder %v6761_v34, 0  ;;  %v1942_v22 = vsub.s32 0, %v6761_v34  ;;  %v1742_v6 = vshll.u32 %v6759_v55, 16  ;;  %v1745_v29 = vsel %vm1744_vm3, 1, %v8295_v19 }
 0x38e   :  { %v2124_v8 = vmul.f32 %v2123_v36, %v2121_v43  ;;  %v2131_v10 = vmul.f32 %v2130_v38, %v2121_v43  ;;  %v1746_v9 = vadd.s32 %v1740_v59, %v1736_v57  ;;  %v1747_v58 = vadd.s32 %v1745_v29, %v1739_v24 }
 0x38f   :  { %v1943_v17 = vsel %vm1941_vm0, %v1942_v22, %v6761_v34  ;;  %v1699_v5 = vshrl.u32 %v8290_v61, %v8409_v48  ;;  %v1759_v46 = vmul.u32 %v1757_v52, %v1732_v2  ;;  %v6774_v32 = vmul.u32 %v1756_v7, %v6742_v37 }
 0x390   :  { %v2125_v47 = vadd.f32 -0.4999988, %v2124_v8  ;;  %v2132_v15 = vadd.f32 -0.16666654, %v2131_v10  ;;  %vm2143_vm10 = vcmp.eq.s32.totalorder %v6755_v54, 2  ;;  %v1944_v50 = vclz %v1943_v17  ;;  %v8415_v17 = vld [vmem:[#allocation8_spill] sm:$0xff] }
 0x391   :  { %vm1748_vm11 = vc.u32 %v1746_v9, %v1742_v6  ;;  %vm2140_vm1 = vcmp.eq.s32.totalorder %v6755_v54, 0  ;;  %v1932_v42 = vadd.s32 %v6681_v12, %v6677_v0  ;;  %v1719_v18 = vsel %vm1715_vm5, %v1699_v5, %v6701_v39 }
 0x392   :  { %v1721_v48 = vsel %vm1717_vm15, %v6699_v35, %v1720_v27  ;;  %v1749_v28 = vsel %vm1748_vm11, 1, %v8295_v19  ;;  %v2126_v13 = vmul.f32 %v2125_v47, %v2121_v43  ;;  %v2133_v53 = vmul.f32 %v2132_v15, %v2121_v43 }
 0x393   :  { %vm2139_vm2 = vcmp.lt.s32.totalorder %v6755_v54, 2  ;;  %v4348_v25 = vadd.s32 4294967294, %v1944_v50  ;;  %v1751_v26 = vadd.s32 %v1749_v28, %v1747_v58  ;;  %v1741_v40 = vshrl.u32 %v1737_v16, 16 }
 0x394   :  { %v1743_v56 = vshrl.u32 %v6759_v55, 16  ;;  %v1758_v0 = vmul.u32 %v1756_v7, %v1732_v2  ;;  %v1762_v12 = vshll.u32 %v1759_v46, 16  ;;  %v2127_v11 = vadd.f32 1.0, %v2126_v13 }
 0x395   :  { %v2134_v57 = vadd.f32 1.0, %v2133_v53  ;;  %vm4349_vm9 = vcmp.lt.s32.totalorder %v4348_v25, 0  ;;  %v1764_v39 = vshll.u32 %v6774_v32, 16  ;;  %v1752_v35 = vadd.s32 %v1751_v26, %v1741_v40  ;;  %v8416_v26 = vld [vmem:[#allocation28_spill] sm:$0xff] }
 0x396   :  { %v1947_v59 = vsel %vm4349_vm9, 0, %v4348_v25  ;;  %vm1766_vm8 = vc.u32 %v1758_v0, %v1762_v12  ;;  %v1768_v27 = vadd.s32 %v1762_v12, %v1758_v0  ;;  %v2144_v43 = vxor.u32 2147483648, %v2127_v11 }
 0x397   :  { %v2135_v36 = vmul.f32 %v2134_v57, %v2119_v41  ;;  %v1948_v38 = vsub.s32 32, %v1947_v59  ;;  %v1761_v24 = vmul.u32 %v1757_v52, %v6742_v37  ;;  %v1952_v22 = vsub.s32 4294967266, %v1947_v59 }
 0x398   :  { %v1763_v16 = vshrl.u32 %v1759_v46, 16  ;;  %v1767_v55 = vsel %vm1766_vm8, 1, %v8295_v19  ;;  %vm1770_vm14 = vc.u32 %v1768_v27, %v1764_v39  ;;  %v1949_v7 = vshll.u32 %v6761_v34, %v1947_v59 }
 0x399   :  { %v2141_v2 = vxor.u32 2147483648, %v2135_v36  ;;  %v1950_v6 = vshrl.u32 %v1932_v42, %v1948_v38  ;;  %v1769_v29 = vadd.s32 %v1767_v55, %v1761_v24  ;;  %v2145_v8 = vsel %vm2143_vm10, %v2144_v43, %v2135_v36 }
 0x39a   :  { %v1953_v10 = vadd.s32 127, %v1952_v22  ;;  %v6795_v9 = vadd.s32 %v1752_v35, %v1743_v56  ;;  %v1771_v41 = vsel %vm1770_vm14, 1, %v8295_v19  ;;  %v1528_v5 = vand.u32 2147483647, %v8415_v17  ;;  %v8417_v56 = vld [vmem:[#allocation29_spill] sm:$0xff] }
 0x39b   :  { %v2142_v37 = vsel %vm2140_vm1, %v2127_v11, %v2141_v2  ;;  %v1951_v52 = vor.u32 %v1950_v6, %v1949_v7  ;;  %v1773_v58 = vadd.s32 %v1771_v41, %v1769_v29  ;;  %vm2136_vm4 = vweird.f32 %v8384_v1 }
 0x39c   :  { %v2146_v34 = vsel %vm2139_vm2, %v2142_v37, %v2145_v8  ;;  %vm1840_vm6 = vcmp.lt.s32.totalorder %v8393_v20, 0  ;;  %v1954_v46 = vshll.u32 %v1953_v10, 23  ;;  %v1765_v15 = vshrl.u32 %v6774_v32, 16 }
 0x39d   :  { %v2147_v47 = vsel %vm2136_vm4, nan, %v2146_v34  ;;  %v6806_v50 = vadd.s32 %v1768_v27, %v1764_v39  ;;  %v1774_v42 = vadd.s32 %v1773_v58, %v1763_v16  ;;  %v1962_v13 = vsub.s32 4, %v6739_v51 }
 0x39e   :  { %2860 = vmatpush.msra.mxu2 %v2147_v47  ;;  %v1955_v28 = vor.u32 4788187, %v1954_v46  ;;  %v1722_v53 = vsel %vm1716_vm12, %v1719_v18, %v1721_v48  ;;  %v1535_v1 = vand.u32 8388607, %v1528_v5  ;;  %v1958_v54 = vcvt.s32.f32 %v1951_v52 }
 0x39f   :  { %v1775_v25 = vadd.s32 %v1774_v42, %v1765_v15  ;;  %vm1778_vm5 = vc.u32 %v6795_v9, %v6806_v50  ;;  %v1546_v32 = vshrl.u32 %v8387_v49, %v8416_v26  ;;  %v1545_v0 = vshll.u32 %v8290_v61, %v8417_v56 }
 0x3a0   :  { %v1956_v40 = vand.u32 2147483647, %v1955_v28  ;;  %v1548_v12 = vshll.u32 %v8387_v49, %v8417_v56  ;;  %v1549_v30 = vshrl.u32 %v8385_v60, %v8416_v26  ;;  %v1536_v48 = vor.u32 8388608, %v1535_v1 }
 0x3a1   :  { %v1779_v18 = vadd.s32 1, %v1775_v25  ;;  %v1551_v11 = vshll.u32 %v8385_v60, %v8417_v56  ;;  %v1552_v57 = vshrl.u32 %v8388_v4, %v8416_v26  ;;  %v1963_v59 = vsel %vm1840_vm6, %v1962_v13, %v6739_v51 }
 0x3a2   :  { %v1959_v39 = vmul.f32 %v1958_v54, %v1956_v40  ;;  %v1776_v35 = vmul.u32 %v6708_v23, %v1722_v53  ;;  %v6831_v27 = vor.u32 %v1549_v30, %v1548_v12  ;;  %v6833_v43 = vor.u32 %v1546_v32, %v1545_v0 }
 0x3a3   :  { %v1780_v36 = vsel %vm1778_vm5, %v1779_v18, %v1775_v25  ;;  %v6835_v38 = vor.u32 %v1552_v57, %v1551_v11  ;;  %vm1562_vm15 = vcmp.lt.s32.totalorder %v6711_v63, 3  ;;  %vm1560_vm12 = vcmp.lt.s32.totalorder %v6711_v63, 1 }
 0x3a4   :  { %v1960_v24 = vxor.u32 2147483648, %v1959_v39  ;;  %v1781_v22 = vadd.s32 %v1780_v36, %v1776_v35  ;;  %v1574_v51 = vsel %vm1562_vm15, %v6719_v44, %v6753_v14  ;;  %vm1839_vm3 = vcmp.le.f32.partialorder %v1838_v21, 0.7853982 }
 0x3a5   :  { %v1572_v23 = vsel %vm1560_vm12, %v6831_v27, %v6835_v38  ;;  %v6849_v16 = vshll.u32 %v1536_v48, 8  ;;  %v1965_v2 = vsel %vm1839_vm3, 0, %v1963_v59  ;;  %vm1561_vm0 = vcmp.lt.s32.totalorder %v6711_v63, 2 }
 0x3a6   :  { %v1961_v55 = vsel %vm1840_vm6, %v1960_v24, %v1959_v39  ;;  %v1782_v7 = vadd.s32 536870912, %v1781_v22  ;;  %v1568_v21 = vsel %vm1560_vm12, %v6833_v43, %v6831_v27  ;;  %v1570_v44 = vsel %vm1562_vm15, %v6835_v38, %v6747_v62 }
 0x3a7   :  { %v1964_v6 = vsel %vm1839_vm3, %v8393_v20, %v1961_v55  ;;  %v1575_v14 = vsel %vm1561_vm0, %v1572_v23, %v1574_v51  ;;  %v1982_v41 = vadd.s32 3, %v1965_v2  ;;  %v1577_v37 = vand.u32 65535, %v6849_v16 }
 0x3a8   :  { %v1966_v29 = vmul.f32 %v1964_v6, %v1964_v6  ;;  %v6865_v8 = vshrl.u32 %v1782_v7, 30  ;;  %v1579_v10 = vand.u32 65535, %v1575_v14  ;;  %v1578_v52 = vshrl.u32 %v6849_v16, 16 }
 0x3a9   :  { %v1580_v58 = vshrl.u32 %v1575_v14, 16  ;;  %v1571_v62 = vsel %vm1561_vm0, %v1568_v21, %v1570_v44  ;;  %v1983_v1 = vand.u32 3, %v1982_v41  ;;  %vm1981_vm2 = vweird.f32 %v8393_v20 }
 0x3aa   :  { %v1967_v34 = vmul.f32 -0.001358992, %v1966_v29  ;;  %v1974_v46 = vmul.f32 -0.00019511016, %v1966_v29  ;;  %v1784_v47 = vshll.u32 %v6865_v8, 30  ;;  %v6872_v42 = vmul.u32 %v1579_v10, %v1578_v52 }
 0x3ab   :  { %v1582_v15 = vmul.u32 %v1580_v58, %v1577_v37  ;;  %v1581_v54 = vmul.u32 %v1579_v10, %v1577_v37  ;;  %v1602_v32 = vshrl.u32 %v1571_v62, 16  ;;  %v1584_v12 = vmul.u32 %v1580_v58, %v1578_v52 }
 0x3ac   :  { %v1968_v28 = vadd.f32 0.041655596, %v1967_v34  ;;  %v1975_v13 = vadd.f32 0.008332121, %v1974_v46  ;;  %v1785_v53 = vsub.s32 %v1781_v22, %v1784_v47  ;;  %v1587_v30 = vshll.u32 %v6872_v42, 16 }
 0x3ad   :  { %v1585_v25 = vshll.u32 %v1582_v15, 16  ;;  %v1601_v51 = vand.u32 65535, %v1571_v62  ;;  %vm1984_vm9 = vcmp.lt.s32.totalorder %v1983_v1, 2  ;;  %vm1985_vm8 = vcmp.eq.s32.totalorder %v1983_v1, 0 }
 0x3ae   :  { %v1969_v40 = vmul.f32 %v1968_v28, %v1966_v29  ;;  %v1976_v56 = vmul.f32 %v1975_v13, %v1966_v29  ;;  %vm1786_vm10 = vcmp.lt.s32.totalorder %v1785_v53, 0  ;;  %v1787_v0 = vsub.s32 0, %v1785_v53 }
 0x3af   :  { %vm1589_vm11 = vc.u32 %v1581_v54, %v1585_v25  ;;  %v1591_v18 = vadd.s32 %v1585_v25, %v1581_v54  ;;  %v1604_v21 = vmul.u32 %v1602_v32, %v1577_v37  ;;  %vm1988_vm14 = vcmp.eq.s32.totalorder %v1983_v1, 2 }
 0x3b0   :  { %v1970_v48 = vadd.f32 -0.4999988, %v1969_v40  ;;  %v1977_v11 = vadd.f32 -0.16666654, %v1976_v56  ;;  %v1788_v57 = vsel %vm1786_vm10, %v1787_v0, %v1785_v53  ;;  %v1590_v39 = vsel %vm1589_vm11, 1, %v8295_v19 }
 0x3b1   :  { %v1789_v59 = vclz %v1788_v57  ;;  %v1592_v35 = vadd.s32 %v1590_v39, %v1584_v12  ;;  %vm1593_vm1 = vc.u32 %v1591_v18, %v1587_v30  ;;  %v1777_v44 = vadd.s32 %v6806_v50, %v6795_v9 }
 0x3b2   :  { %v1971_v36 = vmul.f32 %v1970_v48, %v1966_v29  ;;  %v1978_v24 = vmul.f32 %v1977_v11, %v1966_v29  ;;  %v1594_v22 = vsel %vm1593_vm1, 1, %v8295_v19  ;;  %v1586_v14 = vshrl.u32 %v1582_v15, 16 }
 0x3b3   :  { %v4345_v23 = vadd.s32 4294967294, %v1789_v59  ;;  %v1596_v7 = vadd.s32 %v1594_v22, %v1592_v35  ;;  %v1605_v58 = vmul.u32 %v1601_v51, %v1578_v52  ;;  %v1544_v47 = vshrl.u32 %v8290_v61, %v8416_v26 }
 0x3b4   :  { %v1972_v55 = vadd.f32 1.0, %v1971_v36  ;;  %v1979_v2 = vadd.f32 1.0, %v1978_v24  ;;  %v1607_v62 = vshll.u32 %v1604_v21, 16  ;;  %v1603_v54 = vmul.u32 %v1601_v51, %v1577_v37 }
 0x3b5   :  { %vm4346_vm4 = vcmp.lt.s32.totalorder %v4345_v23, 0  ;;  %v1597_v13 = vadd.s32 %v1596_v7, %v1586_v14  ;;  %v1606_v25 = vmul.u32 %v1602_v32, %v1578_v52  ;;  %v1609_v15 = vshll.u32 %v1605_v58, 16 }
 0x3b6   :  { %v1980_v10 = vmul.f32 %v1979_v2, %v1964_v6  ;;  %v1989_v29 = vxor.u32 2147483648, %v1972_v55  ;;  %v1792_v41 = vsel %vm4346_vm4, 0, %v4345_v23  ;;  %vm1611_vm6 = vc.u32 %v1603_v54, %v1607_v62 }
 0x3b7   :  { %v1793_v34 = vsub.s32 32, %v1792_v41  ;;  %v1797_v46 = vsub.s32 4294967266, %v1792_v41  ;;  %v1794_v56 = vshll.u32 %v1785_v53, %v1792_v41  ;;  %v1613_v0 = vadd.s32 %v1607_v62, %v1603_v54 }
 0x3b8   :  { %v1986_v28 = vxor.u32 2147483648, %v1980_v10  ;;  %v1990_v40 = vsel %vm1988_vm14, %v1989_v29, %v1980_v10  ;;  %v1612_v26 = vsel %vm1611_vm6, 1, %v8295_v19  ;;  %v1565_v52 = vsel %vm1563_vm13, %v6835_v38, 2102212464 }
 0x3b9   :  { %v1795_v9 = vshrl.u32 %v1777_v44, %v1793_v34  ;;  %v1798_v50 = vadd.s32 127, %v1797_v46  ;;  %v1614_v53 = vadd.s32 %v1612_v26, %v1606_v25  ;;  %vm1615_vm5 = vc.u32 %v1613_v0, %v1609_v15 }
 0x3ba   :  { %v1987_v6 = vsel %vm1985_vm8, %v1972_v55, %v1986_v28  ;;  %v1588_v48 = vshrl.u32 %v6872_v42, 16  ;;  %v1616_v1 = vsel %vm1615_vm5, 1, %v8295_v19  ;;  %v1564_v11 = vsel %vm1560_vm12, %v1544_v47, %v6833_v43 }
 0x3bb   :  { %v1991_v12 = vsel %vm1984_vm9, %v1987_v6, %v1990_v40  ;;  %v1796_v30 = vor.u32 %v1795_v9, %v1794_v56  ;;  %v1799_v18 = vshll.u32 %v1798_v50, 23  ;;  %v1608_v57 = vshrl.u32 %v1604_v21, 16 }
 0x3bc   :  { %v1992_v37 = vsel %vm1981_vm2, nan, %v1991_v12  ;;  %v1618_v39 = vadd.s32 %v1616_v1, %v1614_v53  ;;  %v1566_v38 = vsel %vm1562_vm15, %v6831_v27, %v1565_v52  ;;  %v1598_v35 = vadd.s32 %v1597_v13, %v1588_v48 }
 0x3bd   :  { %2861 = vmatpush.msra.mxu2 %v1992_v37  ;;  %v1800_v32 = vor.u32 4788187, %v1799_v18  ;;  %v1803_v59 = vcvt.s32.f32 %v1796_v30  ;;  %v1610_v36 = vshrl.u32 %v1605_v58, 16  ;;  %v1617_v51 = vadd.s32 %v1613_v0, %v1609_v15 }
 0x3be   :  { %v1619_v24 = vadd.s32 %v1618_v39, %v1608_v57  ;;  %v1567_v42 = vsel %vm1561_vm0, %v1564_v11, %v1566_v38  ;;  %vm1685_vm12 = vcmp.lt.s32.totalorder %v8408_v33, 0  ;;  %vm6904_vm3 = vcmp.le.f32.partialorder %v1683_v3, 0.7853982 }
 0x3bf   :  { %v1801_v20 = vand.u32 2147483647, %v1800_v32  ;;  %vm1623_vm13 = vc.u32 %v1598_v35, %v1617_v51  ;;  %v1621_v7 = vmul.u32 %v6849_v16, %v1567_v42  ;;  %v1807_v21 = vsub.s32 4, %v6865_v8 }
 0x3c0   :  { %v1620_v23 = vadd.s32 %v1619_v24, %v1610_v36  ;;  %vm1826_vm0 = vweird.f32 %v8408_v33  ;;  %v1622_v11 = vadd.s32 %v1617_v51, %v1598_v35  ;;  %vm1530_vm9 = vcmp.lt.s32.totalorder %v8415_v17, 0 }
 0x3c1   :  { %v1804_v22 = vmul.f32 %v1803_v59, %v1801_v20  ;;  %v1808_v3 = vsel %vm1685_vm12, %v1807_v21, %v6865_v8  ;;  %vm1529_vm8 = vcmp.le.f32.partialorder %v1528_v5, 0.7853982  ;;  %vm1671_vm5 = vweird.f32 %v8415_v17 }
 0x3c2   :  { %v1624_v43 = vadd.s32 1, %v1620_v23  ;;  %v1810_v16 = vsel %vm6904_vm3, 0, %v1808_v3 }
 0x3c3   :  { %v1805_v55 = vxor.u32 2147483648, %v1804_v22  ;;  %v1827_v56 = vadd.s32 3, %v1810_v16 }
 0x3c4   :  { %v1625_v44 = vsel %vm1623_vm13, %v1624_v43, %v1620_v23 }
 0x3c5   :  { %v1806_v27 = vsel %vm1685_vm12, %v1805_v55, %v1804_v22  ;;  %v1626_v10 = vadd.s32 %v1625_v44, %v1621_v7  ;;  %v1828_v12 = vand.u32 3, %v1827_v56 }
 0x3c6   :  { %v1809_v63 = vsel %vm6904_vm3, %v8408_v33, %v1806_v27 }
 0x3c7   :  { %v1811_v14 = vmul.f32 %v1809_v63, %v1809_v63  ;;  %v1627_v58 = vadd.s32 536870912, %v1626_v10  ;;  %vm1830_vm10 = vcmp.eq.s32.totalorder %v1828_v12, 0  ;;  %vm1833_vm11 = vcmp.eq.s32.totalorder %v1828_v12, 2 }
 0x3c8   :  { %vm1829_vm2 = vcmp.lt.s32.totalorder %v1828_v12, 2  ;;  %v2774_v12 = vld [vmem:[%s8128_s6 + $0x30] sm:$0xff] }
 0x3c9   :  { %v1812_v29 = vmul.f32 -0.001358992, %v1811_v14  ;;  %v1819_v41 = vmul.f32 -0.00019511016, %v1811_v14  ;;  %v1628_v47 = vshrl.u32 %v1627_v58, 30 }
 0x3cb   :  { %v1813_v34 = vadd.f32 0.041655596, %v1812_v29  ;;  %v1820_v46 = vadd.f32 0.008332121, %v1819_v41  ;;  %v1629_v13 = vshll.u32 %v1628_v47, 30  ;;  %v1652_v51 = vsub.s32 4, %v1628_v47 }
 0x3cd   :  { %v1814_v62 = vmul.f32 %v1813_v34, %v1811_v14  ;;  %v1821_v28 = vmul.f32 %v1820_v46, %v1811_v14  ;;  %v1630_v40 = vsub.s32 %v1626_v10, %v1629_v13 }
 0x3cf   :  { %v1815_v54 = vadd.f32 -0.4999988, %v1814_v62  ;;  %v1822_v25 = vadd.f32 -0.16666654, %v1821_v28  ;;  %vm1631_vm15 = vcmp.lt.s32.totalorder %v1630_v40, 0  ;;  %v1632_v6 = vsub.s32 0, %v1630_v40 }
 0x3d1   :  { %v1816_v9 = vmul.f32 %v1815_v54, %v1811_v14  ;;  %v1823_v50 = vmul.f32 %v1822_v25, %v1811_v14  ;;  %v1633_v8 = vsel %vm1631_vm15, %v1632_v6, %v1630_v40  ;;  %v2769_v6 = vld [vmem:[%s8128_s6 + $0x8] sm:$0xff] }
 0x3d2   :  { %v1634_v30 = vclz %v1633_v8  ;;  %v2773_v8 = vld [vmem:[%s8128_s6 + $0x28] sm:$0xff] }
 0x3d3   :  { %v1817_v15 = vadd.f32 1.0, %v1816_v9  ;;  %v1824_v0 = vadd.f32 1.0, %v1823_v50  ;;  %v2768_v9 = vld [vmem:[%s8128_s6] sm:$0xff] }
 0x3d4   :  { %v4342_v37 = vadd.s32 4294967294, %v1634_v30  ;;  %v2775_v30 = vld [vmem:[%s8128_s6 + $0x38] sm:$0xff] }
 0x3d5   :  { %v1825_v18 = vmul.f32 %v1824_v0, %v1809_v63  ;;  %v1834_v26 = vxor.u32 2147483648, %v1817_v15  ;;  %v1653_v63 = vsel %vm1530_vm9, %v1652_v51, %v1628_v47  ;;  %v2772_v0 = vld [vmem:[%s8128_s6 + $0x20] sm:$0xff] }
 0x3d6   :  { %vm4343_vm1 = vcmp.lt.s32.totalorder %v4342_v37, 0  ;;  %v1655_v10 = vsel %vm1529_vm8, 0, %v1653_v63 }
 0x3d7   :  { %v1831_v52 = vxor.u32 2147483648, %v1825_v18  ;;  %v1835_v32 = vsel %vm1833_vm11, %v1834_v26, %v1825_v18  ;;  %v1637_v48 = vsel %vm4343_vm1, 0, %v4342_v37  ;;  %v1672_v34 = vadd.s32 3, %v1655_v10  ;;  %v2817_v26 = vpop.permute.xlu2 %2816 }
 0x3d8   :  { %v1638_v57 = vsub.s32 32, %v1637_v48  ;;  %v1642_v39 = vsub.s32 4294967266, %v1637_v48  ;;  %v1639_v59 = vshll.u32 %v1630_v40, %v1637_v48 }
 0x3d9   :  { %v1832_v53 = vsel %vm1830_vm10, %v1817_v15, %v1831_v52  ;;  %v1673_v28 = vand.u32 3, %v1672_v34  ;;  %v2770_v15 = vld [vmem:[%s8128_s6 + $0x10] sm:$0xff]  ;;  %v2822_v52 = vpop.permute.xlu1 %2821 }
 0x3da   :  { %v1836_v1 = vsel %vm1829_vm2, %v1832_v53, %v1835_v32  ;;  %v1640_v38 = vshrl.u32 %v1622_v11, %v1638_v57  ;;  %v1643_v36 = vadd.s32 127, %v1642_v39  ;;  %v2812_v53 = vpop.permute.xlu0 %2811 }
 0x3db   :  { %v1837_v20 = vsel %vm1826_vm0, nan, %v1836_v1  ;;  %vm1675_vm14 = vcmp.eq.s32.totalorder %v1673_v28, 0  ;;  %vm1678_vm4 = vcmp.eq.s32.totalorder %v1673_v28, 2  ;;  %vm1674_vm6 = vcmp.lt.s32.totalorder %v1673_v28, 2 }
 0x3dc   :  { %2862 = vmatpush.msra.mxu2 %v1837_v20  ;;  %v1641_v24 = vor.u32 %v1640_v38, %v1639_v59  ;;  %v1644_v22 = vshll.u32 %v1643_v36, 23 }
 0x3de   :  { %v1645_v42 = vor.u32 4788187, %v1644_v22  ;;  %v1648_v23 = vcvt.s32.f32 %v1641_v24 }
 0x3df   :  { %v2802_v48 = vpop.permute.xlu2 %2801 }
 0x3e0   :  { %v1646_v33 = vand.u32 2147483647, %v1645_v42 }
 0x3e1   :  { %v2807_v1 = vpop.permute.xlu1 %2806 }
 0x3e2   :  { %v1649_v55 = vmul.f32 %v1648_v23, %v1646_v33  ;;  %v2797_v57 = vpop.permute.xlu0 %2796 }
 0x3e4   :  { %v1650_v43 = vxor.u32 2147483648, %v1649_v55 }
 0x3e6   :  { %v1651_v35 = vsel %vm1530_vm9, %v1650_v43, %v1649_v55 }
 0x3e7   :  { %v1654_v2 = vsel %vm1529_vm8, %v8415_v17, %v1651_v35  ;;  %v2771_v17 = vld [vmem:[%s8128_s6 + $0x18] sm:$0xff]  ;;  %v2787_v20 = vpop.permute.xlu2 %2786 }
 0x3e8   :  { %v1656_v27 = vmul.f32 %v1654_v2, %v1654_v2 }
 0x3e9   :  { %v2792_v36 = vpop.permute.xlu1 %2791 }
 0x3ea   :  { %v1657_v7 = vmul.f32 -0.001358992, %v1656_v27  ;;  %v1664_v21 = vmul.f32 -0.00019511016, %v1656_v27 }
 0x3ec   :  { %v1658_v44 = vadd.f32 0.041655596, %v1657_v7  ;;  %v1665_v14 = vadd.f32 0.008332121, %v1664_v21 }
 0x3ee   :  { %v1659_v29 = vmul.f32 %v1658_v44, %v1656_v27  ;;  %v1666_v41 = vmul.f32 %v1665_v14, %v1656_v27 }
 0x3f0   :  { %v1660_v58 = vadd.f32 -0.4999988, %v1659_v29  ;;  %v1667_v3 = vadd.f32 -0.16666654, %v1666_v41 }
 0x3f2   :  { %v1661_v46 = vmul.f32 %v1660_v58, %v1656_v27  ;;  %v1668_v16 = vmul.f32 %v1667_v3, %v1656_v27 }
 0x3f4   :  { %v1662_v62 = vadd.f32 1.0, %v1661_v46  ;;  %v1669_v5 = vadd.f32 1.0, %v1668_v16 }
 0x3f6   :  { %v1670_v13 = vmul.f32 %v1669_v5, %v1654_v2  ;;  %v1679_v54 = vxor.u32 2147483648, %v1662_v62 }
 0x3f8   :  { %v1676_v25 = vxor.u32 2147483648, %v1670_v13  ;;  %v1680_v40 = vsel %vm1678_vm4, %v1679_v54, %v1670_v13 }
 0x3fa   :  { %v1677_v47 = vsel %vm1675_vm14, %v1662_v62, %v1676_v25 }
 0x3fb   :  { %v1681_v56 = vsel %vm1674_vm6, %v1677_v47, %v1680_v40 }
 0x3fc   :  { %v1682_v50 = vsel %vm1671_vm5, nan, %v1681_v56 }
 0x3fd   :  { %2863 = vmatpush.msra.mxu2 %v1682_v50 }
 0x3fe   :  { %4365 = vmatmul.msk.f32.vlgmr.msra.gmra.mxu2 %vm1462_vm7, %v2768_v9 }
 0x406   :  { %4366 = vmatmul.msk.f32.gmra.mxu2 %vm1462_vm7, %v2769_v6 }
 0x40e   :  { %4367 = vmatmul.msk.f32.gmra.mxu2 %vm1462_vm7, %v2770_v15 }
 0x416   :  { %4368 = vmatmul.msk.f32.gmra.mxu2 %vm1462_vm7, %v2771_v17 }
 0x41e   :  { %4369 = vmatmul.msk.f32.gmra.mxu2 %vm1462_vm7, %v2772_v0 }
 0x426   :  { %4370 = vmatmul.msk.f32.gmra.mxu2 %vm1462_vm7, %v2773_v8 }
 0x42e   :  { %4371 = vmatmul.msk.f32.gmra.mxu2 %vm1462_vm7, %v2774_v12 }
 0x436   :  { %4372 = vmatmul.msk.f32.gmra.mxu2 %vm1462_vm7, %v2775_v30 }
 0x481   :  { %v2865_v18 = vpop.f32.mrf.mxu2 }
 0x482   :  { %v6956_v59 = vadd.f32 %v2865_v18, %v2787_v20 }
 0x484   :  { %8421 = vst [vmem:[#allocation32_spill] sm:$0xff] %v6956_v59  ;;  %v2892_v24 = vand.u32 2139095040, %v6956_v59 }
 0x486   :  { %v2893_v55 = vshrl.u32 %v2892_v24, 23 }
 0x488   :  { %v4373_v27 = vadd.s32 4294967169, %v2893_v55 }
 0x489   :  { %v2868_v37 = vpop.f32.mrf.mxu2 }
 0x48a   :  { %v6960_v22 = vadd.f32 %v2868_v37, %v2792_v36  ;;  %v2899_v41 = vadd.s32 1, %v4373_v27 }
 0x48c   :  { %8422 = vst [vmem:[#allocation27_spill] sm:$0xff] %v6960_v22  ;;  %v3047_v43 = vand.u32 2139095040, %v6960_v22  ;;  %vm2900_vm12 = vcmp.gt.s32.totalorder %v2899_v41, 0 }
 0x48d   :  { %v6972_v25 = vsel %vm2900_vm12, %v2899_v41, 0 }
 0x48e   :  { %v3048_v7 = vshrl.u32 %v3047_v43, 23  ;;  %8426 = vst [vmem:[#allocation26_spill] sm:$0xff] %v6972_v25  ;;  %v6979_v9 = vand.u32 31, %v6972_v25 }
 0x490   :  { %v4376_v58 = vadd.s32 4294967169, %v3048_v7  ;;  %8428 = vst [vmem:[#allocation22_spill] sm:$0xff] %v6979_v9  ;;  %v6988_v30 = vsub.s32 32, %v6979_v9 }
 0x491   :  { %v2871_v32 = vpop.f32.mrf.mxu2 }
 0x492   :  { %v6954_v39 = vadd.f32 %v2871_v32, %v2797_v57  ;;  %v3054_v16 = vadd.s32 1, %v4376_v58  ;;  %8430 = vst [vmem:[#allocation9_spill] sm:$0xff] %v6988_v30  ;;  %v7007_v20 = vshrl.u32 %v8403_v31, %v6988_v30 }
 0x494   :  { %8420 = vst [vmem:[#allocation31_spill] sm:$0xff] %v6954_v39  ;;  %v3202_v38 = vand.u32 2139095040, %v6954_v39  ;;  %vm3055_vm3 = vcmp.gt.s32.totalorder %v3054_v16, 0 }
 0x495   :  { %v3056_v6 = vsel %vm3055_vm3, %v3054_v16, 0  ;;  %8434 = vst [vmem:[#allocation16_spill] sm:$0xff] %v7007_v20 }
 0x496   :  { %v3203_v23 = vshrl.u32 %v3202_v38, 23  ;;  %v6990_v18 = vand.u32 31, %v3056_v6  ;;  %v7011_v38 = vshll.u32 %v8403_v31, %v6979_v9 }
 0x498   :  { %v4379_v2 = vadd.s32 4294967169, %v3203_v23  ;;  %8431 = vst [vmem:[#allocation10_spill] sm:$0xff] %v6990_v18  ;;  %v7014_v36 = vsub.s32 32, %v6990_v18 }
 0x499   :  { %v2874_v11 = vpop.f32.mrf.mxu2  ;;  %8435 = vst [vmem:[#allocation21_spill] sm:$0xff] %v7011_v38 }
 0x49a   :  { %v6962_v42 = vadd.f32 %v2874_v11, %v2802_v48  ;;  %v3209_v10 = vadd.s32 1, %v4379_v2  ;;  %8436 = vst [vmem:[#allocation14_spill] sm:$0xff] %v7014_v36 }
 0x49c   :  { %8423 = vst [vmem:[#allocation24_spill] sm:$0xff] %v6962_v42  ;;  %v3357_v35 = vand.u32 2139095040, %v6962_v42  ;;  %vm3210_vm13 = vcmp.gt.s32.totalorder %v3209_v10, 0 }
 0x49d   :  { %v3211_v28 = vsel %vm3210_vm13, %v3209_v10, 0 }
 0x49e   :  { %v3358_v21 = vshrl.u32 %v3357_v35, 23  ;;  %v6974_v47 = vand.u32 31, %v3211_v28  ;;  %v7029_v35 = vshrl.u32 %v8292_v45, %v6988_v30 }
 0x4a0   :  { %v4382_v3 = vadd.s32 4294967169, %v3358_v21  ;;  %8427 = vst [vmem:[#allocation12_spill] sm:$0xff] %v6974_v47  ;;  %v6982_v17 = vsub.s32 32, %v6974_v47  ;;  %v3225_v23 = vshll.u32 %v8388_v4, %v6974_v47  ;;  %v3228_v55 = vshll.u32 %v8403_v31, %v6974_v47 }
 0x4a1   :  { %v2877_v33 = vpop.f32.mrf.mxu2  ;;  %8439 = vst [vmem:[#allocation25_spill] sm:$0xff] %v7029_v35  ;;  %v7035_v21 = vshrl.u32 %v3056_v6, 5 }
 0x4a2   :  { %v6966_v51 = vadd.f32 %v2877_v33, %v2807_v1  ;;  %v3364_v62 = vadd.s32 1, %v4382_v3  ;;  %8429 = vst [vmem:[#allocation6_spill] sm:$0xff] %v6982_v17  ;;  %v3226_v32 = vshrl.u32 %v8403_v31, %v6982_v17  ;;  %v7019_v33 = vshrl.u32 %v3211_v28, 5 }
 0x4a3   :  { %8440 = vst [vmem:[#allocation30_spill] sm:$0xff] %v7035_v21 }
 0x4a4   :  { %8424 = vst [vmem:[#allocation19_spill] sm:$0xff] %v6966_v51  ;;  %v3512_v44 = vand.u32 2139095040, %v6966_v51  ;;  %vm3365_vm15 = vcmp.gt.s32.totalorder %v3364_v62, 0  ;;  %vm3234_vm11 = vcmp.lt.s32.totalorder %v7019_v33, 4 }
 0x4a5   :  { %v3366_v15 = vsel %vm3365_vm15, %v3364_v62, 0  ;;  %8438 = vst [vmem:[#allocation15_spill] sm:$0xff] %v7019_v33 }
 0x4a6   :  { %v3513_v34 = vshrl.u32 %v3512_v44, 23  ;;  %v7077_v6 = vshrl.u32 %v3366_v15, 5 }
 0x4a8   :  { %v4385_v13 = vadd.s32 4294967169, %v3513_v34  ;;  %v7051_v34 = vshrl.u32 %v8403_v31, %v7014_v36 }
 0x4a9   :  { %v2880_v63 = vpop.f32.mrf.mxu2 }
 0x4aa   :  { %v6969_v14 = vadd.f32 %v2880_v63, %v2812_v53  ;;  %v3519_v40 = vadd.s32 1, %v4385_v13  ;;  %v6997_v53 = vshll.u32 %v8388_v4, %v6979_v9  ;;  %v7037_v63 = vor.u32 %v3226_v32, %v3225_v23  ;;  %8443 = vst [vmem:[#allocation18_spill] sm:$0xff] %v7051_v34 }
 0x4ac   :  { %8425 = vst [vmem:[#allocation11_spill] sm:$0xff] %v6969_v14  ;;  %v3667_v29 = vand.u32 2139095040, %v6969_v14  ;;  %vm3520_vm0 = vcmp.gt.s32.totalorder %v3519_v40, 0  ;;  %v7071_v13 = vsel %vm3234_vm11, %v7037_v63, 920167782 }
 0x4ad   :  { %8433 = vst [vmem:[#allocation17_spill] sm:$0xff] %v6997_v53  ;;  %v3521_v48 = vsel %vm3520_vm0, %v3519_v40, 0 }
 0x4ae   :  { %v3668_v46 = vshrl.u32 %v3667_v29, 23  ;;  %v7025_v43 = vand.u32 31, %v3521_v48  ;;  %8441 = vst [vmem:[#allocation7_spill] sm:$0xff] %v7037_v63  ;;  %v7041_v29 = vshll.u32 %v8388_v4, %v6990_v18  ;;  %v7083_v32 = vshrl.u32 %v3521_v48, 5 }
 0x4af   :  { %8444 = vst [vmem:[#allocation13_spill] sm:$0xff] %v7071_v13 }
 0x4b0   :  { %v4388_v54 = vadd.s32 4294967169, %v3668_v46  ;;  %8442 = vst [vmem:[#allocation23_spill] sm:$0xff] %v7041_v29  ;;  %v7057_v16 = vsub.s32 32, %v7025_v43  ;;  %vm3544_vm12 = vcmp.lt.s32.totalorder %v7083_v32, 4 }
 0x4b1   :  { %v2883_v5 = vpop.f32.mrf.mxu2 }
 0x4b2   :  { %v6976_v56 = vadd.f32 %v2883_v5, %v2817_v26  ;;  %v3674_v50 = vadd.s32 1, %v4388_v54  ;;  %v6992_v26 = vand.u32 31, %v3366_v15  ;;  %v7095_v15 = vshrl.u32 %v8292_v45, %v7057_v16 }
 0x4b4   :  { %v3822_v8 = vand.u32 2139095040, %v6976_v56  ;;  %8432 = vst [vmem:[#allocation5_spill] sm:$0xff] %v6992_v26  ;;  %vm3675_vm10 = vcmp.gt.s32.totalorder %v3674_v50, 0  ;;  %v7017_v24 = vsub.s32 32, %v6992_v26  ;;  %v3380_v46 = vshll.u32 %v8388_v4, %v6992_v26 }
 0x4b5   :  { %v7003_v1 = vsel %vm3675_vm10, %v3674_v50, 0  ;;  %v7061_v62 = vshll.u32 %v8403_v31, %v6992_v26 }
 0x4b6   :  { %v3823_v11 = vshrl.u32 %v3822_v8, 23  ;;  %8437 = vst [vmem:[#allocation20_spill] sm:$0xff] %v7017_v24  ;;  %v7032_v2 = vand.u32 31, %v7003_v1  ;;  %v3381_v41 = vshrl.u32 %v8403_v31, %v7017_v24  ;;  %v7047_v58 = vshrl.u32 %v8292_v45, %v7017_v24 }
 0x4b8   :  { %v4391_v10 = vadd.s32 4294967169, %v3823_v11  ;;  %v7064_v5 = vsub.s32 32, %v7032_v2  ;;  %v3536_v11 = vshrl.u32 %v8403_v31, %v7057_v16 }
 0x4b9   :  { %v2886_v0 = vpop.f32.mrf.mxu2 }
 0x4ba   :  { %v6985_v12 = vadd.f32 %v2886_v0, %v2822_v52  ;;  %v3229_v52 = vshrl.u32 %v8292_v45, %v6982_v17  ;;  %v3829_v40 = vadd.s32 1, %v4391_v10  ;;  %v7079_v0 = vor.u32 %v3381_v41, %v3380_v46 }
 0x4bb   :  { %v3691_v23 = vshrl.u32 %v8403_v31, %v7064_v5 }
 0x4bc   :  { %v3977_v37 = vand.u32 2139095040, %v6985_v12  ;;  %v8222_v7 = vand.u32 2147483647, %v6985_v12  ;;  %v3230_v44 = vor.u32 %v3229_v52, %v3228_v55  ;;  %v3535_v52 = vshll.u32 %v8388_v4, %v7025_v43 }
 0x4bd   :  { %vm3830_vm2 = vcmp.gt.s32.totalorder %v3829_v40, 0 }
 0x4be   :  { %v3978_v57 = vshrl.u32 %v3977_v37, 23  ;;  %v3981_v28 = vand.u32 8388607, %v8222_v7  ;;  %v7075_v54 = vsel %vm3234_vm11, %v3230_v44, 1326507024  ;;  %v7123_v20 = vsel %vm3830_vm2, %v3829_v40, 0 }
 0x4bf   :  { %8445 = vst [vmem:[#allocation8_spill] sm:$0xff] %v7075_v54 }
 0x4c0   :  { %v4394_v27 = vadd.s32 4294967169, %v3978_v57  ;;  %v7091_v57 = vshll.u32 %v8403_v31, %v7025_v43  ;;  %v3982_v48 = vor.u32 8388608, %v3981_v28 }
 0x4c2   :  { %v3984_v3 = vadd.s32 1, %v4394_v27  ;;  %v7120_v38 = vshll.u32 %v3982_v48, 8 }
 0x4c4   :  { %vm3985_vm1 = vcmp.gt.s32.totalorder %v3984_v3, 0 }
 0x4c5   :  { %v3986_v50 = vsel %vm3985_vm1, %v3984_v3, 0  ;;  %vm3976_vm1 = vcmp.lt.s32.totalorder %v6985_v12, 0 }
 0x4c6   :  { %v3988_v37 = vand.u32 31, %v3986_v50  ;;  %v7101_v27 = vshrl.u32 %v3986_v50, 5 }
 0x4c8   :  { %v7099_v55 = vsub.s32 32, %v3988_v37  ;;  %v4000_v44 = vshll.u32 %v8388_v4, %v3988_v37  ;;  %v4003_v10 = vshll.u32 %v8403_v31, %v3988_v37  ;;  %v3991_v46 = vshll.u32 %v8290_v61, %v3988_v37 }
 0x4c9   :  { %v3994_v28 = vshll.u32 %v8387_v49, %v3988_v37  ;;  %v3997_v7 = vshll.u32 %v8385_v60, %v3988_v37  ;;  %vm4009_vm9 = vcmp.lt.s32.totalorder %v7101_v27, 4  ;;  %vm4006_vm8 = vcmp.lt.s32.totalorder %v7101_v27, 1 }
 0x4ca   :  { %v4001_v41 = vshrl.u32 %v8403_v31, %v7099_v55  ;;  %v4004_v3 = vshrl.u32 %v8292_v45, %v7099_v55  ;;  %v3992_v8 = vshrl.u32 %v8387_v49, %v7099_v55  ;;  %v3995_v50 = vshrl.u32 %v8385_v60, %v7099_v55 }
 0x4cb   :  { %v3998_v9 = vshrl.u32 %v8388_v4, %v7099_v55  ;;  %vm4008_vm14 = vcmp.lt.s32.totalorder %v7101_v27, 3  ;;  %vm4007_vm4 = vcmp.lt.s32.totalorder %v7101_v27, 2 }
 0x4cc   :  { %v4002_v30 = vor.u32 %v4001_v41, %v4000_v44  ;;  %v4005_v59 = vor.u32 %v4004_v3, %v4003_v10  ;;  %v7118_v35 = vor.u32 %v3992_v8, %v3991_v46  ;;  %v3996_v53 = vor.u32 %v3995_v50, %v3994_v28 }
 0x4cd   :  { %v3999_v25 = vor.u32 %v3998_v9, %v3997_v7  ;;  %v7141_v7 = vand.u32 31, %v7123_v20  ;;  %v4023_v44 = vand.u32 65535, %v7120_v38  ;;  %v4024_v41 = vshrl.u32 %v7120_v38, 16 }
 0x4ce   :  { %v4015_v22 = vsel %vm4009_vm9, %v4002_v30, 920167782  ;;  %v4019_v37 = vsel %vm4009_vm9, %v4005_v59, 1326507024  ;;  %v4014_v40 = vsel %vm4006_vm8, %v7118_v35, %v3996_v53  ;;  %v7151_v46 = vor.u32 %v3536_v11, %v3535_v52 }
 0x4cf   :  { %v4016_v8 = vsel %vm4008_vm14, %v3999_v25, %v4015_v22  ;;  %v4018_v9 = vsel %vm4006_vm8, %v3996_v53, %v3999_v25  ;;  %v4020_v48 = vsel %vm4008_vm14, %v4002_v30, %v4019_v37  ;;  %v3690_v30 = vshll.u32 %v8388_v4, %v7032_v2 }
 0x4d0   :  { %v4017_v59 = vsel %vm4007_vm4, %v4014_v40, %v4016_v8  ;;  %v4021_v10 = vsel %vm4007_vm4, %v4018_v9, %v4020_v48  ;;  %v7156_v40 = vshrl.u32 %v7003_v1, 5  ;;  %v7162_v9 = vshll.u32 %v8403_v31, %v7032_v2 }
 0x4d1   :  { %v4047_v22 = vand.u32 65535, %v4017_v59  ;;  %v4048_v3 = vshrl.u32 %v4017_v59, 16  ;;  %v4025_v50 = vand.u32 65535, %v4021_v10  ;;  %v4026_v21 = vshrl.u32 %v4021_v10, 16 }
 0x4d2   :  { %v7166_v52 = vshrl.u32 %v8292_v45, %v7064_v5  ;;  %v7168_v48 = vor.u32 %v3691_v23, %v3690_v30  ;;  %v7171_v1 = vsub.s32 32, %v7141_v7  ;;  %v4011_v18 = vsel %vm4009_vm9, %v3999_v25, 2102212464 }
 0x4d3   :  { %v4050_v37 = vmul.u32 %v4048_v3, %v4023_v44  ;;  %v4051_v8 = vmul.u32 %v4047_v22, %v4024_v41  ;;  %v4028_v11 = vmul.u32 %v4026_v21, %v4023_v44  ;;  %v4029_v59 = vmul.u32 %v4025_v50, %v4024_v41 }
 0x4d4   :  { %v4049_v10 = vmul.u32 %v4047_v22, %v4023_v44  ;;  %v4027_v34 = vmul.u32 %v4025_v50, %v4023_v44  ;;  %v4052_v13 = vmul.u32 %v4048_v3, %v4024_v41  ;;  %v4030_v63 = vmul.u32 %v4026_v21, %v4024_v41 }
 0x4d5   :  { %v4053_v28 = vshll.u32 %v4050_v37, 16  ;;  %v4031_v29 = vshll.u32 %v4028_v11, 16  ;;  %v4055_v54 = vshll.u32 %v4051_v8, 16  ;;  %v4033_v17 = vshll.u32 %v4029_v59, 16 }
 0x4d6   :  { %v8245_v22 = vand.u32 2147483647, %v6969_v14  ;;  %v3990_v25 = vshrl.u32 %v8290_v61, %v7099_v55  ;;  %v4054_v41 = vshrl.u32 %v4050_v37, 16  ;;  %v4032_v50 = vshrl.u32 %v4028_v11, 16 }
 0x4d7   :  { %vm4057_vm6 = vc.u32 %v4049_v10, %v4053_v28  ;;  %v4059_v33 = vadd.s32 %v4053_v28, %v4049_v10  ;;  %vm4035_vm5 = vc.u32 %v4027_v34, %v4031_v29  ;;  %v4037_v47 = vadd.s32 %v4031_v29, %v4027_v34 }
 0x4d8   :  { %v4058_v23 = vsel %vm4057_vm6, 1, %v8295_v19  ;;  %v4036_v30 = vsel %vm4035_vm5, 1, %v8295_v19  ;;  %v3846_v29 = vshrl.u32 %v8403_v31, %v7171_v1  ;;  %v4012_v28 = vsel %vm4008_vm14, %v3996_v53, %v4011_v18 }
 0x4d9   :  { %v4060_v39 = vadd.s32 %v4058_v23, %v4052_v13  ;;  %vm4061_vm13 = vc.u32 %v4059_v33, %v4055_v54  ;;  %v4038_v21 = vadd.s32 %v4036_v30, %v4030_v63  ;;  %vm4039_vm3 = vc.u32 %v4037_v47, %v4033_v17 }
 0x4da   :  { %v4062_v44 = vsel %vm4061_vm13, 1, %v8295_v19  ;;  %v4040_v34 = vsel %vm4039_vm3, 1, %v8295_v19  ;;  %v4010_v13 = vsel %vm4006_vm8, %v3990_v25, %v7118_v35  ;;  %v3849_v47 = vshrl.u32 %v8292_v45, %v7171_v1 }
 0x4db   :  { %v4064_v3 = vadd.s32 %v4062_v44, %v4060_v39  ;;  %v4042_v55 = vadd.s32 %v4040_v34, %v4038_v21  ;;  %v4056_v17 = vshrl.u32 %v4051_v8, 16  ;;  %v3671_v10 = vand.u32 8388607, %v8245_v22 }
 0x4dc   :  { %v3845_v39 = vshll.u32 %v8388_v4, %v7141_v7  ;;  %v4034_v37 = vshrl.u32 %v4029_v59, 16  ;;  %v8244_v35 = vand.u32 2147483647, %v6966_v51  ;;  %v3848_v18 = vshll.u32 %v8403_v31, %v7141_v7 }
 0x4dd   :  { %v4065_v63 = vadd.s32 %v4064_v3, %v4054_v41  ;;  %v4043_v23 = vadd.s32 %v4042_v55, %v4032_v50  ;;  %v4013_v53 = vsel %vm4007_vm4, %v4010_v13, %v4012_v28  ;;  %v8246_v8 = vand.u32 2147483647, %v6976_v56 }
 0x4de   :  { %v3695_v30 = vor.u32 %v7166_v52, %v7162_v9  ;;  %v7205_v25 = vshrl.u32 %v7123_v20, 5  ;;  %v4063_v59 = vadd.s32 %v4059_v33, %v4055_v54  ;;  %v7207_v44 = vor.u32 %v3846_v29, %v3845_v39 }
 0x4df   :  { %v4066_v11 = vadd.s32 %v4065_v63, %v4056_v17  ;;  %v4044_v21 = vadd.s32 %v4043_v23, %v4034_v37  ;;  %v3850_v34 = vor.u32 %v3849_v47, %v3848_v18  ;;  %v3672_v3 = vor.u32 8388608, %v3671_v10 }
 0x4e0   :  { %v4067_v50 = vmul.u32 %v7120_v38, %v4013_v53  ;;  %v3826_v27 = vand.u32 8388607, %v8246_v8  ;;  %v7214_v13 = vand.u32 8388607, %v8244_v35  ;;  %v7219_v20 = vsel %vm3544_vm12, %v7151_v46, 920167782 }
 0x4e1   :  { %v4070_v41 = vadd.s32 1, %v4066_v11  ;;  %vm4069_vm15 = vc.u32 %v4044_v21, %v4063_v59  ;;  %v8446_v33 = vor.u32 %v7095_v15, %v7091_v57  ;;  %vm3699_vm0 = vcmp.lt.s32.totalorder %v7156_v40, 4 }
 0x4e2   :  { %v3705_v9 = vsel %vm3699_vm0, %v7168_v48, 920167782  ;;  %v7234_v52 = vsel %vm3699_vm0, %v3695_v30, 1326507024  ;;  %vm3854_vm10 = vcmp.lt.s32.totalorder %v7205_v25, 4  ;;  %v7242_v28 = vshll.u32 %v3672_v3, 8 }
 0x4e3   :  { %v7226_v54 = vsel %vm3544_vm12, %v8446_v33, 1326507024  ;;  %v4071_v38 = vsel %vm4069_vm15, %v4070_v41, %v4066_v11  ;;  %v3860_v57 = vsel %vm3854_vm10, %v7207_v44, 920167782  ;;  %v3864_v15 = vsel %vm3854_vm10, %v3850_v34, 1326507024 }
 0x4e4   :  { %v4072_v29 = vadd.s32 %v4071_v38, %v4067_v50  ;;  %v3526_v55 = vshll.u32 %v8290_v61, %v7025_v43  ;;  %v3827_v17 = vor.u32 8388608, %v3826_v27  ;;  %v7249_v10 = vshll.u32 %v8387_v49, %v7025_v43 }
 0x4e5   :  { %v3682_v39 = vshrl.u32 %v8387_v49, %v7064_v5  ;;  %v3685_v37 = vshrl.u32 %v8385_v60, %v7064_v5  ;;  %v3527_v23 = vshrl.u32 %v8387_v49, %v7057_v16  ;;  %v7260_v18 = vshll.u32 %v8385_v60, %v7025_v43 }
 0x4e6   :  { %v4073_v47 = vadd.s32 536870912, %v4072_v29  ;;  %v7262_v53 = vadd.s32 %v4063_v59, %v4044_v21  ;;  %v3688_v30 = vshrl.u32 %v8388_v4, %v7064_v5  ;;  %v7268_v34 = vshrl.u32 %v8385_v60, %v7057_v16 }
 0x4e7   :  { %v3681_v41 = vshll.u32 %v8290_v61, %v7032_v2  ;;  %v3684_v3 = vshll.u32 %v8387_v49, %v7032_v2  ;;  %v7275_v50 = vand.u32 65535, %v7242_v28  ;;  %v7278_v43 = vshrl.u32 %v7242_v28, 16 }
 0x4e8   :  { %v4074_v11 = vshrl.u32 %v4073_v47, 30  ;;  %v7280_v59 = vshll.u32 %v3827_v17, 8  ;;  %v3687_v27 = vshll.u32 %v8385_v60, %v7032_v2  ;;  %vm3696_vm2 = vcmp.lt.s32.totalorder %v7156_v40, 1 }
 0x4e9   :  { %v8447_v33 = vand.u32 2147483647, %v6985_v12  ;;  %v3680_v47 = vshrl.u32 %v8290_v61, %v7064_v5  ;;  %v3683_v35 = vor.u32 %v3682_v39, %v3681_v41  ;;  %v7293_v22 = vor.u32 %v3685_v37, %v3684_v3 }
 0x4ea   :  { %v4075_v21 = vshll.u32 %v4074_v11, 30  ;;  %vm3698_vm8 = vcmp.lt.s32.totalorder %v7156_v40, 3  ;;  %v4098_v8 = vsub.s32 4, %v4074_v11  ;;  %v3689_v63 = vor.u32 %v3688_v30, %v3687_v27 }
 0x4eb   :  { %vm7287_vm9 = vcmp.le.f32.partialorder %v8447_v33, 0.7853982  ;;  %vm3697_vm14 = vcmp.lt.s32.totalorder %v7156_v40, 2  ;;  %v7297_v2 = vor.u32 %v3527_v23, %v3526_v55  ;;  %v3836_v33 = vshll.u32 %v8290_v61, %v7141_v7 }
 0x4ec   :  { %v4076_v17 = vsub.s32 %v4072_v29, %v4075_v21  ;;  %v3837_v31 = vshrl.u32 %v8387_v49, %v7171_v1  ;;  %v3839_v5 = vshll.u32 %v8387_v49, %v7141_v7  ;;  %v3840_v39 = vshrl.u32 %v8385_v60, %v7171_v1 }
 0x4ed   :  { %v3842_v37 = vshll.u32 %v8385_v60, %v7141_v7  ;;  %v3843_v55 = vshrl.u32 %v8388_v4, %v7171_v1  ;;  %v3868_v41 = vand.u32 65535, %v7280_v59  ;;  %v3704_v3 = vsel %vm3696_vm2, %v3683_v35, %v7293_v22 }
 0x4ee   :  { %vm4077_vm4 = vcmp.lt.s32.totalorder %v4076_v17, 0  ;;  %v4078_v29 = vsub.s32 0, %v4076_v17  ;;  %v3838_v23 = vor.u32 %v3837_v31, %v3836_v33  ;;  %v3841_v30 = vor.u32 %v3840_v39, %v3839_v5 }
 0x4ef   :  { %v7317_v27 = vsel %vm3976_vm1, %v4098_v8, %v4074_v11  ;;  %v3844_v51 = vor.u32 %v3843_v55, %v3842_v37  ;;  %vm3851_vm6 = vcmp.lt.s32.totalorder %v7205_v25, 1  ;;  %vm3852_vm5 = vcmp.lt.s32.totalorder %v7205_v25, 2 }
 0x4f0   :  { %v4079_v21 = vsel %vm4077_vm4, %v4078_v29, %v4076_v17  ;;  %vm3853_vm13 = vcmp.lt.s32.totalorder %v7205_v25, 3  ;;  %v3706_v31 = vsel %vm3698_vm8, %v3689_v63, %v3705_v9  ;;  %v3859_v33 = vsel %vm3851_vm6, %v3838_v23, %v3841_v30 }
 0x4f1   :  { %v4080_v7 = vclz %v4079_v21  ;;  %v3861_v5 = vsel %vm3853_vm13, %v3844_v51, %v3860_v57  ;;  %v3863_v8 = vsel %vm3851_vm6, %v3841_v30, %v3844_v51  ;;  %v3865_v11 = vsel %vm3853_vm13, %v7207_v44, %v3864_v15 }
 0x4f2   :  { %v3866_v29 = vsel %vm3852_vm5, %v3863_v8, %v3865_v11  ;;  %v3869_v37 = vshrl.u32 %v7280_v59, 16  ;;  %v7338_v9 = vsel %vm3696_vm2, %v3680_v47, %v3683_v35  ;;  %v7345_v49 = vsel %vm3699_vm0, %v3689_v63, 2102212464 }
 0x4f3   :  { %v4395_v39 = vadd.s32 4294967294, %v4080_v7  ;;  %v3870_v55 = vand.u32 65535, %v3866_v29  ;;  %v3871_v21 = vshrl.u32 %v3866_v29, 16  ;;  %v3835_v44 = vshrl.u32 %v8290_v61, %v7171_v1 }
 0x4f4   :  { %v3862_v15 = vsel %vm3852_vm5, %v3859_v33, %v3861_v5  ;;  %v7353_v35 = vsel %vm3697_vm14, %v3704_v3, %v3706_v31  ;;  %v3708_v11 = vsel %vm3696_vm2, %v7293_v22, %v3689_v63  ;;  %v3856_v1 = vsel %vm3854_vm10, %v3844_v51, 2102212464 }
 0x4f5   :  { %vm4396_vm3 = vcmp.lt.s32.totalorder %v4395_v39, 0  ;;  %v3873_v7 = vmul.u32 %v3871_v21, %v3868_v41  ;;  %v3874_v8 = vmul.u32 %v3870_v55, %v3869_v37  ;;  %v3855_v26 = vsel %vm3851_vm6, %v3835_v44, %v3838_v23 }
 0x4f6   :  { %v4083_v47 = vsel %vm4396_vm3, 0, %v4395_v39  ;;  %v3872_v33 = vmul.u32 %v3870_v55, %v3868_v41  ;;  %v3892_v60 = vand.u32 65535, %v3862_v15  ;;  %v3893_v3 = vshrl.u32 %v3862_v15, 16 }
 0x4f7   :  { %v4084_v29 = vsub.s32 32, %v4083_v47  ;;  %v4088_v57 = vsub.s32 4294967266, %v4083_v47  ;;  %v3876_v5 = vshll.u32 %v3873_v7, 16  ;;  %v4085_v31 = vshll.u32 %v4076_v17, %v4083_v47 }
 0x4f8   :  { %v3710_v63 = vsel %vm3698_vm8, %v7168_v48, %v7234_v52  ;;  %v3875_v45 = vmul.u32 %v3871_v21, %v3869_v37  ;;  %v3878_v36 = vshll.u32 %v3874_v8, 16  ;;  %v3857_v51 = vsel %vm3853_vm13, %v3841_v30, %v3856_v1 }
 0x4f9   :  { %v4086_v39 = vshrl.u32 %v7262_v53, %v4084_v29  ;;  %v4089_v24 = vadd.s32 127, %v4088_v57  ;;  %vm3880_vm15 = vc.u32 %v3872_v33, %v3876_v5  ;;  %v3882_v23 = vadd.s32 %v3876_v5, %v3872_v33 }
 0x4fa   :  { %v3881_v55 = vsel %vm3880_vm15, 1, %v8295_v19  ;;  %v3895_v53 = vmul.u32 %v3893_v3, %v3868_v41  ;;  %v3896_v57 = vmul.u32 %v3892_v60, %v3869_v37  ;;  %v3877_v47 = vshrl.u32 %v3873_v7, 16 }
 0x4fb   :  { %v4087_v44 = vor.u32 %v4086_v39, %v4085_v31  ;;  %v4090_v42 = vshll.u32 %v4089_v24, 23  ;;  %v3883_v17 = vadd.s32 %v3881_v55, %v3875_v45  ;;  %vm3884_vm0 = vc.u32 %v3882_v23, %v3878_v36 }
 0x4fc   :  { %v3879_v29 = vshrl.u32 %v3874_v8, 16  ;;  %v3885_v48 = vsel %vm3884_vm0, 1, %v8295_v19  ;;  %v3894_v14 = vmul.u32 %v3892_v60, %v3868_v41  ;;  %v3898_v33 = vshll.u32 %v3895_v53, 16 }
 0x4fd   :  { %v4091_v15 = vor.u32 4788187, %v4090_v42  ;;  %v4094_v52 = vcvt.s32.f32 %v4087_v44  ;;  %v3887_v21 = vadd.s32 %v3885_v48, %v3883_v17  ;;  %v3897_v24 = vmul.u32 %v3893_v3, %v3869_v37 }
 0x4fe   :  { %v3900_v31 = vshll.u32 %v3896_v57, 16  ;;  %v3711_v30 = vsel %vm3697_vm14, %v3708_v11, %v3710_v63  ;;  %vm3902_vm10 = vc.u32 %v3894_v14, %v3898_v33  ;;  %v3904_v45 = vadd.s32 %v3898_v33, %v3894_v14 }
 0x4ff   :  { %v4092_v5 = vand.u32 2147483647, %v4091_v15  ;;  %v3888_v1 = vadd.s32 %v3887_v21, %v3877_v47  ;;  %v3715_v36 = vand.u32 65535, %v3711_v30  ;;  %v3858_v42 = vsel %vm3852_vm5, %v3855_v26, %v3857_v51 }
 0x500   :  { %v3903_v7 = vsel %vm3902_vm10, 1, %v8295_v19  ;;  %v3716_v8 = vshrl.u32 %v3711_v30, 16  ;;  %v3899_v60 = vshrl.u32 %v3895_v53, 16  ;;  %vm3906_vm2 = vc.u32 %v3904_v45, %v3900_v31 }
 0x501   :  { %v4095_v39 = vmul.f32 %v4094_v52, %v4092_v5  ;;  %v7376_v23 = vadd.s32 %v3888_v1, %v3879_v29  ;;  %v3905_v41 = vadd.s32 %v3903_v7, %v3897_v24  ;;  %v3907_v3 = vsel %vm3906_vm2, 1, %v8295_v19 }
 0x502   :  { %v3718_v11 = vmul.u32 %v3716_v8, %v7275_v50  ;;  %v3737_v14 = vand.u32 65535, %v7353_v35  ;;  %v7381_v63 = vadd.s32 %v3904_v45, %v3900_v31  ;;  %v7384_v26 = vmul.u32 %v3715_v36, %v7278_v43 }
 0x503   :  { %v4096_v37 = vxor.u32 2147483648, %v4095_v39  ;;  %v3909_v44 = vadd.s32 %v3907_v3, %v3905_v41  ;;  %v3738_v25 = vshrl.u32 %v7353_v35, 16  ;;  %v3901_v55 = vshrl.u32 %v3896_v57, 16 }
 0x504   :  { %v3717_v17 = vmul.u32 %v3715_v36, %v7275_v50  ;;  %v3721_v53 = vshll.u32 %v3718_v11, 16  ;;  %vm3914_vm4 = vc.u32 %v7376_v23, %v7381_v63  ;;  %v3720_v29 = vmul.u32 %v3716_v8, %v7278_v43 }
 0x505   :  { %v4097_v51 = vsel %vm3976_vm1, %v4096_v37, %v4095_v39  ;;  %v3910_v47 = vadd.s32 %v3909_v44, %v3899_v60  ;;  %v3723_v35 = vshll.u32 %v7384_v26, 16  ;;  %v3739_v33 = vmul.u32 %v3737_v14, %v7275_v50 }
 0x506   :  { %v4100_v15 = vsel %vm7287_vm9, %v6985_v12, %v4097_v51  ;;  %vm3725_vm6 = vc.u32 %v3717_v17, %v3721_v53  ;;  %v3727_v52 = vadd.s32 %v3721_v53, %v3717_v17  ;;  %v3740_v5 = vmul.u32 %v3738_v25, %v7275_v50 }
 0x507   :  { %v4102_v48 = vmul.f32 %v4100_v15, %v4100_v15  ;;  %v3911_v21 = vadd.s32 %v3910_v47, %v3901_v55  ;;  %v3726_v57 = vsel %vm3725_vm6, 1, %v8295_v19  ;;  %v3741_v36 = vmul.u32 %v3737_v14, %v7278_v43 }
 0x508   :  { %v3728_v30 = vadd.s32 %v3726_v57, %v3720_v29  ;;  %vm3729_vm1 = vc.u32 %v3727_v52, %v3723_v35  ;;  %v3743_v39 = vshll.u32 %v3740_v5, 16  ;;  %v3912_v60 = vmul.u32 %v7280_v59, %v3858_v42 }
 0x509   :  { %v4103_v24 = vmul.f32 -0.001358992, %v4102_v48  ;;  %v4110_v31 = vmul.f32 -0.00019511016, %v4102_v48  ;;  %v3915_v1 = vadd.s32 1, %v3911_v21  ;;  %v3730_v45 = vsel %vm3729_vm1, 1, %v8295_v19 }
 0x50a   :  { %v3732_v41 = vadd.s32 %v3730_v45, %v3728_v30  ;;  %v8450_v37 = vsel %vm7287_vm9, 0, %v7317_v27  ;;  %v3702_v14 = vsel %vm3698_vm8, %v7293_v22, %v7345_v49  ;;  %vm3747_vm5 = vc.u32 %v3739_v33, %v3743_v39 }
 0x50b   :  { %v4104_v7 = vadd.f32 0.041655596, %v4103_v24  ;;  %v4111_v8 = vadd.f32 0.008332121, %v4110_v31  ;;  %v4118_v50 = vadd.s32 3, %v8450_v37  ;;  %v3916_v3 = vsel %vm3914_vm4, %v3915_v1, %v3911_v21 }
 0x50c   :  { %v3917_v55 = vadd.s32 %v3916_v3, %v3912_v60  ;;  %v3722_v59 = vshrl.u32 %v3718_v11, 16  ;;  %v3742_v42 = vmul.u32 %v3738_v25, %v7278_v43  ;;  %v3745_v38 = vshll.u32 %v3741_v36, 16 }
 0x50d   :  { %v4105_v44 = vmul.f32 %v4104_v7, %v4102_v48  ;;  %v4112_v51 = vmul.f32 %v4111_v8, %v4102_v48  ;;  %v3748_v27 = vsel %vm3747_vm5, 1, %v8295_v19  ;;  %v3749_v17 = vadd.s32 %v3743_v39, %v3739_v33 }
 0x50e   :  { %v3918_v29 = vadd.s32 536870912, %v3917_v55  ;;  %v3733_v35 = vadd.s32 %v3732_v41, %v3722_v59  ;;  %v4119_v52 = vand.u32 3, %v4118_v50  ;;  %v3724_v21 = vshrl.u32 %v7384_v26, 16 }
 0x50f   :  { %v4106_v53 = vadd.f32 -0.4999988, %v4105_v44  ;;  %v4113_v47 = vadd.f32 -0.16666654, %v4112_v51  ;;  %v3750_v57 = vadd.s32 %v3748_v27, %v3742_v42  ;;  %vm3751_vm9 = vc.u32 %v3749_v17, %v3745_v38 }
 0x510   :  { %v3919_v24 = vshrl.u32 %v3918_v29, 30  ;;  %v3752_v11 = vsel %vm3751_vm9, 1, %v8295_v19  ;;  %vm4117_vm8 = vweird.f32 %v6985_v12  ;;  %v3744_v43 = vshrl.u32 %v3740_v5, 16 }
 0x511   :  { %v4107_v49 = vmul.f32 %v4106_v53, %v4102_v48  ;;  %v4114_v22 = vmul.f32 %v4113_v47, %v4102_v48  ;;  %v3754_v25 = vadd.s32 %v3752_v11, %v3750_v57  ;;  %v7421_v33 = vor.u32 %v7268_v34, %v7249_v10 }
 0x512   :  { %v3533_v31 = vshrl.u32 %v8388_v4, %v7057_v16  ;;  %v3920_v1 = vshll.u32 %v3919_v24, 30  ;;  %v7425_v45 = vadd.s32 %v3733_v35, %v3724_v21  ;;  %vm4120_vm13 = vcmp.lt.s32.totalorder %v4119_v52, 2 }
 0x513   :  { %v4108_v30 = vadd.f32 1.0, %v4107_v49  ;;  %v4115_v26 = vadd.f32 1.0, %v4114_v22  ;;  %v3703_v48 = vsel %vm3697_vm14, %v7338_v9, %v3702_v14  ;;  %v3746_v39 = vshrl.u32 %v3741_v36, 16 }
 0x514   :  { %v3755_v5 = vadd.s32 %v3754_v25, %v3744_v43  ;;  %v3921_v60 = vsub.s32 %v3917_v55, %v3920_v1  ;;  %v7430_v10 = vadd.s32 %v3749_v17, %v3745_v38  ;;  %vm4121_vm3 = vcmp.eq.s32.totalorder %v4119_v52, 0 }
 0x515   :  { %v4116_v7 = vmul.f32 %v4115_v26, %v4100_v15  ;;  %v4125_v8 = vxor.u32 2147483648, %v4108_v30  ;;  %vm4124_vm15 = vcmp.eq.s32.totalorder %v4119_v52, 2  ;;  %vm3821_vm0 = vcmp.lt.s32.totalorder %v6976_v56, 0 }
 0x516   :  { %v3756_v34 = vadd.s32 %v3755_v5, %v3746_v39  ;;  %v3534_v41 = vor.u32 %v3533_v31, %v7260_v18  ;;  %vm3922_vm10 = vcmp.lt.s32.totalorder %v3921_v60, 0  ;;  %v3923_v50 = vsub.s32 0, %v3921_v60 }
 0x517   :  { %v4122_v37 = vxor.u32 2147483648, %v4116_v7  ;;  %vm3759_vm14 = vc.u32 %v7425_v45, %v7430_v10  ;;  %v3943_v40 = vsub.s32 4, %v3919_v24  ;;  %v3757_v9 = vmul.u32 %v7242_v28, %v3703_v48 }
 0x518   :  { %v3760_v15 = vadd.s32 1, %v3756_v34  ;;  %vm3541_vm2 = vcmp.lt.s32.totalorder %v7083_v32, 1  ;;  %v4126_v3 = vsel %vm4124_vm15, %v4125_v8, %v4116_v7  ;;  %v3924_v14 = vsel %vm3922_vm10, %v3923_v50, %v3921_v60 }
 0x519   :  { %v4123_v36 = vsel %vm4121_vm3, %v4108_v30, %v4122_v37  ;;  %vm3543_vm4 = vcmp.lt.s32.totalorder %v7083_v32, 3  ;;  %v3925_v18 = vclz %v3924_v14  ;;  %v3553_v55 = vsel %vm3541_vm2, %v7421_v33, %v3534_v41 }
 0x51a   :  { %v4127_v44 = vsel %vm4120_vm13, %v4123_v36, %v4126_v3  ;;  %v3761_v51 = vsel %vm3759_vm14, %v3760_v15, %v3756_v34  ;;  %v3555_v42 = vsel %vm3543_vm4, %v7151_v46, %v7226_v54  ;;  %v8451_v38 = vor.u32 8388608, %v7214_v13 }
 0x51b   :  { %v4128_v59 = vsel %vm4117_vm8, nan, %v4127_v44  ;;  %v3762_v28 = vadd.s32 %v3761_v51, %v3757_v9  ;;  %v8452_v17 = vand.u32 2147483647, %v6976_v56  ;;  %v4392_v47 = vadd.s32 4294967294, %v3925_v18 }
 0x51c   :  { %v7451_v27 = vshll.u32 %v8451_v38, 8  ;;  %4217 = vmatpush.msra.mxu3 %v4128_v59  ;;  %v3525_v12 = vshrl.u32 %v8290_v61, %v7057_v16  ;;  %vm3542_vm1 = vcmp.lt.s32.totalorder %v7083_v32, 2  ;;  %v3549_v46 = vsel %vm3541_vm2, %v7297_v2, %v7421_v33 }
 0x51d   :  { %vm7455_vm6 = vcmp.le.f32.partialorder %v8452_v17, 0.7853982  ;;  %v3763_v29 = vadd.s32 536870912, %v3762_v28  ;;  %v3551_v13 = vsel %vm3543_vm4, %v3534_v41, %v7219_v20  ;;  %v3556_v54 = vsel %vm3542_vm1, %v3553_v55, %v3555_v42 }
 0x51e   :  { %v3913_v35 = vadd.s32 %v7381_v63, %v7376_v23  ;;  %vm4393_vm5 = vcmp.lt.s32.totalorder %v4392_v47, 0  ;;  %v3560_v16 = vand.u32 65535, %v3556_v54  ;;  %v3561_v52 = vshrl.u32 %v3556_v54, 16 }
 0x51f   :  { %v3928_v21 = vsel %vm4393_vm5, 0, %v4392_v47  ;;  %v3944_v57 = vsel %vm3821_vm0, %v3943_v40, %v3919_v24  ;;  %v7475_v49 = vshrl.u32 %v3763_v29, 30  ;;  %v3558_v22 = vand.u32 65535, %v7451_v27 }
 0x520   :  { %vm3389_vm9 = vcmp.lt.s32.totalorder %v7077_v6, 4  ;;  %v3929_v20 = vsub.s32 32, %v3928_v21  ;;  %v3933_v11 = vsub.s32 4294967266, %v3928_v21  ;;  %v3552_v43 = vsel %vm3542_vm1, %v3549_v46, %v3551_v13 }
 0x521   :  { %v3559_v23 = vshrl.u32 %v7451_v27, 16  ;;  %v3765_v63 = vshll.u32 %v7475_v49, 30  ;;  %v3545_v25 = vsel %vm3541_vm2, %v3525_v12, %v7297_v2  ;;  %v3546_v24 = vsel %vm3544_vm12, %v3534_v41, 2102212464 }
 0x522   :  { %v3563_v31 = vmul.u32 %v3561_v52, %v3558_v22  ;;  %v3930_v30 = vshll.u32 %v3921_v60, %v3928_v21  ;;  %v3931_v26 = vshrl.u32 %v3913_v35, %v3929_v20  ;;  %v3934_v1 = vadd.s32 127, %v3933_v11  ;;  %v8456_v20 = vld [vmem:[#allocation11_spill] sm:$0xff] }
 0x523   :  { %v7488_v48 = vmul.u32 %v3560_v16, %v3559_v23  ;;  %v3946_v39 = vsel %vm7455_vm6, 0, %v3944_v57  ;;  %v7492_v5 = vsub.s32 %v3762_v28, %v3765_v63  ;;  %v3583_v8 = vshrl.u32 %v3552_v43, 16 }
 0x524   :  { %v3566_v7 = vshll.u32 %v3563_v31, 16  ;;  %v3932_v34 = vor.u32 %v3931_v26, %v3930_v30  ;;  %v3935_v37 = vshll.u32 %v3934_v1, 23  ;;  %v3547_v2 = vsel %vm3543_vm4, %v7421_v33, %v3546_v24 }
 0x525   :  { %v3562_v41 = vmul.u32 %v3560_v16, %v3558_v22  ;;  %vm3767_vm12 = vcmp.lt.s32.totalorder %v7492_v5, 0  ;;  %v3768_v60 = vsub.s32 0, %v7492_v5  ;;  %v3565_v50 = vmul.u32 %v3561_v52, %v3559_v23 }
 0x526   :  { %v3582_v40 = vand.u32 65535, %v3552_v43  ;;  %v3936_v9 = vor.u32 4788187, %v3935_v37  ;;  %v3568_v15 = vshll.u32 %v7488_v48, 16  ;;  %v3939_v3 = vcvt.s32.f32 %v3932_v34 }
 0x527   :  { %vm3570_vm8 = vc.u32 %v3562_v41, %v3566_v7  ;;  %v3572_v36 = vadd.s32 %v3566_v7, %v3562_v41  ;;  %v3769_v14 = vsel %vm3767_vm12, %v3768_v60, %v7492_v5  ;;  %v3585_v18 = vmul.u32 %v3583_v8, %v3558_v22 }
 0x528   :  { %v3571_v44 = vsel %vm3570_vm8, 1, %v8295_v19  ;;  %v3937_v51 = vand.u32 2147483647, %v3936_v9  ;;  %v3770_v33 = vclz %v3769_v14  ;;  %v7505_v59 = vsel %vm3389_vm9, %v7079_v0, 920167782 }
 0x529   :  { %v3573_v55 = vadd.s32 %v3571_v44, %v3565_v50  ;;  %vm3574_vm13 = vc.u32 %v3572_v36, %v3568_v15  ;;  %v8455_v28 = vor.u32 %v7047_v58, %v7061_v62  ;;  %v3758_v38 = vadd.s32 %v7430_v10, %v7425_v45  ;;  %v8461_v15 = vld [vmem:[#allocation14_spill] sm:$0xff] }
 0x52a   :  { %v3575_v17 = vsel %vm3574_vm13, 1, %v8295_v19  ;;  %v3940_v47 = vmul.f32 %v3939_v3, %v3937_v51  ;;  %v4389_v12 = vadd.s32 4294967294, %v3770_v33  ;;  %v3586_v46 = vmul.u32 %v3582_v40, %v3559_v23 }
 0x52b   :  { %v7512_v42 = vsel %vm3389_vm9, %v8455_v28, 1326507024  ;;  %v3577_v29 = vadd.s32 %v3575_v17, %v3573_v55  ;;  %v3963_v13 = vadd.s32 3, %v3946_v39  ;;  %v7519_v54 = vsel %vm3542_vm1, %v3545_v25, %v3547_v2 }
 0x52c   :  { %v3584_v35 = vmul.u32 %v3582_v40, %v3558_v22  ;;  %v3588_v58 = vshll.u32 %v3585_v18, 16  ;;  %v3941_v62 = vxor.u32 2147483648, %v3940_v47  ;;  %vm4390_vm3 = vcmp.lt.s32.totalorder %v4389_v12, 0  ;;  %v8460_v40 = vld [vmem:[#allocation24_spill] sm:$0xff] }
 0x52d   :  { %v3567_v16 = vshrl.u32 %v3563_v31, 16  ;;  %v3587_v52 = vmul.u32 %v3583_v8, %v3559_v23  ;;  %v3773_v21 = vsel %vm4390_vm3, 0, %v4389_v12  ;;  %v3590_v57 = vshll.u32 %v3586_v46, 16 }
 0x52e   :  { %vm3592_vm15 = vc.u32 %v3584_v35, %v3588_v58  ;;  %v3594_v45 = vadd.s32 %v3588_v58, %v3584_v35  ;;  %v3942_v10 = vsel %vm3821_vm0, %v3941_v62, %v3940_v47  ;;  %vm3666_vm10 = vcmp.lt.s32.totalorder %v8456_v20, 0 }
 0x52f   :  { %v3774_v11 = vsub.s32 32, %v3773_v21  ;;  %v3778_v43 = vsub.s32 4294967266, %v3773_v21  ;;  %v3578_v32 = vadd.s32 %v3577_v29, %v3567_v16  ;;  %v7527_v22 = vsel %vm7455_vm6, %v6976_v56, %v3942_v10 }
 0x530   :  { %v3775_v63 = vshll.u32 %v7492_v5, %v3773_v21  ;;  %v3593_v23 = vsel %vm3592_vm15, 1, %v8295_v19  ;;  %vm3596_vm14 = vc.u32 %v3594_v45, %v3590_v57  ;;  %v3947_v25 = vmul.f32 %v7527_v22, %v7527_v22 }
 0x531   :  { %v3776_v24 = vshrl.u32 %v3758_v38, %v3774_v11  ;;  %v3779_v31 = vadd.s32 127, %v3778_v43  ;;  %v3595_v30 = vadd.s32 %v3593_v23, %v3587_v52  ;;  %v7533_v26 = vand.u32 3, %v3963_v13  ;;  %v8463_v13 = vld [vmem:[#allocation20_spill] sm:$0xff]  ;;  %v8465_v52 = vld [vmem:[#allocation5_spill] sm:$0xff] }
 0x532   :  { %v8457_v1 = vand.u32 2147483647, %v8456_v20  ;;  %v3788_v53 = vsub.s32 4, %v7475_v49  ;;  %v3569_v5 = vshrl.u32 %v7488_v48, 16  ;;  %v3597_v7 = vsel %vm3596_vm14, 1, %v8295_v19 }
 0x533   :  { %v3948_v8 = vmul.f32 -0.001358992, %v3947_v25  ;;  %v3955_v34 = vmul.f32 -0.00019511016, %v3947_v25  ;;  %v3777_v37 = vor.u32 %v3776_v24, %v3775_v63  ;;  %v3780_v2 = vshll.u32 %v3779_v31, 23 }
 0x534   :  { %vm7537_vm0 = vcmp.le.f32.partialorder %v8457_v1, 0.7853982  ;;  %v7544_v41 = vadd.s32 %v3578_v32, %v3569_v5  ;;  %v3589_v60 = vshrl.u32 %v3585_v18, 16  ;;  %v3599_v50 = vadd.s32 %v3597_v7, %v3595_v30 }
 0x535   :  { %v3354_v9 = vand.u32 2147483647, %v8460_v40  ;;  %v8462_v36 = vmov 1326507024   ;;  %v3949_v14 = vadd.f32 0.041655596, %v3948_v8  ;;  %v7551_v33 = vadd.s32 %v3594_v45, %v3590_v57 }
 0x536   :  { %v7549_v3 = vshrl.u32 %v8462_v36, %v8461_v15  ;;  %v3956_v44 = vadd.f32 0.008332121, %v3955_v34  ;;  %v3781_v51 = vor.u32 4788187, %v3780_v2  ;;  %v3591_v48 = vshrl.u32 %v3586_v46, 16 }
 0x537   :  { %v3600_v55 = vadd.s32 %v3599_v50, %v3589_v60  ;;  %v3602_v28 = vmul.u32 %v7451_v27, %v7519_v54  ;;  %v3950_v38 = vmul.f32 %v3949_v14, %v3947_v25  ;;  %v3784_v47 = vcvt.s32.f32 %v3777_v37 }
 0x538   :  { %v3957_v17 = vmul.f32 %v3956_v44, %v3947_v25  ;;  %v3782_v18 = vand.u32 2147483647, %v3781_v51  ;;  %v3789_v12 = vsel %vm3666_vm10, %v3788_v53, %v7475_v49  ;;  %vm3604_vm2 = vc.u32 %v7544_v41, %v7551_v33 }
 0x539   :  { %v3601_v29 = vadd.s32 %v3600_v55, %v3591_v48  ;;  %v8464_v46 = vmov 2131351028   ;;  %v3951_v58 = vadd.f32 -0.4999988, %v3950_v38  ;;  %vm3969_vm4 = vcmp.eq.s32.totalorder %v7533_v26, 2 }
 0x53a   :  { %v3375_v35 = vshrl.u32 %v8464_v46, %v8463_v13  ;;  %v3958_v62 = vadd.f32 -0.16666654, %v3957_v17  ;;  %v3785_v27 = vmul.f32 %v3784_v47, %v3782_v18  ;;  %v3361_v54 = vand.u32 8388607, %v3354_v9 }
 0x53b   :  { %vm3966_vm6 = vcmp.eq.s32.totalorder %v7533_v26, 0  ;;  %v3605_v16 = vadd.s32 1, %v3601_v29  ;;  %v8466_v49 = vmov 2475754826   ;;  %v3377_v57 = vshll.u32 %v8464_v46, %v8465_v52 }
 0x53c   :  { %v3374_v21 = vshll.u32 %v8466_v49, %v8465_v52  ;;  %v3378_v45 = vshrl.u32 %v8388_v4, %v8463_v13  ;;  %v3952_v10 = vmul.f32 %v3951_v58, %v3947_v25  ;;  %v3959_v11 = vmul.f32 %v3958_v62, %v3947_v25 }
 0x53d   :  { %vm3965_vm1 = vcmp.lt.s32.totalorder %v7533_v26, 2  ;;  %v3786_v43 = vxor.u32 2147483648, %v3785_v27  ;;  %v3791_v32 = vsel %vm7537_vm0, 0, %v3789_v12  ;;  %v3606_v63 = vsel %vm3604_vm2, %v3605_v16, %v3601_v29 }
 0x53e   :  { %v3372_v23 = vshrl.u32 %v8466_v49, %v8463_v13  ;;  %v7580_v24 = vor.u32 %v3375_v35, %v3374_v21  ;;  %v7582_v31 = vor.u32 %v3378_v45, %v3377_v57  ;;  %v3953_v30 = vadd.f32 1.0, %v3952_v10 }
 0x53f   :  { %v3960_v1 = vadd.f32 1.0, %v3959_v11  ;;  %v3787_v25 = vsel %vm3666_vm10, %v3786_v43, %v3785_v27  ;;  %v3607_v53 = vadd.s32 %v3606_v63, %v3602_v28  ;;  %v3362_v7 = vor.u32 8388608, %v3361_v54 }
 0x540   :  { %v7589_v5 = vsel %vm7537_vm0, %v8456_v20, %v3787_v25  ;;  %vm3386_vm5 = vcmp.lt.s32.totalorder %v7077_v6, 1  ;;  %vm3388_vm12 = vcmp.lt.s32.totalorder %v7077_v6, 3  ;;  %v3970_v34 = vxor.u32 2147483648, %v3953_v30 }
 0x541   :  { %v3961_v8 = vmul.f32 %v3960_v1, %v7527_v22  ;;  %v3792_v37 = vmul.f32 %v7589_v5, %v7589_v5  ;;  %v3608_v2 = vadd.s32 536870912, %v3607_v53  ;;  %v3808_v60 = vadd.s32 3, %v3791_v32 }
 0x542   :  { %v3371_v50 = vshll.u32 %v8290_v61, %v8465_v52  ;;  %v3398_v39 = vsel %vm3386_vm5, %v7580_v24, %v7582_v31  ;;  %v3400_v36 = vsel %vm3388_vm12, %v7079_v0, %v7512_v42  ;;  %vm3387_vm8 = vcmp.lt.s32.totalorder %v7077_v6, 2 }
 0x543   :  { %v3967_v22 = vxor.u32 2147483648, %v3961_v8  ;;  %v3793_v14 = vmul.f32 -0.001358992, %v3792_v37  ;;  %v3800_v44 = vmul.f32 -0.00019511016, %v3792_v37  ;;  %v3971_v51 = vsel %vm3969_vm4, %v3970_v34, %v3961_v8 }
 0x544   :  { %v7609_v48 = vshrl.u32 %v3608_v2, 30  ;;  %v3373_v55 = vor.u32 %v3372_v23, %v3371_v50  ;;  %v3401_v28 = vsel %vm3387_vm8, %v3398_v39, %v3400_v36  ;;  %v7615_v0 = vshll.u32 %v3362_v7, 8  ;;  %v8467_v7 = vld [vmem:[#allocation19_spill] sm:$0xff] }
 0x545   :  { %v3968_v38 = vsel %vm3966_vm6, %v3953_v30, %v3967_v22  ;;  %v3794_v17 = vadd.f32 0.041655596, %v3793_v14  ;;  %v3801_v18 = vadd.f32 0.008332121, %v3800_v44  ;;  %vm3962_vm13 = vweird.f32 %v6976_v56 }
 0x546   :  { %v3972_v42 = vsel %vm3965_vm1, %v3968_v38, %v3971_v51  ;;  %v3809_v47 = vand.u32 3, %v3808_v60  ;;  %v3610_v12 = vshll.u32 %v7609_v48, 30  ;;  %v3405_v62 = vand.u32 65535, %v3401_v28 }
 0x547   :  { %v3973_v29 = vsel %vm3962_vm13, nan, %v3972_v42  ;;  %v3795_v35 = vmul.f32 %v3794_v17, %v3792_v37  ;;  %v3802_v58 = vmul.f32 %v3801_v18, %v3792_v37  ;;  %v3394_v54 = vsel %vm3386_vm5, %v3373_v55, %v7580_v24 }
 0x548   :  { %4218 = vmatpush.msra.mxu3 %v3973_v29  ;;  %v7621_v27 = vsub.s32 %v3607_v53, %v3610_v12  ;;  %v3403_v16 = vand.u32 65535, %v7615_v0  ;;  %v3406_v56 = vshrl.u32 %v3401_v28, 16  ;;  %v3396_v21 = vsel %vm3388_vm12, %v7582_v31, %v7505_v59 }
 0x549   :  { %v3796_v52 = vadd.f32 -0.4999988, %v3795_v35  ;;  %v3803_v26 = vadd.f32 -0.16666654, %v3802_v58  ;;  %v3404_v57 = vshrl.u32 %v7615_v0, 16  ;;  %vm3811_vm3 = vcmp.eq.s32.totalorder %v3809_v47, 0 }
 0x54a   :  { %vm3814_vm15 = vcmp.eq.s32.totalorder %v3809_v47, 2  ;;  %vm3612_vm10 = vcmp.lt.s32.totalorder %v7621_v27, 0  ;;  %v3613_v45 = vsub.s32 0, %v7621_v27  ;;  %v3408_v10 = vmul.u32 %v3406_v56, %v3403_v16 }
 0x54b   :  { %v3797_v11 = vmul.f32 %v3796_v52, %v3792_v37  ;;  %v3804_v43 = vmul.f32 %v3803_v26, %v3792_v37  ;;  %vm3810_vm14 = vcmp.lt.s32.totalorder %v3809_v47, 2  ;;  %v3603_v32 = vadd.s32 %v7551_v33, %v7544_v41 }
 0x54c   :  { %v7636_v63 = vmul.u32 %v3405_v62, %v3404_v57  ;;  %vm3807_vm0 = vweird.f32 %v8456_v20  ;;  %v3614_v59 = vsel %vm3612_vm10, %v3613_v45, %v7621_v27  ;;  %v3370_v23 = vshrl.u32 %v8290_v61, %v8463_v13  ;;  %v8471_v20 = vld [vmem:[#allocation31_spill] sm:$0xff] }
 0x54d   :  { %v3397_v30 = vsel %vm3387_vm8, %v3394_v54, %v3396_v21  ;;  %v3411_v1 = vshll.u32 %v3408_v10, 16  ;;  %v3798_v25 = vadd.f32 1.0, %v3797_v11  ;;  %v3805_v53 = vadd.f32 1.0, %v3804_v43 }
 0x54e   :  { %vm3511_vm2 = vcmp.lt.s32.totalorder %v8467_v7, 0  ;;  %v3615_v8 = vclz %v3614_v59  ;;  %v3407_v34 = vmul.u32 %v3405_v62, %v3403_v16  ;;  %v3390_v41 = vsel %vm3386_vm5, %v3370_v23, %v3373_v55 }
 0x54f   :  { %v3391_v33 = vsel %vm3389_vm9, %v7582_v31, 2102212464  ;;  %v3410_v37 = vmul.u32 %v3406_v56, %v3404_v57  ;;  %v3413_v13 = vshll.u32 %v7636_v63, 16  ;;  %v3806_v2 = vmul.f32 %v3805_v53, %v7589_v5 }
 0x550   :  { %v3815_v60 = vxor.u32 2147483648, %v3798_v25  ;;  %v4386_v50 = vadd.s32 4294967294, %v3615_v8  ;;  %vm3415_vm4 = vc.u32 %v3407_v34, %v3411_v1  ;;  %v8468_v39 = vand.u32 2147483647, %v8467_v7 }
 0x551   :  { %v3416_v22 = vsel %vm3415_vm4, 1, %v8295_v19  ;;  %v3417_v14 = vadd.s32 %v3411_v1, %v3407_v34  ;;  %v3427_v44 = vand.u32 65535, %v3397_v30  ;;  %v3428_v51 = vshrl.u32 %v3397_v30, 16 }
 0x552   :  { %vm7654_vm6 = vcmp.le.f32.partialorder %v8468_v39, 0.7853982  ;;  %v3812_v31 = vxor.u32 2147483648, %v3806_v2  ;;  %vm4387_vm9 = vcmp.lt.s32.totalorder %v4386_v50, 0  ;;  %v3392_v5 = vsel %vm3388_vm12, %v7580_v24, %v3391_v33 }
 0x553   :  { %v3418_v55 = vadd.s32 %v3416_v22, %v3410_v37  ;;  %v3618_v28 = vsel %vm4387_vm9, 0, %v4386_v50  ;;  %v3633_v38 = vsub.s32 4, %v7609_v48  ;;  %vm3419_vm1 = vc.u32 %v3417_v14, %v3413_v13  ;;  %v8473_v14 = vld [vmem:[#allocation6_spill] sm:$0xff] }
 0x554   :  { %v3430_v17 = vmul.u32 %v3428_v51, %v3403_v16  ;;  %v3813_v18 = vsel %vm3811_vm3, %v3798_v25, %v3812_v31  ;;  %v3816_v42 = vsel %vm3814_vm15, %v3815_v60, %v3806_v2  ;;  %v3619_v12 = vsub.s32 32, %v3618_v28 }
 0x555   :  { %v3623_v29 = vsub.s32 4294967266, %v3618_v28  ;;  %v3817_v35 = vsel %vm3810_vm14, %v3813_v18, %v3816_v42  ;;  %v3620_v58 = vshll.u32 %v7621_v27, %v3618_v28  ;;  %v3420_v62 = vsel %vm3419_vm1, 1, %v8295_v19 }
 0x556   :  { %v3431_v54 = vmul.u32 %v3427_v44, %v3404_v57  ;;  %v3818_v24 = vsel %vm3807_vm0, nan, %v3817_v35  ;;  %v3621_v56 = vshrl.u32 %v3603_v32, %v3619_v12  ;;  %v3422_v26 = vadd.s32 %v3420_v62, %v3418_v55  ;;  %v8474_v12 = vld [vmem:[#allocation15_spill] sm:$0xff] }
 0x557   :  { %v3624_v52 = vadd.s32 127, %v3623_v29  ;;  %4219 = vmatpush.msra.mxu3 %v3818_v24  ;;  %v3634_v21 = vsel %vm3511_vm2, %v3633_v38, %v7609_v48  ;;  %v3412_v45 = vshrl.u32 %v3408_v10, 16  ;;  %v3429_v11 = vmul.u32 %v3427_v44, %v3403_v16  ;;  %v8476_v62 = vld [vmem:[#allocation7_spill] sm:$0xff] }
 0x558   :  { %v3433_v47 = vshll.u32 %v3430_v17, 16  ;;  %v3622_v43 = vor.u32 %v3621_v56, %v3620_v58  ;;  %v3432_v27 = vmul.u32 %v3428_v51, %v3404_v57  ;;  %v3435_v23 = vshll.u32 %v3431_v54, 16  ;;  %v8475_v58 = vld [vmem:[#allocation8_spill] sm:$0xff] }
 0x559   :  { %v3625_v59 = vshll.u32 %v3624_v52, 23  ;;  %v3423_v30 = vadd.s32 %v3422_v26, %v3412_v45  ;;  %v3199_v25 = vand.u32 2147483647, %v8471_v20  ;;  %v3636_v53 = vsel %vm7654_vm6, 0, %v3634_v21  ;;  %v8477_v45 = vld [vmem:[#allocation13_spill] sm:$0xff] }
 0x55a   :  { %vm3437_vm5 = vc.u32 %v3429_v11, %v3433_v47  ;;  %v3439_v1 = vadd.s32 %v3433_v47, %v3429_v11  ;;  %v3393_v8 = vsel %vm3387_vm8, %v3390_v41, %v3392_v5  ;;  %v3414_v16 = vshrl.u32 %v7636_v63, 16  ;;  %v8472_v63 = vld [vmem:[#allocation12_spill] sm:$0xff]  ;;  %v8478_v47 = vld [vmem:[#allocation23_spill] sm:$0xff] }
 0x55b   :  { %v3626_v32 = vor.u32 4788187, %v3625_v59  ;;  %v3438_v48 = vsel %vm3437_vm5, 1, %v8295_v19  ;;  %v3434_v10 = vshrl.u32 %v3430_v17, 16  ;;  %v3629_v33 = vcvt.s32.f32 %v3622_v43  ;;  %v8479_v43 = vld [vmem:[#allocation18_spill] sm:$0xff] }
 0x55c   :  { %v3440_v34 = vadd.s32 %v3438_v48, %v3432_v27  ;;  %vm3441_vm12 = vc.u32 %v3439_v1, %v3435_v23  ;;  %v3206_v13 = vand.u32 8388607, %v3199_v25  ;;  %v7683_v2 = vadd.s32 %v3423_v30, %v3414_v16 }
 0x55d   :  { %v3627_v57 = vand.u32 2147483647, %v3626_v32  ;;  %v3442_v37 = vsel %vm3441_vm12, 1, %v8295_v19  ;;  %v3436_v60 = vshrl.u32 %v3431_v54, 16  ;;  %v3447_v6 = vmul.u32 %v7615_v0, %v3393_v8 }
 0x55e   :  { %v3444_v50 = vadd.s32 %v3442_v37, %v3440_v34  ;;  %v7686_v39 = vadd.s32 %v3439_v1, %v3435_v23  ;;  %v3216_v22 = vshll.u32 %v8290_v61, %v8472_v63  ;;  %v3217_v44 = vshrl.u32 %v8466_v49, %v8473_v14 }
 0x55f   :  { %v3630_v41 = vmul.f32 %v3629_v33, %v3627_v57  ;;  %v3207_v31 = vor.u32 8388608, %v3206_v13  ;;  %v3219_v5 = vshll.u32 %v8466_v49, %v8472_v63  ;;  %v3220_v55 = vshrl.u32 %v8464_v46, %v8473_v14  ;;  %v8480_v57 = vld [vmem:[#allocation10_spill] sm:$0xff] }
 0x560   :  { %v3445_v51 = vadd.s32 %v3444_v50, %v3434_v10  ;;  %v7696_v38 = vor.u32 %v3217_v44, %v3216_v22  ;;  %v3222_v0 = vshll.u32 %v8464_v46, %v8472_v63  ;;  %v3223_v17 = vshrl.u32 %v8388_v4, %v8473_v14 }
 0x561   :  { %v3631_v28 = vxor.u32 2147483648, %v3630_v41  ;;  %vm3449_vm8 = vc.u32 %v7683_v2, %v7686_v39  ;;  %v7704_v42 = vor.u32 %v3220_v55, %v3219_v5  ;;  %vm3233_vm13 = vcmp.lt.s32.totalorder %v8474_v12, 3 }
 0x562   :  { %v3446_v18 = vadd.s32 %v3445_v51, %v3436_v60  ;;  %v3224_v35 = vor.u32 %v3223_v17, %v3222_v0  ;;  %vm3231_vm3 = vcmp.lt.s32.totalorder %v8474_v12, 1  ;;  %v3245_v54 = vsel %vm3233_vm13, %v8476_v62, %v8475_v58 }
 0x563   :  { %v3632_v29 = vsel %vm3511_vm2, %v3631_v28, %v3630_v41  ;;  %v3239_v52 = vsel %vm3231_vm3, %v7696_v38, %v7704_v42  ;;  %v7723_v26 = vshll.u32 %v3207_v31, 8  ;;  %vm3232_vm15 = vcmp.lt.s32.totalorder %v8474_v12, 2  ;;  %v8482_v41 = vld [vmem:[#allocation30_spill] sm:$0xff] }
 0x564   :  { %v7717_v24 = vsel %vm7654_vm6, %v8467_v7, %v3632_v29  ;;  %v3450_v56 = vadd.s32 1, %v3446_v18  ;;  %v3241_v11 = vsel %vm3233_vm13, %v3224_v35, %v8477_v45  ;;  %v3243_v36 = vsel %vm3231_vm3, %v7704_v42, %v3224_v35 }
 0x565   :  { %v3637_v21 = vmul.f32 %v7717_v24, %v7717_v24  ;;  %v7736_v59 = vor.u32 %v8479_v43, %v8478_v47  ;;  %v3653_v27 = vadd.s32 3, %v3636_v53  ;;  %v3246_v30 = vsel %vm3232_vm15, %v3243_v36, %v3245_v54 }
 0x566   :  { %v3451_v23 = vsel %vm3449_vm8, %v3450_v56, %v3446_v18  ;;  %v7745_v48 = vsel %vm3232_vm15, %v3239_v52, %v3241_v11  ;;  %v3248_v16 = vand.u32 65535, %v7723_v26  ;;  %v7749_v10 = vshrl.u32 %v7723_v26, 16 }
 0x567   :  { %v3638_v1 = vmul.f32 -0.001358992, %v3637_v21  ;;  %v3645_v32 = vmul.f32 -0.00019511016, %v3637_v21  ;;  %v3452_v8 = vadd.s32 %v3451_v23, %v3447_v6  ;;  %v3250_v53 = vand.u32 65535, %v3246_v30 }
 0x568   :  { %v3251_v34 = vshrl.u32 %v3246_v30, 16  ;;  %v8481_v33 = vmov 920167782   ;;  %vm3079_vm10 = vcmp.lt.s32.totalorder %v8482_v41, 4  ;;  %v3654_v6 = vand.u32 3, %v3653_v27 }
 0x569   :  { %v7753_v37 = vshll.u32 %v8481_v33, %v8480_v57  ;;  %v3639_v13 = vadd.f32 0.041655596, %v3638_v1  ;;  %v3646_v60 = vadd.f32 0.008332121, %v3645_v32  ;;  %v3453_v50 = vadd.s32 536870912, %v3452_v8 }
 0x56a   :  { %v7756_v63 = vmul.u32 %v3251_v34, %v3248_v16  ;;  %v7759_v22 = vmul.u32 %v3250_v53, %v7749_v10  ;;  %v3273_v5 = vshrl.u32 %v7745_v48, 16  ;;  %v7769_v28 = vsel %vm3079_vm10, %v7736_v59, 920167782 }
 0x56b   :  { %v3640_v44 = vmul.f32 %v3639_v13, %v3637_v21  ;;  %v3647_v51 = vmul.f32 %v3646_v60, %v3637_v21  ;;  %v7761_v31 = vshrl.u32 %v3453_v50, 30  ;;  %v3075_v55 = vor.u32 %v7549_v3, %v7753_v37 }
 0x56c   :  { %v3252_v0 = vmul.u32 %v3250_v53, %v3248_v16  ;;  %v3256_v17 = vshll.u32 %v7756_v63, 16  ;;  %v3215_v62 = vshrl.u32 %v8290_v61, %v8473_v14  ;;  %vm3656_vm14 = vcmp.eq.s32.totalorder %v3654_v6, 0 }
 0x56d   :  { %v3641_v18 = vadd.f32 -0.4999988, %v3640_v44  ;;  %v3648_v29 = vadd.f32 -0.16666654, %v3647_v51  ;;  %v3455_v58 = vshll.u32 %v7761_v31, 30  ;;  %v3258_v56 = vshll.u32 %v7759_v22, 16 }
 0x56e   :  { %v3236_v54 = vsel %vm3234_vm11, %v3224_v35, 2102212464  ;;  %vm3260_vm0 = vc.u32 %v3252_v0, %v3256_v17  ;;  %v3262_v52 = vadd.s32 %v3256_v17, %v3252_v0  ;;  %vm3655_vm2 = vcmp.lt.s32.totalorder %v3654_v6, 2 }
 0x56f   :  { %v3642_v45 = vmul.f32 %v3641_v18, %v3637_v21  ;;  %v3649_v11 = vmul.f32 %v3648_v29, %v3637_v21  ;;  %v7778_v36 = vsub.s32 %v3452_v8, %v3455_v58  ;;  %v7780_v47 = vmul.u32 %v3273_v5, %v3248_v16 }
 0x570   :  { %vm3652_vm4 = vweird.f32 %v8467_v7  ;;  %v3255_v43 = vmul.u32 %v3251_v34, %v7749_v10  ;;  %v3261_v14 = vsel %vm3260_vm0, 1, %v8295_v19  ;;  %vm3264_vm6 = vc.u32 %v3262_v52, %v3258_v56 }
 0x571   :  { %v3272_v35 = vand.u32 65535, %v7745_v48  ;;  %v3643_v27 = vadd.f32 1.0, %v3642_v45  ;;  %v3650_v23 = vadd.f32 1.0, %v3649_v11  ;;  %vm3356_vm11 = vcmp.lt.s32.totalorder %v8460_v40, 0 }
 0x572   :  { %vm3457_vm9 = vcmp.lt.s32.totalorder %v7778_v36, 0  ;;  %v3458_v21 = vsub.s32 0, %v7778_v36  ;;  %v3235_v30 = vsel %vm3231_vm3, %v3215_v62, %v7696_v38  ;;  %v3237_v1 = vsel %vm3233_vm13, %v7704_v42, %v3236_v54 }
 0x573   :  { %v3263_v32 = vadd.s32 %v3261_v14, %v3255_v43  ;;  %v3265_v8 = vsel %vm3264_vm6, 1, %v8295_v19  ;;  %v3651_v48 = vmul.f32 %v3650_v23, %v7717_v24  ;;  %v3660_v53 = vxor.u32 2147483648, %v3643_v27  ;;  %v8485_v43 = vld [vmem:[#allocation27_spill] sm:$0xff] }
 0x574   :  { %v3459_v34 = vsel %vm3457_vm9, %v3458_v21, %v7778_v36  ;;  %v3278_v33 = vshll.u32 %v7780_v47, 16  ;;  %vm3659_vm1 = vcmp.eq.s32.totalorder %v3654_v6, 2  ;;  %vm7801_vm5 = vcmp.le.f32.partialorder %v3354_v9, 0.7853982 }
 0x575   :  { %v3448_v38 = vadd.s32 %v7686_v39, %v7683_v2  ;;  %v3460_v42 = vclz %v3459_v34  ;;  %v3276_v60 = vmul.u32 %v3272_v35, %v7749_v10  ;;  %v3657_v50 = vxor.u32 2147483648, %v3651_v48 }
 0x576   :  { %v7810_v24 = vsel %vm3232_vm15, %v3235_v30, %v3237_v1  ;;  %v3267_v44 = vadd.s32 %v3265_v8, %v3263_v32  ;;  %v3274_v51 = vmul.u32 %v3272_v35, %v3248_v16  ;;  %v3478_v17 = vsub.s32 4, %v7761_v31 }
 0x577   :  { %v4383_v0 = vadd.s32 4294967294, %v3460_v42  ;;  %v3257_v9 = vshrl.u32 %v7756_v63, 16  ;;  %v3277_v18 = vmul.u32 %v3273_v5, %v7749_v10  ;;  %v3658_v29 = vsel %vm3656_vm14, %v3643_v27, %v3657_v50 }
 0x578   :  { %v3661_v2 = vsel %vm3659_vm1, %v3660_v53, %v3651_v48  ;;  %vm3282_vm12 = vc.u32 %v3274_v51, %v3278_v33  ;;  %v3284_v39 = vadd.s32 %v3278_v33, %v3274_v51  ;;  %v3280_v12 = vshll.u32 %v3276_v60, 16 }
 0x579   :  { %v3662_v58 = vsel %vm3655_vm2, %v3658_v29, %v3661_v2  ;;  %vm4384_vm8 = vcmp.lt.s32.totalorder %v4383_v0, 0  ;;  %v3283_v62 = vsel %vm3282_vm12, 1, %v8295_v19  ;;  %v3268_v56 = vadd.s32 %v3267_v44, %v3257_v9  ;;  %v8486_v29 = vld [vmem:[#allocation26_spill] sm:$0xff] }
 0x57a   :  { %v3663_v16 = vsel %vm3652_vm4, nan, %v3662_v58  ;;  %v3463_v54 = vsel %vm4384_vm8, 0, %v4383_v0  ;;  %v3285_v52 = vadd.s32 %v3283_v62, %v3277_v18  ;;  %v3479_v5 = vsel %vm3356_vm11, %v3478_v17, %v7761_v31  ;;  %v8488_v62 = vld [vmem:[#allocation16_spill] sm:$0xff] }
 0x57b   :  { %4220 = vmatpush.msra.mxu3 %v3663_v16  ;;  %v3464_v63 = vsub.s32 32, %v3463_v54  ;;  %v3468_v10 = vsub.s32 4294967266, %v3463_v54  ;;  %vm3286_vm13 = vc.u32 %v3284_v39, %v3280_v12  ;;  %v3259_v6 = vshrl.u32 %v7759_v22, 16 }
 0x57c   :  { %v3279_v45 = vshrl.u32 %v7780_v47, 16  ;;  %v3287_v11 = vsel %vm3286_vm13, 1, %v8295_v19  ;;  %v3044_v7 = vand.u32 2147483647, %v8485_v43  ;;  %v3465_v14 = vshll.u32 %v7778_v36, %v3463_v54  ;;  %v8489_v54 = vld [vmem:[#allocation21_spill] sm:$0xff] }
 0x57d   :  { %v3466_v35 = vshrl.u32 %v3448_v38, %v3464_v63  ;;  %v3469_v27 = vadd.s32 127, %v3468_v10  ;;  %v3289_v23 = vadd.s32 %v3287_v11, %v3285_v52  ;;  %v3089_v31 = vsel %vm3079_vm10, %v3075_v55, 1326507024 }
 0x57e   :  { %v3481_v22 = vsel %vm7801_vm5, 0, %v3479_v5  ;;  %v7835_v21 = vadd.s32 %v3268_v56, %v3259_v6  ;;  %v3051_v47 = vand.u32 8388607, %v3044_v7  ;;  %v3281_v36 = vshrl.u32 %v3276_v60, 16  ;;  %v8490_v56 = vld [vmem:[#allocation25_spill] sm:$0xff] }
 0x57f   :  { %v3467_v30 = vor.u32 %v3466_v35, %v3465_v14  ;;  %v3470_v1 = vshll.u32 %v3469_v27, 23  ;;  %v3290_v32 = vadd.s32 %v3289_v23, %v3279_v45  ;;  %v7839_v8 = vadd.s32 %v3284_v39, %v3280_v12  ;;  %v8487_v12 = vld [vmem:[#allocation17_spill] sm:$0xff] }
 0x580   :  { %v3292_v3 = vmul.u32 %v7723_v26, %v7810_v24  ;;  %v3052_v37 = vor.u32 8388608, %v3051_v47  ;;  %v3062_v55 = vshrl.u32 %v8466_v49, %v8461_v15  ;;  %v3064_v34 = vshll.u32 %v8466_v49, %v8480_v57 }
 0x581   :  { %v3471_v48 = vor.u32 4788187, %v3470_v1  ;;  %v3291_v53 = vadd.s32 %v3290_v32, %v3281_v36  ;;  %v3065_v33 = vshrl.u32 %v8464_v46, %v8461_v15  ;;  %vm3294_vm3 = vc.u32 %v7835_v21, %v7839_v8 }
 0x582   :  { %v3061_v38 = vshll.u32 %v8290_v61, %v8480_v57  ;;  %v3067_v26 = vshll.u32 %v8464_v46, %v8480_v57  ;;  %v3068_v42 = vshrl.u32 %v8388_v4, %v8461_v15  ;;  %v3474_v50 = vcvt.s32.f32 %v3467_v30 }
 0x583   :  { %v3472_v60 = vand.u32 2147483647, %v3471_v48  ;;  %v3295_v24 = vadd.s32 1, %v3291_v53  ;;  %v7857_v44 = vor.u32 %v3065_v33, %v3064_v34  ;;  %vm3076_vm15 = vcmp.lt.s32.totalorder %v8482_v41, 1 }
 0x584   :  { %v7859_v51 = vor.u32 %v3062_v55, %v3061_v38  ;;  %v3069_v0 = vor.u32 %v3068_v42, %v3067_v26  ;;  %vm3078_vm14 = vcmp.lt.s32.totalorder %v8482_v41, 3  ;;  %v7866_v18 = vshll.u32 %v3052_v37, 8 }
 0x585   :  { %v3475_v17 = vmul.f32 %v3474_v50, %v3472_v60  ;;  %v3296_v9 = vsel %vm3294_vm3, %v3295_v24, %v3291_v53  ;;  %v3090_v57 = vsel %vm3078_vm14, %v7736_v59, %v3089_v31  ;;  %v7869_v2 = vshrl.u32 %v8486_v29, 5 }
 0x586   :  { %v3297_v39 = vadd.s32 %v3296_v9, %v3292_v3  ;;  %vm3077_vm0 = vcmp.lt.s32.totalorder %v8482_v41, 2  ;;  %v3088_v58 = vsel %vm3076_vm15, %v7857_v44, %v3069_v0  ;;  %v7877_v16 = vor.u32 %v8488_v62, %v8487_v12 }
 0x587   :  { %v2920_v52 = vor.u32 %v8490_v56, %v8489_v54  ;;  %v3476_v59 = vxor.u32 2147483648, %v3475_v17  ;;  %v3091_v63 = vsel %vm3077_vm0, %v3088_v58, %v3090_v57  ;;  %v3498_v10 = vadd.s32 3, %v3481_v22 }
 0x588   :  { %v3298_v5 = vadd.s32 536870912, %v3297_v39  ;;  %v3084_v6 = vsel %vm3076_vm15, %v7859_v51, %v7857_v44  ;;  %v3086_v45 = vsel %vm3078_vm14, %v3069_v0, %v7769_v28  ;;  %v3093_v14 = vand.u32 65535, %v7866_v18 }
 0x589   :  { %v3477_v11 = vsel %vm3356_vm11, %v3476_v59, %v3475_v17  ;;  %v3095_v35 = vand.u32 65535, %v3091_v63  ;;  %v3096_v27 = vshrl.u32 %v3091_v63, 16  ;;  %vm2924_vm2 = vcmp.lt.s32.totalorder %v7869_v2, 4 }
 0x58a   :  { %v3480_v23 = vsel %vm7801_vm5, %v8460_v40, %v3477_v11  ;;  %v7897_v31 = vshrl.u32 %v3298_v5, 30  ;;  %v7900_v22 = vshrl.u32 %v7866_v18, 16  ;;  %v7905_v28 = vsel %vm2924_vm2, %v7877_v16, 920167782 }
 0x58b   :  { %v3482_v47 = vmul.f32 %v3480_v23, %v3480_v23  ;;  %v3087_v30 = vsel %vm3077_vm0, %v3084_v6, %v3086_v45  ;;  %v3098_v1 = vmul.u32 %v3096_v27, %v3093_v14  ;;  %v7911_v36 = vsel %vm2924_vm2, %v2920_v52, 1326507024 }
 0x58c   :  { %v7913_v13 = vand.u32 3, %v3498_v10  ;;  %v3300_v32 = vshll.u32 %v7897_v31, 30  ;;  %v7917_v3 = vmul.u32 %v3095_v35, %v7900_v22  ;;  %v3097_v48 = vmul.u32 %v3095_v35, %v3093_v14 }
 0x58d   :  { %v3483_v37 = vmul.f32 -0.001358992, %v3482_v47  ;;  %v3490_v55 = vmul.f32 -0.00019511016, %v3482_v47  ;;  %v3101_v53 = vshll.u32 %v3098_v1, 16  ;;  %v3117_v38 = vand.u32 65535, %v3087_v30 }
 0x58e   :  { %v7919_v34 = vsub.s32 %v3297_v39, %v3300_v32  ;;  %v3081_v33 = vsel %vm3079_vm10, %v3069_v0, 2102212464  ;;  %v3118_v26 = vshrl.u32 %v3087_v30, 16  ;;  %v3100_v50 = vmul.u32 %v3096_v27, %v7900_v22 }
 0x58f   :  { %v3484_v42 = vadd.f32 0.041655596, %v3483_v37  ;;  %v3491_v60 = vadd.f32 0.008332121, %v3490_v55  ;;  %vm3105_vm4 = vc.u32 %v3097_v48, %v3101_v53  ;;  %v3103_v17 = vshll.u32 %v7917_v3, 16 }
 0x590   :  { %vm3302_vm6 = vcmp.lt.s32.totalorder %v7919_v34, 0  ;;  %v3303_v24 = vsub.s32 0, %v7919_v34  ;;  %v3106_v9 = vsel %vm3105_vm4, 1, %v8295_v19  ;;  %v3107_v39 = vadd.s32 %v3101_v53, %v3097_v48 }
 0x591   :  { %v3485_v57 = vmul.f32 %v3484_v42, %v3482_v47  ;;  %v3492_v29 = vmul.f32 %v3491_v60, %v3482_v47  ;;  %v3108_v58 = vadd.s32 %v3106_v9, %v3100_v50  ;;  %v3060_v12 = vshrl.u32 %v8290_v61, %v8461_v15 }
 0x592   :  { %v3304_v0 = vsel %vm3302_vm6, %v3303_v24, %v7919_v34  ;;  %v3120_v62 = vmul.u32 %v3118_v26, %v3093_v14  ;;  %v7932_v54 = vmul.u32 %v3117_v38, %v7900_v22  ;;  %vm3504_vm10 = vcmp.eq.s32.totalorder %v7913_v13, 2 }
 0x593   :  { %v3486_v56 = vadd.f32 -0.4999988, %v3485_v57  ;;  %v3493_v52 = vadd.f32 -0.16666654, %v3492_v29  ;;  %v3305_v59 = vclz %v3304_v0  ;;  %vm3109_vm11 = vc.u32 %v3107_v39, %v3103_v17  ;;  %v8491_v39 = vld [vmem:[#allocation32_spill] sm:$0xff] }
 0x594   :  { %vm3501_vm9 = vcmp.eq.s32.totalorder %v7913_v13, 0  ;;  %v3293_v63 = vadd.s32 %v7839_v8, %v7835_v21  ;;  %v3080_v10 = vsel %vm3076_vm15, %v3060_v12, %v7859_v51  ;;  %v3082_v15 = vsel %vm3078_vm14, %v7857_v44, %v3081_v33 }
 0x595   :  { %v3110_v5 = vsel %vm3109_vm11, 1, %v8295_v19  ;;  %v3487_v6 = vmul.f32 %v3486_v56, %v3482_v47  ;;  %v3494_v45 = vmul.f32 %v3493_v52, %v3482_v47  ;;  %vm3500_vm1 = vcmp.lt.s32.totalorder %v7913_v13, 2 }
 0x596   :  { %v4380_v11 = vadd.s32 4294967294, %v3305_v59  ;;  %v3112_v35 = vadd.s32 %v3110_v5, %v3108_v58  ;;  %v3102_v27 = vshrl.u32 %v3098_v1, 16  ;;  %v3104_v30 = vshrl.u32 %v7917_v3, 16 }
 0x597   :  { %v3119_v21 = vmul.u32 %v3117_v38, %v3093_v14  ;;  %v3123_v8 = vshll.u32 %v3120_v62, 16  ;;  %v3488_v32 = vadd.f32 1.0, %v3487_v6  ;;  %v3495_v37 = vadd.f32 1.0, %v3494_v45  ;;  %v8492_v45 = vld [vmem:[#allocation9_spill] sm:$0xff] }
 0x598   :  { %vm4381_vm5 = vcmp.lt.s32.totalorder %v4380_v11, 0  ;;  %v3125_v51 = vshll.u32 %v7932_v54, 16  ;;  %v3113_v44 = vadd.s32 %v3112_v35, %v3102_v27  ;;  %v3122_v42 = vmul.u32 %v3118_v26, %v7900_v22  ;;  %v8493_v35 = vld [vmem:[#allocation22_spill] sm:$0xff] }
 0x599   :  { %v3308_v55 = vsel %vm4381_vm5, 0, %v4380_v11  ;;  %vm3127_vm12 = vc.u32 %v3119_v21, %v3123_v8  ;;  %v3129_v48 = vadd.s32 %v3123_v8, %v3119_v21  ;;  %v3496_v53 = vmul.f32 %v3495_v37, %v3480_v23 }
 0x59a   :  { %v3505_v47 = vxor.u32 2147483648, %v3488_v32  ;;  %v3309_v33 = vsub.s32 32, %v3308_v55  ;;  %v3313_v60 = vsub.s32 4294967266, %v3308_v55  ;;  %v3124_v1 = vshrl.u32 %v3120_v62, 16 }
 0x59b   :  { %v3128_v3 = vsel %vm3127_vm12, 1, %v8295_v19  ;;  %vm3131_vm8 = vc.u32 %v3129_v48, %v3125_v51  ;;  %v3502_v14 = vxor.u32 2147483648, %v3496_v53  ;;  %v3310_v38 = vshll.u32 %v7919_v34, %v3308_v55 }
 0x59c   :  { %v3311_v50 = vshrl.u32 %v3293_v63, %v3309_v33  ;;  %v3130_v24 = vadd.s32 %v3128_v3, %v3122_v42  ;;  %v3506_v17 = vsel %vm3504_vm10, %v3505_v47, %v3496_v53  ;;  %v3314_v9 = vadd.s32 127, %v3313_v60 }
 0x59d   :  { %v7953_v57 = vadd.s32 %v3113_v44, %v3104_v30  ;;  %v3132_v23 = vsel %vm3131_vm8, 1, %v8295_v19  ;;  %v3503_v22 = vsel %vm3501_vm9, %v3488_v32, %v3502_v14  ;;  %v2889_v58 = vand.u32 2147483647, %v8491_v39 }
 0x59e   :  { %v3312_v26 = vor.u32 %v3311_v50, %v3310_v38  ;;  %v3134_v29 = vadd.s32 %v3132_v23, %v3130_v24  ;;  %vm3497_vm13 = vweird.f32 %v8460_v40  ;;  %v3507_v34 = vsel %vm3500_vm1, %v3503_v22, %v3506_v17 }
 0x59f   :  { %vm3201_vm3 = vcmp.lt.s32.totalorder %v8471_v20, 0  ;;  %v3315_v0 = vshll.u32 %v3314_v9, 23  ;;  %v3508_v12 = vsel %vm3497_vm13, nan, %v3507_v34  ;;  %v3126_v62 = vshrl.u32 %v7932_v54, 16 }
 0x5a0   :  { %v7964_v56 = vadd.s32 %v3129_v48, %v3125_v51  ;;  %v3135_v52 = vadd.s32 %v3134_v29, %v3124_v1  ;;  %4221 = vmatpush.msra.mxu3 %v3508_v12  ;;  %v3323_v63 = vsub.s32 4, %v7897_v31  ;;  %v3083_v5 = vsel %vm3077_vm0, %v3080_v10, %v3082_v15 }
 0x5a1   :  { %v3316_v59 = vor.u32 4788187, %v3315_v0  ;;  %v2896_v40 = vand.u32 8388607, %v2889_v58  ;;  %v3319_v13 = vcvt.s32.f32 %v3312_v26  ;;  %v2907_v54 = vshrl.u32 %v8466_v49, %v8492_v45 }
 0x5a2   :  { %v3136_v6 = vadd.s32 %v3135_v52, %v3126_v62  ;;  %vm3139_vm15 = vc.u32 %v7953_v57, %v7964_v56  ;;  %v2906_v27 = vshll.u32 %v8290_v61, %v8493_v35  ;;  %v2909_v30 = vshll.u32 %v8466_v49, %v8493_v35 }
 0x5a3   :  { %v3317_v11 = vand.u32 2147483647, %v3316_v59  ;;  %v2910_v41 = vshrl.u32 %v8464_v46, %v8492_v45  ;;  %v2897_v15 = vor.u32 8388608, %v2896_v40  ;;  %v2912_v21 = vshll.u32 %v8464_v46, %v8493_v35 }
 0x5a4   :  { %v3140_v10 = vadd.s32 1, %v3136_v6  ;;  %v2913_v8 = vshrl.u32 %v8388_v4, %v8492_v45  ;;  %v3324_v37 = vsel %vm3201_vm3, %v3323_v63, %v7897_v31  ;;  %v3137_v51 = vmul.u32 %v7866_v18, %v3083_v5 }
 0x5a5   :  { %v3320_v32 = vmul.f32 %v3319_v13, %v3317_v11  ;;  %v7989_v55 = vor.u32 %v2910_v41, %v2909_v30  ;;  %v7991_v44 = vor.u32 %v2907_v54, %v2906_v27  ;;  %vm2923_vm14 = vcmp.lt.s32.totalorder %v7869_v2, 3 }
 0x5a6   :  { %v3141_v49 = vsel %vm3139_vm15, %v3140_v10, %v3136_v6  ;;  %v7993_v48 = vor.u32 %v2913_v8, %v2912_v21  ;;  %vm2921_vm0 = vcmp.lt.s32.totalorder %v7869_v2, 1  ;;  %v2935_v4 = vsel %vm2923_vm14, %v7877_v16, %v7911_v36 }
 0x5a7   :  { %v3321_v46 = vxor.u32 2147483648, %v3320_v32  ;;  %v3142_v53 = vadd.s32 %v3141_v49, %v3137_v51  ;;  %vm3200_vm4 = vcmp.le.f32.partialorder %v3199_v25, 0.7853982  ;;  %v8007_v31 = vshll.u32 %v2897_v15, 8 }
 0x5a8   :  { %v2933_v18 = vsel %vm2921_vm0, %v7989_v55, %v7993_v48  ;;  %v3326_v33 = vsel %vm3200_vm4, 0, %v3324_v37  ;;  %vm2922_vm6 = vcmp.lt.s32.totalorder %v7869_v2, 2  ;;  %v2929_v25 = vsel %vm2921_vm0, %v7991_v44, %v7989_v55 }
 0x5a9   :  { %v3322_v47 = vsel %vm3201_vm3, %v3321_v46, %v3320_v32  ;;  %v3143_v42 = vadd.s32 536870912, %v3142_v53  ;;  %v2931_v16 = vsel %vm2923_vm14, %v7993_v48, %v7905_v28  ;;  %v2936_v36 = vsel %vm2922_vm6, %v2933_v18, %v2935_v4 }
 0x5aa   :  { %v3325_v60 = vsel %vm3200_vm4, %v8471_v20, %v3322_v47  ;;  %v2940_v14 = vand.u32 65535, %v2936_v36  ;;  %v3343_v38 = vadd.s32 3, %v3326_v33  ;;  %v2938_v50 = vand.u32 65535, %v8007_v31 }
 0x5ab   :  { %v3327_v1 = vmul.f32 %v3325_v60, %v3325_v60  ;;  %v8023_v3 = vshrl.u32 %v3143_v42, 30  ;;  %v2939_v24 = vshrl.u32 %v8007_v31, 16  ;;  %v2941_v17 = vshrl.u32 %v2936_v36, 16 }
 0x5ac   :  { %v2932_v28 = vsel %vm2922_vm6, %v2929_v25, %v2931_v16  ;;  %v3344_v62 = vand.u32 3, %v3343_v38  ;;  %v2942_v52 = vmul.u32 %v2940_v14, %v2938_v50  ;;  %vm3342_vm1 = vweird.f32 %v8471_v20 }
 0x5ad   :  { %v3328_v9 = vmul.f32 -0.001358992, %v3327_v1  ;;  %v3335_v23 = vmul.f32 -0.00019511016, %v3327_v1  ;;  %v3145_v22 = vshll.u32 %v8023_v3, 30  ;;  %v2943_v26 = vmul.u32 %v2941_v17, %v2938_v50 }
 0x5ae   :  { %v8030_v29 = vmul.u32 %v2940_v14, %v2939_v24  ;;  %v2963_v63 = vshrl.u32 %v2932_v28, 16  ;;  %v2945_v6 = vmul.u32 %v2941_v17, %v2939_v24  ;;  %v2962_v37 = vand.u32 65535, %v2932_v28 }
 0x5af   :  { %v3329_v34 = vadd.f32 0.041655596, %v3328_v9  ;;  %v3336_v0 = vadd.f32 0.008332121, %v3335_v23  ;;  %v3146_v12 = vsub.s32 %v3142_v53, %v3145_v22  ;;  %v2946_v59 = vshll.u32 %v2943_v26, 16 }
 0x5b0   :  { %v2948_v54 = vshll.u32 %v8030_v29, 16  ;;  %vm3345_vm5 = vcmp.lt.s32.totalorder %v3344_v62, 2  ;;  %vm3346_vm12 = vcmp.eq.s32.totalorder %v3344_v62, 0  ;;  %v2965_v4 = vmul.u32 %v2963_v63, %v2938_v50 }
 0x5b1   :  { %v3330_v5 = vmul.f32 %v3329_v34, %v3327_v1  ;;  %v3337_v40 = vmul.f32 %v3336_v0, %v3327_v1  ;;  %vm3147_vm10 = vcmp.lt.s32.totalorder %v3146_v12, 0  ;;  %v3148_v13 = vsub.s32 0, %v3146_v12 }
 0x5b2   :  { %vm2950_vm11 = vc.u32 %v2942_v52, %v2946_v59  ;;  %v2952_v11 = vadd.s32 %v2946_v59, %v2942_v52  ;;  %vm3349_vm8 = vcmp.eq.s32.totalorder %v3344_v62, 2  ;;  %v3138_v18 = vadd.s32 %v7964_v56, %v7953_v57 }
 0x5b3   :  { %v3331_v35 = vadd.f32 -0.4999988, %v3330_v5  ;;  %v3338_v27 = vadd.f32 -0.16666654, %v3337_v40  ;;  %v3149_v30 = vsel %vm3147_vm10, %v3148_v13, %v3146_v12  ;;  %v2951_v41 = vsel %vm2950_vm11, 1, %v8295_v19 }
 0x5b4   :  { %v3150_v10 = vclz %v3149_v30  ;;  %v2953_v15 = vadd.s32 %v2951_v41, %v2945_v6  ;;  %vm2954_vm9 = vc.u32 %v2952_v11, %v2948_v54  ;;  %v2947_v47 = vshrl.u32 %v2943_v26, 16 }
 0x5b5   :  { %v3332_v21 = vmul.f32 %v3331_v35, %v3327_v1  ;;  %v3339_v8 = vmul.f32 %v3338_v27, %v3327_v1  ;;  %v2955_v32 = vsel %vm2954_vm9, 1, %v8295_v19  ;;  %v2966_v16 = vmul.u32 %v2962_v37, %v2939_v24 }
 0x5b6   :  { %v4377_v51 = vadd.s32 4294967294, %v3150_v10  ;;  %v2957_v53 = vadd.s32 %v2955_v32, %v2953_v15  ;;  %v2905_v14 = vshrl.u32 %v8290_v61, %v8492_v45  ;;  %v2968_v38 = vshll.u32 %v2965_v4, 16 }
 0x5b7   :  { %v3333_v49 = vadd.f32 1.0, %v3332_v21  ;;  %v3340_v46 = vadd.f32 1.0, %v3339_v8  ;;  %v2964_v23 = vmul.u32 %v2962_v37, %v2938_v50  ;;  %v2967_v22 = vmul.u32 %v2963_v63, %v2939_v24 }
 0x5b8   :  { %vm4378_vm13 = vcmp.lt.s32.totalorder %v4377_v51, 0  ;;  %v2958_v9 = vadd.s32 %v2957_v53, %v2947_v47  ;;  %v2970_v26 = vshll.u32 %v2966_v16, 16  ;;  %v2926_v50 = vsel %vm2924_vm2, %v7993_v48, 2102212464 }
 0x5b9   :  { %v3341_v33 = vmul.f32 %v3340_v46, %v3325_v60  ;;  %v3350_v42 = vxor.u32 2147483648, %v3333_v49  ;;  %v3153_v25 = vsel %vm4378_vm13, 0, %v4377_v51  ;;  %vm2972_vm3 = vc.u32 %v2964_v23, %v2968_v38 }
 0x5ba   :  { %v3154_v36 = vsub.s32 32, %v3153_v25  ;;  %v3158_v1 = vsub.s32 4294967266, %v3153_v25  ;;  %v3155_v34 = vshll.u32 %v3146_v12, %v3153_v25  ;;  %v2974_v0 = vadd.s32 %v2968_v38, %v2964_v23 }
 0x5bb   :  { %v3347_v17 = vxor.u32 2147483648, %v3341_v33  ;;  %v3351_v28 = vsel %vm3349_vm8, %v3350_v42, %v3341_v33  ;;  %v2973_v61 = vsel %vm2972_vm3, 1, %v8295_v19  ;;  %v2949_v63 = vshrl.u32 %v8030_v29, 16 }
 0x5bc   :  { %v3156_v57 = vshrl.u32 %v3138_v18, %v3154_v36  ;;  %v3159_v56 = vadd.s32 127, %v3158_v1  ;;  %v2975_v24 = vadd.s32 %v2973_v61, %v2967_v22  ;;  %vm2976_vm15 = vc.u32 %v2974_v0, %v2970_v26 }
 0x5bd   :  { %v3348_v60 = vsel %vm3346_vm12, %v3333_v49, %v3347_v17  ;;  %v2977_v62 = vsel %vm2976_vm15, 1, %v8295_v19  ;;  %v2925_v40 = vsel %vm2921_vm0, %v2905_v14, %v7991_v44  ;;  %v2969_v13 = vshrl.u32 %v2965_v4, 16 }
 0x5be   :  { %v3352_v52 = vsel %vm3345_vm5, %v3348_v60, %v3351_v28  ;;  %v3157_v59 = vor.u32 %v3156_v57, %v3155_v34  ;;  %v3160_v5 = vshll.u32 %v3159_v56, 23  ;;  %v2979_v6 = vadd.s32 %v2977_v62, %v2975_v24 }
 0x5bf   :  { %v3353_v45 = vsel %vm3342_vm1, nan, %v3352_v52  ;;  %v2927_v48 = vsel %vm2923_vm14, %v7989_v55, %v2926_v50  ;;  %v2959_v11 = vadd.s32 %v2958_v9, %v2949_v63  ;;  %v2971_v35 = vshrl.u32 %v2966_v16, 16 }
 0x5c0   :  { %4222 = vmatpush.msra.mxu3 %v3353_v45  ;;  %v3161_v12 = vor.u32 4788187, %v3160_v5  ;;  %v3164_v54 = vcvt.s32.f32 %v3157_v59  ;;  %v2980_v27 = vadd.s32 %v2979_v6, %v2969_v13  ;;  %v2978_v41 = vadd.s32 %v2974_v0, %v2970_v26 }
 0x5c1   :  { %v2928_v19 = vsel %vm2922_vm6, %v2925_v40, %v2927_v48  ;;  %vm3046_vm0 = vcmp.lt.s32.totalorder %v8485_v43, 0  ;;  %vm8062_vm4 = vcmp.le.f32.partialorder %v3044_v7, 0.7853982  ;;  %v3168_v8 = vsub.s32 4, %v8023_v3 }
 0x5c2   :  { %v3162_v20 = vand.u32 2147483647, %v3161_v12  ;;  %v2981_v29 = vadd.s32 %v2980_v27, %v2971_v35  ;;  %vm2984_vm2 = vc.u32 %v2959_v11, %v2978_v41  ;;  %v2982_v21 = vmul.u32 %v8007_v31, %v2928_v19 }
 0x5c3   :  { %v3169_v7 = vsel %vm3046_vm0, %v3168_v8, %v8023_v3  ;;  %vm3187_vm6 = vweird.f32 %v8485_v43  ;;  %v2983_v61 = vadd.s32 %v2978_v41, %v2959_v11  ;;  %vm2891_vm5 = vcmp.lt.s32.totalorder %v8491_v39, 0 }
 0x5c4   :  { %v3165_v30 = vmul.f32 %v3164_v54, %v3162_v20  ;;  %v2985_v44 = vadd.s32 1, %v2981_v29  ;;  %v3171_v31 = vsel %vm8062_vm4, 0, %v3169_v7  ;;  %vm2890_vm12 = vcmp.le.f32.partialorder %v2889_v58, 0.7853982 }
 0x5c5   :  { %v3188_v14 = vadd.s32 3, %v3171_v31  ;;  %vm3032_vm15 = vweird.f32 %v8491_v39 }
 0x5c6   :  { %v3166_v10 = vxor.u32 2147483648, %v3165_v30  ;;  %v2986_v32 = vsel %vm2984_vm2, %v2985_v44, %v2981_v29 }
 0x5c7   :  { %v2987_v51 = vadd.s32 %v2986_v32, %v2982_v21  ;;  %v3189_v28 = vand.u32 3, %v3188_v14  ;;  %v4135_v14 = vld [vmem:[%s8130_s8 + $0x30] sm:$0xff] }
 0x5c8   :  { %v3167_v55 = vsel %vm3046_vm0, %v3166_v10, %v3165_v30 }
 0x5c9   :  { %v3170_v2 = vsel %vm8062_vm4, %v8485_v43, %v3167_v55  ;;  %v2988_v53 = vadd.s32 536870912, %v2987_v51  ;;  %vm3191_vm10 = vcmp.eq.s32.totalorder %v3189_v28, 0  ;;  %vm3194_vm11 = vcmp.eq.s32.totalorder %v3189_v28, 2 }
 0x5ca   :  { %v3172_v37 = vmul.f32 %v3170_v2, %v3170_v2  ;;  %vm3190_vm1 = vcmp.lt.s32.totalorder %v3189_v28, 2 }
 0x5cb   :  { %v2989_v47 = vshrl.u32 %v2988_v53, 30 }
 0x5cc   :  { %v3173_v49 = vmul.f32 -0.001358992, %v3172_v37  ;;  %v3180_v46 = vmul.f32 -0.00019511016, %v3172_v37 }
 0x5cd   :  { %v2990_v25 = vshll.u32 %v2989_v47, 30  ;;  %v3013_v35 = vsub.s32 4, %v2989_v47 }
 0x5ce   :  { %v3174_v4 = vadd.f32 0.041655596, %v3173_v49  ;;  %v3181_v18 = vadd.f32 0.008332121, %v3180_v46 }
 0x5cf   :  { %v2991_v1 = vsub.s32 %v2987_v51, %v2990_v25  ;;  %v3014_v29 = vsel %vm2891_vm5, %v3013_v35, %v2989_v47  ;;  %v4130_v25 = vld [vmem:[%s8130_s8 + $0x8] sm:$0xff] }
 0x5d0   :  { %v3175_v33 = vmul.f32 %v3174_v4, %v3172_v37  ;;  %v3182_v42 = vmul.f32 %v3181_v18, %v3172_v37  ;;  %v3016_v15 = vsel %vm2890_vm12, 0, %v3014_v29 }
 0x5d1   :  { %vm2992_vm14 = vcmp.lt.s32.totalorder %v2991_v1, 0  ;;  %v2993_v9 = vsub.s32 0, %v2991_v1  ;;  %v3033_v32 = vadd.s32 3, %v3016_v15 }
 0x5d2   :  { %v3176_v16 = vadd.f32 -0.4999988, %v3175_v33  ;;  %v3183_v36 = vadd.f32 -0.16666654, %v3182_v42  ;;  %v4129_v33 = vld [vmem:[%s8130_s8] sm:$0xff] }
 0x5d3   :  { %v2994_v3 = vsel %vm2992_vm14, %v2993_v9, %v2991_v1  ;;  %v3034_v46 = vand.u32 3, %v3033_v32 }
 0x5d4   :  { %v3177_v38 = vmul.f32 %v3176_v16, %v3172_v37  ;;  %v3184_v17 = vmul.f32 %v3183_v36, %v3172_v37  ;;  %v2995_v34 = vclz %v2994_v3  ;;  %v4131_v16 = vld [vmem:[%s8130_s8 + $0x10] sm:$0xff]  ;;  %v4133_v36 = vld [vmem:[%s8130_s8 + $0x20] sm:$0xff] }
 0x5d5   :  { %vm3036_vm8 = vcmp.eq.s32.totalorder %v3034_v46, 0  ;;  %vm3039_vm13 = vcmp.eq.s32.totalorder %v3034_v46, 2  ;;  %vm3035_vm3 = vcmp.lt.s32.totalorder %v3034_v46, 2 }
 0x5d6   :  { %v3178_v23 = vadd.f32 1.0, %v3177_v38  ;;  %v3185_v22 = vadd.f32 1.0, %v3184_v17  ;;  %v4374_v60 = vadd.s32 4294967294, %v2995_v34  ;;  %v4136_v38 = vld [vmem:[%s8130_s8 + $0x38] sm:$0xff]  ;;  %v4183_v34 = vpop.permute.xlu0 %4182 }
 0x5d8   :  { %v3186_v57 = vmul.f32 %v3185_v22, %v3170_v2  ;;  %v3195_v56 = vxor.u32 2147483648, %v3178_v23  ;;  %vm4375_vm9 = vcmp.lt.s32.totalorder %v4374_v60, 0 }
 0x5d9   :  { %v2998_v59 = vsel %vm4375_vm9, 0, %v4374_v60  ;;  %v4173_v60 = vpop.permute.xlu2 %4172 }
 0x5da   :  { %v3192_v26 = vxor.u32 2147483648, %v3186_v57  ;;  %v3196_v52 = vsel %vm3194_vm11, %v3195_v56, %v3186_v57  ;;  %v2999_v45 = vsub.s32 32, %v2998_v59  ;;  %v3003_v50 = vsub.s32 4294967266, %v2998_v59  ;;  %v4178_v57 = vpop.permute.xlu1 %4177 }
 0x5db   :  { %v3000_v12 = vshll.u32 %v2991_v1, %v2998_v59  ;;  %v4134_v1 = vld [vmem:[%s8130_s8 + $0x28] sm:$0xff] }
 0x5dc   :  { %v3193_v0 = vsel %vm3191_vm10, %v3178_v23, %v3192_v26  ;;  %v3001_v63 = vshrl.u32 %v2983_v61, %v2999_v45  ;;  %v3004_v62 = vadd.s32 127, %v3003_v50  ;;  %v4250_v61 = vld [vmem:[%s8123_s1] sm:$0xff] }
 0x5dd   :  { %v3197_v5 = vsel %vm3190_vm1, %v3193_v0, %v3196_v52 }
 0x5de   :  { %v3198_v24 = vsel %vm3187_vm6, nan, %v3197_v5  ;;  %v3002_v40 = vor.u32 %v3001_v63, %v3000_v12  ;;  %v3005_v13 = vshll.u32 %v3004_v62, 23  ;;  %v4168_v26 = vpop.permute.xlu0 %4167 }
 0x5df   :  { %4223 = vmatpush.msra.mxu3 %v3198_v24 }
 0x5e0   :  { %v3006_v6 = vor.u32 4788187, %v3005_v13  ;;  %v3009_v20 = vcvt.s32.f32 %v3002_v40 }
 0x5e1   :  { %v4158_v40 = vpop.permute.xlu2 %4157 }
 0x5e2   :  { %v3007_v43 = vand.u32 2147483647, %v3006_v6  ;;  %v4163_v5 = vpop.permute.xlu1 %4162 }
 0x5e4   :  { %v3010_v54 = vmul.f32 %v3009_v20, %v3007_v43 }
 0x5e6   :  { %v3011_v48 = vxor.u32 2147483648, %v3010_v54  ;;  %v4153_v43 = vpop.permute.xlu0 %4152 }
 0x5e8   :  { %v3012_v11 = vsel %vm2891_vm5, %v3011_v48, %v3010_v54 }
 0x5e9   :  { %v3015_v27 = vsel %vm2890_vm12, %v8491_v39, %v3012_v11  ;;  %v4132_v39 = vld [vmem:[%s8130_s8 + $0x18] sm:$0xff] }
 0x5ea   :  { %v3017_v30 = vmul.f32 %v3015_v27, %v3015_v27  ;;  %v4148_v48 = vpop.permute.xlu1 %4147 }
 0x5ec   :  { %v3018_v41 = vmul.f32 -0.001358992, %v3017_v30  ;;  %v3025_v19 = vmul.f32 -0.00019511016, %v3017_v30 }
 0x5ee   :  { %v3019_v10 = vadd.f32 0.041655596, %v3018_v41  ;;  %v3026_v44 = vadd.f32 0.008332121, %v3025_v19  ;;  %v4251_v41 = vld [vmem:[%s8132_s10] sm:$0xff] }
 0x5f0   :  { %v3020_v55 = vmul.f32 %v3019_v10, %v3017_v30  ;;  %v3027_v21 = vmul.f32 %v3026_v44, %v3017_v30 }
 0x5f2   :  { %v3021_v8 = vadd.f32 -0.4999988, %v3020_v55  ;;  %v3028_v2 = vadd.f32 -0.16666654, %v3027_v21 }
 0x5f4   :  { %v3022_v37 = vmul.f32 %v3021_v8, %v3017_v30  ;;  %v3029_v51 = vmul.f32 %v3028_v2, %v3017_v30 }
 0x5f6   :  { %v3023_v49 = vadd.f32 1.0, %v3022_v37  ;;  %v3030_v58 = vadd.f32 1.0, %v3029_v51 }
 0x5f8   :  { %v3031_v53 = vmul.f32 %v3030_v58, %v3015_v27  ;;  %v3040_v7 = vxor.u32 2147483648, %v3023_v49 }
 0x5fa   :  { %v3037_v4 = vxor.u32 2147483648, %v3031_v53  ;;  %v3041_v47 = vsel %vm3039_vm13, %v3040_v7, %v3031_v53 }
 0x5fc   :  { %v3038_v18 = vsel %vm3036_vm8, %v3023_v49, %v3037_v4 }
 0x5fd   :  { %v3042_v31 = vsel %vm3035_vm3, %v3038_v18, %v3041_v47 }
 0x5fe   :  { %v3043_v42 = vsel %vm3032_vm15, nan, %v3042_v31 }
 0x5ff   :  { %4224 = vmatpush.msra.mxu3 %v3043_v42 }
 0x600   :  { %4397 = vmatmul.msk.f32.vlgmr.msra.gmra.mxu3 %vm1462_vm7, %v4129_v33 }
 0x608   :  { %4398 = vmatmul.msk.f32.gmra.mxu3 %vm1462_vm7, %v4130_v25 }
 0x610   :  { %4399 = vmatmul.msk.f32.gmra.mxu3 %vm1462_vm7, %v4131_v16 }
 0x618   :  { %4400 = vmatmul.msk.f32.gmra.mxu3 %vm1462_vm7, %v4132_v39 }
 0x620   :  { %4401 = vmatmul.msk.f32.gmra.mxu3 %vm1462_vm7, %v4133_v36 }
 0x628   :  { %4402 = vmatmul.msk.f32.gmra.mxu3 %vm1462_vm7, %v4134_v1 }
 0x630   :  { %4403 = vmatmul.msk.f32.gmra.mxu3 %vm1462_vm7, %v4135_v14 }
 0x638   :  { %4404 = vmatmul.msk.f32.gmra.mxu3 %vm1462_vm7, %v4136_v38 }
 0x683   :  { %v4226_v17 = vpop.f32.mrf.mxu3 }
 0x684   :  { %v4227_v11 = vadd.f32 %v4226_v17, %v4148_v48 }
 0x686   :  { %v4252_v30 = vmul.f32 %v4250_v61, %v4227_v11 }
 0x68b   :  { %v4229_v9 = vpop.f32.mrf.mxu3 }
 0x68c   :  { %v4230_v20 = vadd.f32 %v4229_v9, %v4153_v43 }
 0x68e   :  { %v4253_v27 = vmul.f32 %v4250_v61, %v4230_v20 }
 0x693   :  { %v4232_v23 = vpop.f32.mrf.mxu3 }
 0x694   :  { %v4233_v13 = vadd.f32 %v4232_v23, %v4158_v40 }
 0x696   :  { %v4254_v35 = vmul.f32 %v4250_v61, %v4233_v13 }
 0x69b   :  { %v4235_v22 = vpop.f32.mrf.mxu3 }
 0x69c   :  { %v4236_v63 = vadd.f32 %v4235_v22, %v4163_v5 }
 0x69e   :  { %v4255_v54 = vmul.f32 %v4250_v61, %v4236_v63 }
 0x6a3   :  { %v4238_v3 = vpop.f32.mrf.mxu3 }
 0x6a4   :  { %v4239_v24 = vadd.f32 %v4238_v3, %v4168_v26 }
 0x6a6   :  { %v4256_v6 = vmul.f32 %v4250_v61, %v4239_v24 }
 0x6ab   :  { %v4241_v28 = vpop.f32.mrf.mxu3 }
 0x6ac   :  { %v4242_v45 = vadd.f32 %v4241_v28, %v4173_v60 }
 0x6ae   :  { %v4257_v62 = vmul.f32 %v4250_v61, %v4242_v45 }
 0x6b3   :  { %v4244_v56 = vpop.f32.mrf.mxu3 }
 0x6b4   :  { %v4245_v52 = vadd.f32 %v4244_v56, %v4178_v57 }
 0x6b6   :  { %v4258_v12 = vmul.f32 %v4250_v61, %v4245_v52 }
 0x6bb   :  { %v4247_v0 = vpop.f32.mrf.mxu3 }
 0x6bc   :  { %v4248_v59 = vadd.f32 %v4247_v0, %v4183_v34 }
 0x6be   :  { %v4259_v50 = vmul.f32 %v4250_v61, %v4248_v59 }
 0x6c0   :  { %4271 = vmatpush.msrb.mxu0 %v4259_v50 }
 0x6c2   :  { %4272 = vmatpush.msrb.mxu0 %v4258_v12 }
 0x6c4   :  { %4273 = vmatpush.msrb.mxu0 %v4257_v62 }
 0x6c6   :  { %4274 = vmatpush.msrb.mxu0 %v4256_v6 }
 0x6c8   :  { %4275 = vmatpush.msrb.mxu0 %v4255_v54 }
 0x6ca   :  { %4276 = vmatpush.msrb.mxu0 %v4254_v35 }
 0x6cc   :  { %4277 = vmatpush.msrb.mxu0 %v4253_v27 }
 0x6ce   :  { %4278 = vmatpush.msrb.mxu0 %v4252_v30 }
 0x6cf   :  { %4405 = vmatmul.msk.f32.vlgmr.msrb.gmra.mxu0 %vm1462_vm7, %v4251_v41 }
 0x74c   :  { %v4280_v19 = vpop.f32.mrf.mxu0 }
 0x74d   :  { %4283 = vst [vmem:[#allocation2] sm:$0xff] %v4280_v19 }
 0x74e   :  { %4294 = dma.vmem_to_hbm [thread:$0]  %s4290_s29, 128, %s4292_s12, [#allocation3]  }
 0x74f   :  { %4441 = dma.done.wait [#allocation3], 128  }
 0x750   :  { %4442 = vsyncadd [#allocation3], 4294967168 }
 0x751   :  { %4299 = vsyncpa [#allocation3], 1 }

</bundles_post_ra>
